<compile_context>
chip_gen: v7x
topology: tpu7x:2x2x1
jax: 0.10.0
libtpu: 0.0.40
codegen_flags: <defaults>
</compile_context>

<pallas_src>
import jax
import jax.numpy as jnp
from jax import lax
from jax.experimental import pallas as pl
from jax.experimental.pallas import tpu as pltpu

EPS = 1e-5


def _fused_block_kernel(x_ref, w1_ref, wsk_ref, w2_ref, b1_ref, bsk_ref, b2_ref,
                        o_ref, h1pad_ref):
    """Fused ResidualBlock forward for one image.

    x_ref:     (1, H+2, W+2, Cin)  bf16  halo-padded NHWC input tile
    w1_ref:    (9, Cin, Cout)      bf16  conv1 weights, BN1 folded, tap-major
    wsk_ref:   (Cin, Cout)         bf16  1x1 skip conv weights
    w2_ref:    (9, Cout, Cout)     bf16  conv2 weights, BN2 folded, tap-major
    b*_ref:    (1, Cout)           f32   folded biases
    o_ref:     (1, H*W, Cout)      f32   output tile
    h1pad_ref: (H+2, W+2, Cout)    bf16  VMEM scratch for h1 with a zero halo
    """
    Hp2, Wp2, Cin = x_ref.shape[1], x_ref.shape[2], x_ref.shape[3]
    H, W = Hp2 - 2, Wp2 - 2
    Cout = o_ref.shape[2]
    HW = H * W

    xp = x_ref[0]                       # (H+2, W+2, Cin) bf16
    w1 = w1_ref[...]                    # (9, Cin, Cout)
    w2 = w2_ref[...]                    # (9, Cout, Cout)

    # ---- conv1 + bn1 (folded) + relu: 9 shifted matmuls, f32 accumulation ----
    acc1 = jnp.zeros((HW, Cout), jnp.float32)
    for t in range(9):
        dy, dx = t // 3, t % 3
        tap = xp[dy:dy + H, dx:dx + W, :].reshape(HW, Cin)
        acc1 = acc1 + jnp.dot(tap, w1[t], preferred_element_type=jnp.float32)
    h1 = jnp.maximum(acc1 + b1_ref[...], 0.0)          # (HW, Cout) f32
    # dropout1: identity in eval mode

    # ---- 1x1 skip conv on the un-padded (centre) pixels ----
    xc = xp[1:H + 1, 1:W + 1, :].reshape(HW, Cin)
    res = jnp.dot(xc, wsk_ref[...],
                  preferred_element_type=jnp.float32) + bsk_ref[...]

    # ---- stage h1 (bf16) into a zero-haloed VMEM scratch for conv2 ----
    h1pad_ref[...] = jnp.zeros_like(h1pad_ref)
    h1pad_ref[pl.ds(1, H), pl.ds(1, W), :] = (
        h1.astype(h1pad_ref.dtype).reshape(H, W, Cout))
    hp = h1pad_ref[...]                                 # (H+2, W+2, Cout) bf16

    # ---- conv2 + bn2 (folded), residual add, relu ----
    acc2 = jnp.zeros((HW, Cout), jnp.float32)
    for t in range(9):
        dy, dx = t // 3, t % 3
        tap = hp[dy:dy + H, dx:dx + W, :].reshape(HW, Cout)
        acc2 = acc2 + jnp.dot(tap, w2[t], preferred_element_type=jnp.float32)
    # dropout2: identity in eval mode
    out = jnp.maximum(acc2 + b2_ref[...] + res, 0.0)
    o_ref[...] = out.reshape(1, HW, Cout).astype(o_ref.dtype)


def prepare_packed_params(params):
    """Fold BN running stats into conv weights/biases and pack for the kernel.

    Runs ONCE per weight update, outside the jitted forward (perf review item).
    """
    cout, cin = params["w1"].shape[0], params["w1"].shape[1]
    s1 = params["bn1_gamma"] / jnp.sqrt(params["bn1_var"] + EPS)
    t1 = params["bn1_beta"] - params["bn1_mean"] * s1
    s2 = params["bn2_gamma"] / jnp.sqrt(params["bn2_var"] + EPS)
    t2 = params["bn2_beta"] - params["bn2_mean"] * s2

    def pack3x3(w, scale):
        # (Co, Ci, 3, 3) -> (9, Ci, Co), tap index t = ky*3+kx, BN scale folded.
        return (jnp.transpose(w, (2, 3, 1, 0)).reshape(9, w.shape[1], w.shape[0])
                * scale[None, None, :])

    if "wskip" in params:                 # in_channels != out_channels
        wsk = jnp.transpose(params["wskip"][:, :, 0, 0], (1, 0))
        bsk = params["bskip"]
    else:                                 # identity skip connection
        wsk = jnp.eye(cin, dtype=jnp.float32)
        bsk = jnp.zeros((cout,), jnp.float32)

    return {
        "w1": pack3x3(params["w1"], s1).astype(jnp.bfloat16),
        "b1": (s1 * params["b1"] + t1).reshape(1, cout).astype(jnp.float32),
        "w2": pack3x3(params["w2"], s2).astype(jnp.bfloat16),
        "b2": (s2 * params["b2"] + t2).reshape(1, cout).astype(jnp.float32),
        "wskip": wsk.astype(jnp.bfloat16),
        "bskip": bsk.reshape(1, cout).astype(jnp.float32),
    }


def residual_block_forward(x_nchw, packed):
    """x_nchw: (N, Cin, H, W) float32. Returns (N, Cout, H, W) float32."""
    N, Cin, H, W = x_nchw.shape
    Cout = packed["b1"].shape[-1]

    # NCHW -> NHWC, bf16 storage, 1-pixel zero halo (fused by XLA, read once).
    x_nhwc = jnp.transpose(x_nchw, (0, 2, 3, 1)).astype(jnp.bfloat16)
    x_pad = jnp.pad(x_nhwc, ((0, 0), (1, 1), (1, 1), (0, 0)))

    out_flat = pl.pallas_call(
        _fused_block_kernel,
        out_shape=jax.ShapeDtypeStruct((N, H * W, Cout), jnp.float32),
        grid=(N,),
        in_specs=[
            pl.BlockSpec((1, H + 2, W + 2, Cin), lambda n: (n, 0, 0, 0)),
            pl.BlockSpec((9, Cin, Cout), lambda n: (0, 0, 0)),
            pl.BlockSpec((Cin, Cout), lambda n: (0, 0)),
            pl.BlockSpec((9, Cout, Cout), lambda n: (0, 0, 0)),
            pl.BlockSpec((1, Cout), lambda n: (0, 0)),
            pl.BlockSpec((1, Cout), lambda n: (0, 0)),
            pl.BlockSpec((1, Cout), lambda n: (0, 0)),
        ],
        out_specs=pl.BlockSpec((1, H * W, Cout), lambda n: (n, 0, 0)),
        scratch_shapes=[pltpu.VMEM((H + 2, W + 2, Cout), jnp.bfloat16)],
        compiler_params=pltpu.CompilerParams(
            dimension_semantics=("parallel",),
            vmem_limit_bytes=32 * 1024 * 1024,
        ),
    )(x_pad, packed["w1"], packed["wskip"], packed["w2"],
      packed["b1"], packed["bskip"], packed["b2"])

    out = out_flat.reshape(N, H, W, Cout)
    return jnp.transpose(out, (0, 3, 1, 2))


def reference_forward(x, params):
    """Plain-JAX NCHW f32 reference (eval-mode BN, identity dropout)."""
    dn = ("NCHW", "OIHW", "NCHW")

    def conv(x, w, b, pad):
        y = lax.conv_general_dilated(x, w, (1, 1), [(pad, pad), (pad, pad)],
                                     dimension_numbers=dn)
        return y + b.reshape(1, -1, 1, 1)

    def bn(y, g, be, m, v):
        g, be, m, v = (a.reshape(1, -1, 1, 1) for a in (g, be, m, v))
        return (y - m) / jnp.sqrt(v + EPS) * g + be

    res = conv(x, params["wskip"], params["bskip"], 0)
    out = jax.nn.relu(bn(conv(x, params["w1"], params["b1"], 1),
                         params["bn1_gamma"], params["bn1_beta"],
                         params["bn1_mean"], params["bn1_var"]))
    out = bn(conv(out, params["w2"], params["b2"], 1),
             params["bn2_gamma"], params["bn2_beta"],
             params["bn2_mean"], params["bn2_var"])
    return jax.nn.relu(out + res)


def make_params(key, cin, cout):
    ks = jax.random.split(key, 12)
    return {
        "w1": 0.2 * jax.random.normal(ks[0], (cout, cin, 3, 3), jnp.float32),
        "b1": 0.1 * jax.random.normal(ks[1], (cout,), jnp.float32),
        "w2": 0.2 * jax.random.normal(ks[2], (cout, cout, 3, 3), jnp.float32),
        "b2": 0.1 * jax.random.normal(ks[3], (cout,), jnp.float32),
        "wskip": 0.2 * jax.random.normal(ks[4], (cout, cin, 1, 1), jnp.float32),
        "bskip": 0.1 * jax.random.normal(ks[5], (cout,), jnp.float32),
        "bn1_gamma": 1.0 + 0.1 * jax.random.normal(ks[6], (cout,), jnp.float32),
        "bn1_beta": 0.1 * jax.random.normal(ks[7], (cout,), jnp.float32),
        "bn1_mean": 0.1 * jax.random.normal(ks[8], (cout,), jnp.float32),
        "bn1_var": 0.5 + jnp.abs(jax.random.normal(ks[9], (cout,), jnp.float32)),
        "bn2_gamma": 1.0 + 0.1 * jax.random.normal(ks[10], (cout,), jnp.float32),
        "bn2_beta": 0.1 * jax.random.normal(ks[11], (cout,), jnp.float32),
        "bn2_mean": jnp.zeros((cout,), jnp.float32),
        "bn2_var": jnp.ones((cout,), jnp.float32),
    }


if __name__ == "__main__":
    key = jax.random.PRNGKey(0)
    k_x, k_p = jax.random.split(key)

    N, Cin, Cout, H, W = 2, 4, 8, 16, 16
    x = jax.random.normal(k_x, (N, Cin, H, W), jnp.float32)
    params = make_params(k_p, Cin, Cout)

    # Weight packing / BN folding done once, outside the jitted forward.
    packed = jax.tree_util.tree_map(jax.block_until_ready,
                                    prepare_packed_params(params))

    fwd = jax.jit(residual_block_forward)
    out = jax.block_until_ready(fwd(x, packed))
    ref = jax.block_until_ready(reference_forward(x, params))

    assert out.shape == (N, Cout, H, W)
    max_diff = float(jnp.max(jnp.abs(out - ref)))
    # bf16 operand storage (f32 accumulation): tolerance loosened accordingly.
    assert bool(jnp.allclose(out, ref, atol=5e-2, rtol=2e-2)), (
        f"max abs diff {max_diff}")

    print("KERNEL_OK")
</pallas_src>

<mosaic_0001>
module attributes {stable_mosaic.version = 11 : i64} {
  func.func @_fused_block_kernel(%arg0: i32, %arg1: memref<1x18x18x4xbf16, #tpu.memory_space<vmem>>, %arg2: memref<9x4x8xbf16, #tpu.memory_space<vmem>>, %arg3: memref<4x8xbf16, #tpu.memory_space<vmem>>, %arg4: memref<9x8x8xbf16, #tpu.memory_space<vmem>>, %arg5: memref<1x8xf32, #tpu.memory_space<vmem>>, %arg6: memref<1x8xf32, #tpu.memory_space<vmem>>, %arg7: memref<1x8xf32, #tpu.memory_space<vmem>>, %arg8: memref<1x256x8xf32, #tpu.memory_space<vmem>>, %arg9: memref<18x18x8xbf16, #tpu.memory_space<vmem>>) attributes {dimension_semantics = [#tpu.dimension_semantics<parallel>], iteration_bounds = array<i64: 2>, scalar_prefetch = 0 : i64, scratch_operands = 1 : i64, tpu.core_type = #tpu.core_type<tc>, window_params = [{transform_indices = @transform_0, window_bounds = array<i64: 1, 18, 18, 4>}, {pipeline_mode = #tpu.pipeline_mode<synchronous>, transform_indices = @transform_1, window_bounds = array<i64: 9, 4, 8>}, {pipeline_mode = #tpu.pipeline_mode<synchronous>, transform_indices = @transform_2, window_bounds = array<i64: 4, 8>}, {pipeline_mode = #tpu.pipeline_mode<synchronous>, transform_indices = @transform_3, window_bounds = array<i64: 9, 8, 8>}, {pipeline_mode = #tpu.pipeline_mode<synchronous>, transform_indices = @transform_4, window_bounds = array<i64: 1, 8>}, {pipeline_mode = #tpu.pipeline_mode<synchronous>, transform_indices = @transform_5, window_bounds = array<i64: 1, 8>}, {pipeline_mode = #tpu.pipeline_mode<synchronous>, transform_indices = @transform_6, window_bounds = array<i64: 1, 8>}, {transform_indices = @transform_7, window_bounds = array<i64: 1, 256, 8>}]} {
    %c0 = arith.constant 0 : index
    %c0_0 = arith.constant 0 : index
    %c0_1 = arith.constant 0 : index
    %c0_2 = arith.constant 0 : index
    %0 = vector.load %arg1[%c0, %c0_0, %c0_1, %c0_2] : memref<1x18x18x4xbf16, #tpu.memory_space<vmem>>, vector<1x18x18x4xbf16>
    %1 = vector.shape_cast %0 : vector<1x18x18x4xbf16> to vector<18x18x4xbf16>
    %c0_3 = arith.constant 0 : index
    %c0_4 = arith.constant 0 : index
    %c0_5 = arith.constant 0 : index
    %2 = vector.load %arg2[%c0_3, %c0_4, %c0_5] : memref<9x4x8xbf16, #tpu.memory_space<vmem>>, vector<9x4x8xbf16>
    %c0_6 = arith.constant 0 : index
    %c0_7 = arith.constant 0 : index
    %c0_8 = arith.constant 0 : index
    %3 = vector.load %arg4[%c0_6, %c0_7, %c0_8] : memref<9x8x8xbf16, #tpu.memory_space<vmem>>, vector<9x8x8xbf16>
    %cst = arith.constant 0.000000e+00 : f32
    %4 = vector.broadcast %cst : f32 to vector<256x8xf32>
    %5 = vector.extract_strided_slice %1 {offsets = [0, 0, 0], sizes = [16, 16, 4], strides = [1, 1, 1]} : vector<18x18x4xbf16> to vector<16x16x4xbf16>
    %6 = vector.shape_cast %5 : vector<16x16x4xbf16> to vector<256x4xbf16>
    %7 = vector.extract_strided_slice %2 {offsets = [0, 0, 0], sizes = [1, 4, 8], strides = [1, 1, 1]} : vector<9x4x8xbf16> to vector<1x4x8xbf16>
    %8 = vector.shape_cast %7 : vector<1x4x8xbf16> to vector<4x8xbf16>
    %cst_9 = arith.constant dense<0.000000e+00> : vector<256x8xf32>
    %9 = tpu.matmul %6, %8, %cst_9 {dimension_numbers = #tpu.dot_dimension_numbers<[1], [0], [0], [1], [0, 0, 1, 1], [], []>} : vector<256x4xbf16>, vector<4x8xbf16>, vector<256x8xf32> -> vector<256x8xf32>
    %10 = arith.addf %4, %9 : vector<256x8xf32>
    %11 = vector.extract_strided_slice %1 {offsets = [0, 1, 0], sizes = [16, 16, 4], strides = [1, 1, 1]} : vector<18x18x4xbf16> to vector<16x16x4xbf16>
    %12 = vector.shape_cast %11 : vector<16x16x4xbf16> to vector<256x4xbf16>
    %13 = vector.extract_strided_slice %2 {offsets = [1, 0, 0], sizes = [1, 4, 8], strides = [1, 1, 1]} : vector<9x4x8xbf16> to vector<1x4x8xbf16>
    %14 = vector.shape_cast %13 : vector<1x4x8xbf16> to vector<4x8xbf16>
    %cst_10 = arith.constant dense<0.000000e+00> : vector<256x8xf32>
    %15 = tpu.matmul %12, %14, %cst_10 {dimension_numbers = #tpu.dot_dimension_numbers<[1], [0], [0], [1], [0, 0, 1, 1], [], []>} : vector<256x4xbf16>, vector<4x8xbf16>, vector<256x8xf32> -> vector<256x8xf32>
    %16 = arith.addf %10, %15 : vector<256x8xf32>
    %17 = vector.extract_strided_slice %1 {offsets = [0, 2, 0], sizes = [16, 16, 4], strides = [1, 1, 1]} : vector<18x18x4xbf16> to vector<16x16x4xbf16>
    %18 = vector.shape_cast %17 : vector<16x16x4xbf16> to vector<256x4xbf16>
    %19 = vector.extract_strided_slice %2 {offsets = [2, 0, 0], sizes = [1, 4, 8], strides = [1, 1, 1]} : vector<9x4x8xbf16> to vector<1x4x8xbf16>
    %20 = vector.shape_cast %19 : vector<1x4x8xbf16> to vector<4x8xbf16>
    %cst_11 = arith.constant dense<0.000000e+00> : vector<256x8xf32>
    %21 = tpu.matmul %18, %20, %cst_11 {dimension_numbers = #tpu.dot_dimension_numbers<[1], [0], [0], [1], [0, 0, 1, 1], [], []>} : vector<256x4xbf16>, vector<4x8xbf16>, vector<256x8xf32> -> vector<256x8xf32>
    %22 = arith.addf %16, %21 : vector<256x8xf32>
    %23 = vector.extract_strided_slice %1 {offsets = [1, 0, 0], sizes = [16, 16, 4], strides = [1, 1, 1]} : vector<18x18x4xbf16> to vector<16x16x4xbf16>
    %24 = vector.shape_cast %23 : vector<16x16x4xbf16> to vector<256x4xbf16>
    %25 = vector.extract_strided_slice %2 {offsets = [3, 0, 0], sizes = [1, 4, 8], strides = [1, 1, 1]} : vector<9x4x8xbf16> to vector<1x4x8xbf16>
    %26 = vector.shape_cast %25 : vector<1x4x8xbf16> to vector<4x8xbf16>
    %cst_12 = arith.constant dense<0.000000e+00> : vector<256x8xf32>
    %27 = tpu.matmul %24, %26, %cst_12 {dimension_numbers = #tpu.dot_dimension_numbers<[1], [0], [0], [1], [0, 0, 1, 1], [], []>} : vector<256x4xbf16>, vector<4x8xbf16>, vector<256x8xf32> -> vector<256x8xf32>
    %28 = arith.addf %22, %27 : vector<256x8xf32>
    %29 = vector.extract_strided_slice %1 {offsets = [1, 1, 0], sizes = [16, 16, 4], strides = [1, 1, 1]} : vector<18x18x4xbf16> to vector<16x16x4xbf16>
    %30 = vector.shape_cast %29 : vector<16x16x4xbf16> to vector<256x4xbf16>
    %31 = vector.extract_strided_slice %2 {offsets = [4, 0, 0], sizes = [1, 4, 8], strides = [1, 1, 1]} : vector<9x4x8xbf16> to vector<1x4x8xbf16>
    %32 = vector.shape_cast %31 : vector<1x4x8xbf16> to vector<4x8xbf16>
    %cst_13 = arith.constant dense<0.000000e+00> : vector<256x8xf32>
    %33 = tpu.matmul %30, %32, %cst_13 {dimension_numbers = #tpu.dot_dimension_numbers<[1], [0], [0], [1], [0, 0, 1, 1], [], []>} : vector<256x4xbf16>, vector<4x8xbf16>, vector<256x8xf32> -> vector<256x8xf32>
    %34 = arith.addf %28, %33 : vector<256x8xf32>
    %35 = vector.extract_strided_slice %1 {offsets = [1, 2, 0], sizes = [16, 16, 4], strides = [1, 1, 1]} : vector<18x18x4xbf16> to vector<16x16x4xbf16>
    %36 = vector.shape_cast %35 : vector<16x16x4xbf16> to vector<256x4xbf16>
    %37 = vector.extract_strided_slice %2 {offsets = [5, 0, 0], sizes = [1, 4, 8], strides = [1, 1, 1]} : vector<9x4x8xbf16> to vector<1x4x8xbf16>
    %38 = vector.shape_cast %37 : vector<1x4x8xbf16> to vector<4x8xbf16>
    %cst_14 = arith.constant dense<0.000000e+00> : vector<256x8xf32>
    %39 = tpu.matmul %36, %38, %cst_14 {dimension_numbers = #tpu.dot_dimension_numbers<[1], [0], [0], [1], [0, 0, 1, 1], [], []>} : vector<256x4xbf16>, vector<4x8xbf16>, vector<256x8xf32> -> vector<256x8xf32>
    %40 = arith.addf %34, %39 : vector<256x8xf32>
    %41 = vector.extract_strided_slice %1 {offsets = [2, 0, 0], sizes = [16, 16, 4], strides = [1, 1, 1]} : vector<18x18x4xbf16> to vector<16x16x4xbf16>
    %42 = vector.shape_cast %41 : vector<16x16x4xbf16> to vector<256x4xbf16>
    %43 = vector.extract_strided_slice %2 {offsets = [6, 0, 0], sizes = [1, 4, 8], strides = [1, 1, 1]} : vector<9x4x8xbf16> to vector<1x4x8xbf16>
    %44 = vector.shape_cast %43 : vector<1x4x8xbf16> to vector<4x8xbf16>
    %cst_15 = arith.constant dense<0.000000e+00> : vector<256x8xf32>
    %45 = tpu.matmul %42, %44, %cst_15 {dimension_numbers = #tpu.dot_dimension_numbers<[1], [0], [0], [1], [0, 0, 1, 1], [], []>} : vector<256x4xbf16>, vector<4x8xbf16>, vector<256x8xf32> -> vector<256x8xf32>
    %46 = arith.addf %40, %45 : vector<256x8xf32>
    %47 = vector.extract_strided_slice %1 {offsets = [2, 1, 0], sizes = [16, 16, 4], strides = [1, 1, 1]} : vector<18x18x4xbf16> to vector<16x16x4xbf16>
    %48 = vector.shape_cast %47 : vector<16x16x4xbf16> to vector<256x4xbf16>
    %49 = vector.extract_strided_slice %2 {offsets = [7, 0, 0], sizes = [1, 4, 8], strides = [1, 1, 1]} : vector<9x4x8xbf16> to vector<1x4x8xbf16>
    %50 = vector.shape_cast %49 : vector<1x4x8xbf16> to vector<4x8xbf16>
    %cst_16 = arith.constant dense<0.000000e+00> : vector<256x8xf32>
    %51 = tpu.matmul %48, %50, %cst_16 {dimension_numbers = #tpu.dot_dimension_numbers<[1], [0], [0], [1], [0, 0, 1, 1], [], []>} : vector<256x4xbf16>, vector<4x8xbf16>, vector<256x8xf32> -> vector<256x8xf32>
    %52 = arith.addf %46, %51 : vector<256x8xf32>
    %53 = vector.extract_strided_slice %1 {offsets = [2, 2, 0], sizes = [16, 16, 4], strides = [1, 1, 1]} : vector<18x18x4xbf16> to vector<16x16x4xbf16>
    %54 = vector.shape_cast %53 : vector<16x16x4xbf16> to vector<256x4xbf16>
    %55 = vector.extract_strided_slice %2 {offsets = [8, 0, 0], sizes = [1, 4, 8], strides = [1, 1, 1]} : vector<9x4x8xbf16> to vector<1x4x8xbf16>
    %56 = vector.shape_cast %55 : vector<1x4x8xbf16> to vector<4x8xbf16>
    %cst_17 = arith.constant dense<0.000000e+00> : vector<256x8xf32>
    %57 = tpu.matmul %54, %56, %cst_17 {dimension_numbers = #tpu.dot_dimension_numbers<[1], [0], [0], [1], [0, 0, 1, 1], [], []>} : vector<256x4xbf16>, vector<4x8xbf16>, vector<256x8xf32> -> vector<256x8xf32>
    %58 = arith.addf %52, %57 : vector<256x8xf32>
    %c0_18 = arith.constant 0 : index
    %c0_19 = arith.constant 0 : index
    %59 = vector.load %arg5[%c0_18, %c0_19] : memref<1x8xf32, #tpu.memory_space<vmem>>, vector<1x8xf32>
    %60 = vector.broadcast %59 : vector<1x8xf32> to vector<256x8xf32>
    %61 = arith.addf %58, %60 : vector<256x8xf32>
    %cst_20 = arith.constant 0.000000e+00 : f32
    %62 = vector.broadcast %cst_20 : f32 to vector<256x8xf32>
    %63 = arith.maximumf %61, %62 : vector<256x8xf32>
    %64 = vector.extract_strided_slice %1 {offsets = [1, 1, 0], sizes = [16, 16, 4], strides = [1, 1, 1]} : vector<18x18x4xbf16> to vector<16x16x4xbf16>
    %65 = vector.shape_cast %64 : vector<16x16x4xbf16> to vector<256x4xbf16>
    %c0_21 = arith.constant 0 : index
    %c0_22 = arith.constant 0 : index
    %66 = vector.load %arg3[%c0_21, %c0_22] : memref<4x8xbf16, #tpu.memory_space<vmem>>, vector<4x8xbf16>
    %cst_23 = arith.constant dense<0.000000e+00> : vector<256x8xf32>
    %67 = tpu.matmul %65, %66, %cst_23 {dimension_numbers = #tpu.dot_dimension_numbers<[1], [0], [0], [1], [0, 0, 1, 1], [], []>} : vector<256x4xbf16>, vector<4x8xbf16>, vector<256x8xf32> -> vector<256x8xf32>
    %c0_24 = arith.constant 0 : index
    %c0_25 = arith.constant 0 : index
    %68 = vector.load %arg6[%c0_24, %c0_25] : memref<1x8xf32, #tpu.memory_space<vmem>>, vector<1x8xf32>
    %69 = vector.broadcast %68 : vector<1x8xf32> to vector<256x8xf32>
    %70 = arith.addf %67, %69 : vector<256x8xf32>
    %cst_26 = arith.constant 0.000000e+00 : bf16
    %71 = vector.broadcast %cst_26 : bf16 to vector<18x18x8xbf16>
    %c0_27 = arith.constant 0 : index
    %c0_28 = arith.constant 0 : index
    %c0_29 = arith.constant 0 : index
    %72 = vector.load %arg9[%c0_27, %c0_28, %c0_29] : memref<18x18x8xbf16, #tpu.memory_space<vmem>>, vector<18x18x8xbf16>
    tpu.vector_store %arg9[%c0_27, %c0_28, %c0_29], %71 {strides = array<i32>} : memref<18x18x8xbf16, #tpu.memory_space<vmem>>, vector<18x18x8xbf16>,
    %73 = arith.truncf %63 : vector<256x8xf32> to vector<256x8xbf16>
    %74 = vector.shape_cast %73 : vector<256x8xbf16> to vector<16x16x8xbf16>
    %c1 = arith.constant 1 : index
    %c1_30 = arith.constant 1 : index
    %c0_31 = arith.constant 0 : index
    %75 = vector.load %arg9[%c1, %c1_30, %c0_31] : memref<18x18x8xbf16, #tpu.memory_space<vmem>>, vector<16x16x8xbf16>
    tpu.vector_store %arg9[%c1, %c1_30, %c0_31], %74 {strides = array<i32>} : memref<18x18x8xbf16, #tpu.memory_space<vmem>>, vector<16x16x8xbf16>,
    %c0_32 = arith.constant 0 : index
    %c0_33 = arith.constant 0 : index
    %c0_34 = arith.constant 0 : index
    %76 = vector.load %arg9[%c0_32, %c0_33, %c0_34] : memref<18x18x8xbf16, #tpu.memory_space<vmem>>, vector<18x18x8xbf16>
    %cst_35 = arith.constant 0.000000e+00 : f32
    %77 = vector.broadcast %cst_35 : f32 to vector<256x8xf32>
    %78 = vector.extract_strided_slice %76 {offsets = [0, 0, 0], sizes = [16, 16, 8], strides = [1, 1, 1]} : vector<18x18x8xbf16> to vector<16x16x8xbf16>
    %79 = vector.shape_cast %78 : vector<16x16x8xbf16> to vector<256x8xbf16>
    %80 = vector.extract_strided_slice %3 {offsets = [0, 0, 0], sizes = [1, 8, 8], strides = [1, 1, 1]} : vector<9x8x8xbf16> to vector<1x8x8xbf16>
    %81 = vector.shape_cast %80 : vector<1x8x8xbf16> to vector<8x8xbf16>
    %cst_36 = arith.constant dense<0.000000e+00> : vector<256x8xf32>
    %82 = tpu.matmul %79, %81, %cst_36 {dimension_numbers = #tpu.dot_dimension_numbers<[1], [0], [0], [1], [0, 0, 1, 1], [], []>} : vector<256x8xbf16>, vector<8x8xbf16>, vector<256x8xf32> -> vector<256x8xf32>
    %83 = arith.addf %77, %82 : vector<256x8xf32>
    %84 = vector.extract_strided_slice %76 {offsets = [0, 1, 0], sizes = [16, 16, 8], strides = [1, 1, 1]} : vector<18x18x8xbf16> to vector<16x16x8xbf16>
    %85 = vector.shape_cast %84 : vector<16x16x8xbf16> to vector<256x8xbf16>
    %86 = vector.extract_strided_slice %3 {offsets = [1, 0, 0], sizes = [1, 8, 8], strides = [1, 1, 1]} : vector<9x8x8xbf16> to vector<1x8x8xbf16>
    %87 = vector.shape_cast %86 : vector<1x8x8xbf16> to vector<8x8xbf16>
    %cst_37 = arith.constant dense<0.000000e+00> : vector<256x8xf32>
    %88 = tpu.matmul %85, %87, %cst_37 {dimension_numbers = #tpu.dot_dimension_numbers<[1], [0], [0], [1], [0, 0, 1, 1], [], []>} : vector<256x8xbf16>, vector<8x8xbf16>, vector<256x8xf32> -> vector<256x8xf32>
    %89 = arith.addf %83, %88 : vector<256x8xf32>
    %90 = vector.extract_strided_slice %76 {offsets = [0, 2, 0], sizes = [16, 16, 8], strides = [1, 1, 1]} : vector<18x18x8xbf16> to vector<16x16x8xbf16>
    %91 = vector.shape_cast %90 : vector<16x16x8xbf16> to vector<256x8xbf16>
    %92 = vector.extract_strided_slice %3 {offsets = [2, 0, 0], sizes = [1, 8, 8], strides = [1, 1, 1]} : vector<9x8x8xbf16> to vector<1x8x8xbf16>
    %93 = vector.shape_cast %92 : vector<1x8x8xbf16> to vector<8x8xbf16>
    %cst_38 = arith.constant dense<0.000000e+00> : vector<256x8xf32>
    %94 = tpu.matmul %91, %93, %cst_38 {dimension_numbers = #tpu.dot_dimension_numbers<[1], [0], [0], [1], [0, 0, 1, 1], [], []>} : vector<256x8xbf16>, vector<8x8xbf16>, vector<256x8xf32> -> vector<256x8xf32>
    %95 = arith.addf %89, %94 : vector<256x8xf32>
    %96 = vector.extract_strided_slice %76 {offsets = [1, 0, 0], sizes = [16, 16, 8], strides = [1, 1, 1]} : vector<18x18x8xbf16> to vector<16x16x8xbf16>
    %97 = vector.shape_cast %96 : vector<16x16x8xbf16> to vector<256x8xbf16>
    %98 = vector.extract_strided_slice %3 {offsets = [3, 0, 0], sizes = [1, 8, 8], strides = [1, 1, 1]} : vector<9x8x8xbf16> to vector<1x8x8xbf16>
    %99 = vector.shape_cast %98 : vector<1x8x8xbf16> to vector<8x8xbf16>
    %cst_39 = arith.constant dense<0.000000e+00> : vector<256x8xf32>
    %100 = tpu.matmul %97, %99, %cst_39 {dimension_numbers = #tpu.dot_dimension_numbers<[1], [0], [0], [1], [0, 0, 1, 1], [], []>} : vector<256x8xbf16>, vector<8x8xbf16>, vector<256x8xf32> -> vector<256x8xf32>
    %101 = arith.addf %95, %100 : vector<256x8xf32>
    %102 = vector.extract_strided_slice %76 {offsets = [1, 1, 0], sizes = [16, 16, 8], strides = [1, 1, 1]} : vector<18x18x8xbf16> to vector<16x16x8xbf16>
    %103 = vector.shape_cast %102 : vector<16x16x8xbf16> to vector<256x8xbf16>
    %104 = vector.extract_strided_slice %3 {offsets = [4, 0, 0], sizes = [1, 8, 8], strides = [1, 1, 1]} : vector<9x8x8xbf16> to vector<1x8x8xbf16>
    %105 = vector.shape_cast %104 : vector<1x8x8xbf16> to vector<8x8xbf16>
    %cst_40 = arith.constant dense<0.000000e+00> : vector<256x8xf32>
    %106 = tpu.matmul %103, %105, %cst_40 {dimension_numbers = #tpu.dot_dimension_numbers<[1], [0], [0], [1], [0, 0, 1, 1], [], []>} : vector<256x8xbf16>, vector<8x8xbf16>, vector<256x8xf32> -> vector<256x8xf32>
    %107 = arith.addf %101, %106 : vector<256x8xf32>
    %108 = vector.extract_strided_slice %76 {offsets = [1, 2, 0], sizes = [16, 16, 8], strides = [1, 1, 1]} : vector<18x18x8xbf16> to vector<16x16x8xbf16>
    %109 = vector.shape_cast %108 : vector<16x16x8xbf16> to vector<256x8xbf16>
    %110 = vector.extract_strided_slice %3 {offsets = [5, 0, 0], sizes = [1, 8, 8], strides = [1, 1, 1]} : vector<9x8x8xbf16> to vector<1x8x8xbf16>
    %111 = vector.shape_cast %110 : vector<1x8x8xbf16> to vector<8x8xbf16>
    %cst_41 = arith.constant dense<0.000000e+00> : vector<256x8xf32>
    %112 = tpu.matmul %109, %111, %cst_41 {dimension_numbers = #tpu.dot_dimension_numbers<[1], [0], [0], [1], [0, 0, 1, 1], [], []>} : vector<256x8xbf16>, vector<8x8xbf16>, vector<256x8xf32> -> vector<256x8xf32>
    %113 = arith.addf %107, %112 : vector<256x8xf32>
    %114 = vector.extract_strided_slice %76 {offsets = [2, 0, 0], sizes = [16, 16, 8], strides = [1, 1, 1]} : vector<18x18x8xbf16> to vector<16x16x8xbf16>
    %115 = vector.shape_cast %114 : vector<16x16x8xbf16> to vector<256x8xbf16>
    %116 = vector.extract_strided_slice %3 {offsets = [6, 0, 0], sizes = [1, 8, 8], strides = [1, 1, 1]} : vector<9x8x8xbf16> to vector<1x8x8xbf16>
    %117 = vector.shape_cast %116 : vector<1x8x8xbf16> to vector<8x8xbf16>
    %cst_42 = arith.constant dense<0.000000e+00> : vector<256x8xf32>
    %118 = tpu.matmul %115, %117, %cst_42 {dimension_numbers = #tpu.dot_dimension_numbers<[1], [0], [0], [1], [0, 0, 1, 1], [], []>} : vector<256x8xbf16>, vector<8x8xbf16>, vector<256x8xf32> -> vector<256x8xf32>
    %119 = arith.addf %113, %118 : vector<256x8xf32>
    %120 = vector.extract_strided_slice %76 {offsets = [2, 1, 0], sizes = [16, 16, 8], strides = [1, 1, 1]} : vector<18x18x8xbf16> to vector<16x16x8xbf16>
    %121 = vector.shape_cast %120 : vector<16x16x8xbf16> to vector<256x8xbf16>
    %122 = vector.extract_strided_slice %3 {offsets = [7, 0, 0], sizes = [1, 8, 8], strides = [1, 1, 1]} : vector<9x8x8xbf16> to vector<1x8x8xbf16>
    %123 = vector.shape_cast %122 : vector<1x8x8xbf16> to vector<8x8xbf16>
    %cst_43 = arith.constant dense<0.000000e+00> : vector<256x8xf32>
    %124 = tpu.matmul %121, %123, %cst_43 {dimension_numbers = #tpu.dot_dimension_numbers<[1], [0], [0], [1], [0, 0, 1, 1], [], []>} : vector<256x8xbf16>, vector<8x8xbf16>, vector<256x8xf32> -> vector<256x8xf32>
    %125 = arith.addf %119, %124 : vector<256x8xf32>
    %126 = vector.extract_strided_slice %76 {offsets = [2, 2, 0], sizes = [16, 16, 8], strides = [1, 1, 1]} : vector<18x18x8xbf16> to vector<16x16x8xbf16>
    %127 = vector.shape_cast %126 : vector<16x16x8xbf16> to vector<256x8xbf16>
    %128 = vector.extract_strided_slice %3 {offsets = [8, 0, 0], sizes = [1, 8, 8], strides = [1, 1, 1]} : vector<9x8x8xbf16> to vector<1x8x8xbf16>
    %129 = vector.shape_cast %128 : vector<1x8x8xbf16> to vector<8x8xbf16>
    %cst_44 = arith.constant dense<0.000000e+00> : vector<256x8xf32>
    %130 = tpu.matmul %127, %129, %cst_44 {dimension_numbers = #tpu.dot_dimension_numbers<[1], [0], [0], [1], [0, 0, 1, 1], [], []>} : vector<256x8xbf16>, vector<8x8xbf16>, vector<256x8xf32> -> vector<256x8xf32>
    %131 = arith.addf %125, %130 : vector<256x8xf32>
    %c0_45 = arith.constant 0 : index
    %c0_46 = arith.constant 0 : index
    %132 = vector.load %arg7[%c0_45, %c0_46] : memref<1x8xf32, #tpu.memory_space<vmem>>, vector<1x8xf32>
    %133 = vector.broadcast %132 : vector<1x8xf32> to vector<256x8xf32>
    %134 = arith.addf %131, %133 : vector<256x8xf32>
    %135 = arith.addf %134, %70 : vector<256x8xf32>
    %cst_47 = arith.constant 0.000000e+00 : f32
    %136 = vector.broadcast %cst_47 : f32 to vector<256x8xf32>
    %137 = arith.maximumf %135, %136 : vector<256x8xf32>
    %138 = vector.shape_cast %137 : vector<256x8xf32> to vector<1x256x8xf32>
    %c0_48 = arith.constant 0 : index
    %c0_49 = arith.constant 0 : index
    %c0_50 = arith.constant 0 : index
    %139 = vector.load %arg8[%c0_48, %c0_49, %c0_50] : memref<1x256x8xf32, #tpu.memory_space<vmem>>, vector<1x256x8xf32>
    tpu.vector_store %arg8[%c0_48, %c0_49, %c0_50], %138 {strides = array<i32>} : memref<1x256x8xf32, #tpu.memory_space<vmem>>, vector<1x256x8xf32>,
    return
  }
  func.func @transform_0(%arg0: i32) -> (i32, i32, i32, i32) {
    %c0_i32 = arith.constant 0 : i32
    %c0_i32_0 = arith.constant 0 : i32
    %c0_i32_1 = arith.constant 0 : i32
    %c0_i32_2 = arith.constant 0 : i32
    return %arg0, %c0_i32, %c0_i32_0, %c0_i32_1 : i32, i32, i32, i32
  }
  func.func @transform_1(%arg0: i32) -> (i32, i32, i32) {
    %c0_i32 = arith.constant 0 : i32
    %c0_i32_0 = arith.constant 0 : i32
    %c0_i32_1 = arith.constant 0 : i32
    %c0_i32_2 = arith.constant 0 : i32
    return %c0_i32, %c0_i32_0, %c0_i32_1 : i32, i32, i32
  }
  func.func @transform_2(%arg0: i32) -> (i32, i32) {
    %c0_i32 = arith.constant 0 : i32
    %c0_i32_0 = arith.constant 0 : i32
    %c0_i32_1 = arith.constant 0 : i32
    return %c0_i32, %c0_i32_0 : i32, i32
  }
  func.func @transform_3(%arg0: i32) -> (i32, i32, i32) {
    %c0_i32 = arith.constant 0 : i32
    %c0_i32_0 = arith.constant 0 : i32
    %c0_i32_1 = arith.constant 0 : i32
    %c0_i32_2 = arith.constant 0 : i32
    return %c0_i32, %c0_i32_0, %c0_i32_1 : i32, i32, i32
  }
  func.func @transform_4(%arg0: i32) -> (i32, i32) {
    %c0_i32 = arith.constant 0 : i32
    %c0_i32_0 = arith.constant 0 : i32
    %c0_i32_1 = arith.constant 0 : i32
    return %c0_i32, %c0_i32_0 : i32, i32
  }
  func.func @transform_5(%arg0: i32) -> (i32, i32) {
    %c0_i32 = arith.constant 0 : i32
    %c0_i32_0 = arith.constant 0 : i32
    %c0_i32_1 = arith.constant 0 : i32
    return %c0_i32, %c0_i32_0 : i32, i32
  }
  func.func @transform_6(%arg0: i32) -> (i32, i32) {
    %c0_i32 = arith.constant 0 : i32
    %c0_i32_0 = arith.constant 0 : i32
    %c0_i32_1 = arith.constant 0 : i32
    return %c0_i32, %c0_i32_0 : i32, i32
  }
  func.func @transform_7(%arg0: i32) -> (i32, i32, i32) {
    %c0_i32 = arith.constant 0 : i32
    %c0_i32_0 = arith.constant 0 : i32
    %c0_i32_1 = arith.constant 0 : i32
    return %arg0, %c0_i32, %c0_i32_0 : i32, i32, i32
  }
}

</mosaic_0001>

<bundles_post_ra>
// kernel: residual_block_forward.1
= control target key start
LH: loop header
LB: loop body
LE: loop exit
PB: predicated region body
PF: predicated region fallthrough
CT: control target
= control target key end

     0   :  { %s8940_s24 = smov 0   ;;  %s11192_s0 = inlined_call_operand.vmem [shape: bf16[2,18,18,4], index: 0, kind: input, shape index: {}]   ;;  %s11193_s1 = inlined_call_operand.vmem [shape: bf16[9,4,8], index: 1, kind: input, shape index: {}]   ;;  %s11194_s2 = inlined_call_operand.vmem [shape: bf16[4,8], index: 2, kind: input, shape index: {}]   ;;  %s11195_s3 = inlined_call_operand.vmem [shape: bf16[9,8,8], index: 3, kind: input, shape index: {}]   ;;  %s11196_s4 = inlined_call_operand.vmem [shape: f32[1,8], index: 4, kind: input, shape index: {}]   ;;  %s11197_s5 = inlined_call_operand.vmem [shape: f32[1,8], index: 5, kind: input, shape index: {}]   ;;  %s11198_s6 = inlined_call_operand.vmem [shape: f32[1,8], index: 6, kind: input, shape index: {}]   ;;  %s11199_s7 = inlined_call_operand.vmem [shape: f32[2,256,8], index: 7, kind: output, shape index: {}]  }
   0x1 LB: > { %s6714_s25 = sadd.s32 4294967295, %s8897_s24   ;;  %p6718_p0 = scmp.ge.s32.totalorder %s8897_s24, 1  ;;  %s8897_s24 = sphi %s8940_s24, %s17_s24  }
   0x2   : > { %p237_p1 = scmp.lt.s32.totalorder %s8897_s24, 3 }
   0x4   : > { %p238_p2 = pnand %p6718_p0, %p237_p1 }
   0x6   : > { %241 = sbr.rel (%p238_p2) target bundleno = 1649 (0x671), region = 48 }
   0xd   : > { %v335_v0 = vld [vmem:[%s11193_s1 + $0x2] sm:$0x3]  ;;  %vm836_vm0 = vcmask 1041408   ;;  %p269_p3 = scmp.lt.s32.totalorder %s6714_s25, 1  ;;  %v334_v2 = vld [vmem:[%s11193_s1] sm:$0x3] }
   0xe   : > { %8819 = vmatprep.subr.msk.bf16.mxu0 %vm836_vm0, %v335_v0  ;;  %v838_v1 = vsel %vm836_vm0, %v335_v0, 0  ;;  %vm352_vm1 = vsmask.f32 3328  ;;  %vm353_vm2 = vsmask.f32 7440  ;;  %v11273_v27 = vmov 0 }
   0xf   : > { %7564 = vmatpush3.bf16.msra.mxu0 %v838_v1  ;;  %s11368_s25 = smov (!%p269_p3, %s6714_s25), 1  ;;  %vm8998_vm3 = vmor %vm352_vm1, %vm353_vm2  ;;  %vm787_vm4 = vcmask 31744   ;;  %v1130_v35 = vsel %vm836_vm0, %v334_v2, 0  ;;  %vm1309_vm5 = vcmask 1042432   ;;  %vm1310_vm6 = vcmask 1046532  }
  0x10   : > { %8820 = vmatprep.subr.msk.bf16.mxu0 %vm836_vm0, %v334_v2  ;;  %s8839_s30 = smul.u32 216, %s11368_s25  ;;  %v11274_v27 = vsel %vm8998_vm3, 4294967295, %v11273_v27  ;;  %vm9380_vm7 = vmor %vm1309_vm5, %vm1310_vm6  ;;  %vm3239_vm8 = vcmask 60416   ;;  %vm3242_vm9 = vcmask 57344   ;;  %vm4367_vm10 = vcmask 1043456   ;;  %s7207_s9 = sshll.u32 %s11368_s25, 8 }
  0x11   : > { %11275 = vst [vmem:[#allocation4_spill] sm:$0xff] %v11274_v27  ;;  %vm4318_vm11 = vcmask 64512   ;;  %vm3716_vm12 = vsmask.f32 7938  ;;  %vm3391_vm13 = vsmask.f32 256  ;;  %s11060_s12 = scalar_lea.vmem %s11199_s7, %s7207_s9 }
  0x12   : > { %s8963_s10 = scalar_lea.vmem %s11192_s0, %s8839_s30  ;;  %vm3392_vm14 = vsmask.f32 4368  ;;  %vm10001_vm15 = vmand %vm3239_vm8, %vm3716_vm12 }
  0x13   : > { %v8966_v3 = vld [vmem:[%s8963_s10] sm:$0xf]  ;;  %v8969_v4 = vld [vmem:[%s8963_s10 + $0x4] sm:$0xf]  ;;  %v8972_v5 = vld [vmem:[%s8963_s10 + $0x8] sm:$0x1] }
  0x14   : > { %11272 = vst [vmem:[#allocation3_spill] sm:$0xff] %v8972_v5  ;;  %v356_v6 = vshrl.u32 %v8966_v3, 16  ;;  %v359_v7 = vshll.u32 %v8966_v3, 16  ;;  %v365_v8 = vshll.u32 %v8969_v4, 16  ;;  %v369_v9 = vshrl.u32 %v8969_v4, 16  ;;  %vm10014_vm1 = vmand %vm3242_vm9, %vm3391_vm13 }
  0x15   : > { %v8979_v10 = vld [vmem:[%s8963_s10 + $0xc] sm:$0xf]  ;;  %v375_v11 = vshll.u32 %v8972_v5, 16  ;;  %v8983_v12 = vld [vmem:[%s8963_s10 + $0x10] sm:$0xf] }
  0x16   : > { %v8986_v13 = vld [vmem:[%s8963_s10 + $0x14] sm:$0x1]  ;;  %v358_v14 = vrot.slane %v356_v6, 4  ;;  %v361_v15 = vrot.slane %v359_v7, 5  ;;  %v367_v16 = vrot.slane %v365_v8, 5  ;;  %v371_v17 = vrot.slane %v369_v9, 4 }
  0x17   : > { %v377_v18 = vrot.slane %v375_v11, 5  ;;  %v380_v19 = vshrl.u32 %v8979_v10, 16  ;;  %v383_v20 = vshll.u32 %v8979_v10, 16  ;;  %v389_v21 = vshll.u32 %v8983_v12, 16  ;;  %v8994_v26 = vld [vmem:[%s8963_s10 + $0x18] sm:$0xf] }
  0x18   : > { %v362_v22 = vor.u32 %v361_v15, %v358_v14  ;;  %v372_v23 = vor.u32 %v371_v17, %v367_v16  ;;  %v393_v24 = vshrl.u32 %v8983_v12, 16  ;;  %v399_v25 = vshll.u32 %v8986_v13, 16  ;;  %v9003_v31 = vld [vmem:[%s8963_s10 + $0x1c] sm:$0xf]  ;;  %v9007_v38 = vld [vmem:[%s8963_s10 + $0x20] sm:$0x1] }
  0x19   : > { %v382_v28 = vrot.slane %v380_v19, 4  ;;  %v385_v29 = vrot.slane %v383_v20, 5  ;;  %v391_v30 = vrot.slane %v389_v21, 5  ;;  %11276 = vst [vmem:[#allocation5_spill] sm:$0xff] %v9007_v38  ;;  %v404_v39 = vshrl.u32 %v8994_v26, 16 }
  0x1a   : > { %v363_v32 = vrot.slane %v362_v22, 4  ;;  %v373_v33 = vrot.slane %v372_v23, 4  ;;  %v395_v34 = vrot.slane %v393_v24, 4  ;;  %v401_v37 = vrot.slane %v399_v25, 5  ;;  %v9017_v45 = vld [vmem:[%s8963_s10 + $0x24] sm:$0xf] }
  0x1b   : > { %v386_v36 = vor.u32 %v385_v29, %v382_v28  ;;  %v407_v40 = vshll.u32 %v8994_v26, 16  ;;  %v413_v44 = vshll.u32 %v9003_v31, 16  ;;  %v406_v48 = vrot.slane %v404_v39, 4  ;;  %v9020_v50 = vld [vmem:[%s8963_s10 + $0x28] sm:$0xf] }
  0x1c   : > { %v368_v41 = vsel %vm8998_vm3, %v363_v32, %v367_v16  ;;  %v378_v42 = vsel %vm8998_vm3, %v373_v33, %v377_v18  ;;  %v396_v43 = vor.u32 %v395_v34, %v391_v30  ;;  %v417_v53 = vshrl.u32 %v9003_v31, 16  ;;  %v9028_v57 = vld [vmem:[%s8963_s10 + $0x2c] sm:$0x1]  ;;  %v9036_v0 = vld [vmem:[%s8963_s10 + $0x30] sm:$0xf] }
  0x1d   : > { %v6722_v46 = vcombine.low %v368_v41, %v378_v42  ;;  %v387_v47 = vrot.slane %v386_v36, 4  ;;  %v409_v49 = vrot.slane %v407_v40, 5  ;;  %v415_v52 = vrot.slane %v413_v44, 5  ;;  %v9041_v8 = vld [vmem:[%s8963_s10 + $0x34] sm:$0xf] }
  0x1e   : > { %v397_v51 = vrot.slane %v396_v43, 4  ;;  %v423_v54 = vshll.u32 %v9007_v38, 16  ;;  %v428_v58 = vshrl.u32 %v9017_v45, 16  ;;  %v431_v59 = vshll.u32 %v9017_v45, 16  ;;  %v9048_v16 = vld [vmem:[%s11193_s1 + $0x4] sm:$0x3] }
  0x1f   : > { %7565 = vmatprep.mubr.msk.bf16.mxu0 %vm787_vm4, %v6722_v46  ;;  %v392_v55 = vsel %vm8998_vm3, %v387_v47, %v391_v30  ;;  %v410_v56 = vor.u32 %v409_v49, %v406_v48  ;;  %v419_v61 = vrot.slane %v417_v53, 4  ;;  %v437_v63 = vshll.u32 %v9020_v50, 16  ;;  %v9055_v19 = vld [vmem:[%s8963_s10 + $0x38] sm:$0x1]  ;;  %v9062_v33 = vld [vmem:[%s8963_s10 + $0x3c] sm:$0xf] }
  0x20   : > { %v402_v60 = vsel %vm8998_vm3, %v397_v51, %v401_v37  ;;  %v425_v62 = vrot.slane %v423_v54, 5  ;;  %v430_v6 = vrot.slane %v428_v58, 4  ;;  %v433_v7 = vrot.slane %v431_v59, 5  ;;  %v9070_v39 = vld [vmem:[%s8963_s10 + $0x40] sm:$0xf] }
  0x21   : > { %v9038_v1 = vcombine.low %v392_v55, %v402_v60  ;;  %v411_v2 = vrot.slane %v410_v56, 4  ;;  %v420_v9 = vor.u32 %v419_v61, %v415_v52  ;;  %v439_v11 = vrot.slane %v437_v63, 5  ;;  %v9077_v44 = vld [vmem:[%s8963_s10 + $0x44] sm:$0x1]  ;;  %v9086_v55 = vld [vmem:[%s8963_s10 + $0x48] sm:$0xf] }
  0x22   : > { %v441_v14 = vshrl.u32 %v9020_v50, 16  ;;  %v447_v15 = vshll.u32 %v9028_v57, 16  ;;  %v434_v18 = vor.u32 %v433_v7, %v430_v6  ;;  %v452_v20 = vshrl.u32 %v9036_v0, 16  ;;  %v9092_v61 = vld [vmem:[%s8963_s10 + $0x4c] sm:$0xf] }
  0x23   : > { %11277 = vst [vmem:[#allocation6_spill] sm:$0xff] %v9038_v1  ;;  %7566 = vmatmul.mubr.msk.bf16.vlgmr.msra.gmra.mrb[0].mxu0 %vm787_vm4, %v9038_v1  ;;  %v416_v17 = vsel %vm8998_vm3, %v411_v2, %v415_v52  ;;  %v455_v21 = vshll.u32 %v9036_v0, 16  ;;  %v421_v22 = vrot.slane %v420_v9, 4  ;;  %v461_v25 = vshll.u32 %v9041_v8, 16 }
  0x24   : > { %7598 = vmatpush3.bf16.msra.mxu0 %v1130_v35  ;;  %v443_v23 = vrot.slane %v441_v14, 4  ;;  %v449_v24 = vrot.slane %v447_v15, 5  ;;  %v435_v28 = vrot.slane %v434_v18, 4  ;;  %v454_v29 = vrot.slane %v452_v20, 4  ;;  %v9099_v14 = vld [vmem:[%s8963_s10 + $0x50] sm:$0x1] }
  0x25   : > { %v457_v30 = vrot.slane %v455_v21, 5  ;;  %v465_v32 = vshrl.u32 %v9041_v8, 16  ;;  %8821 = vmatprep.subr.msk.bf16.mxu0 %vm836_vm0, %v9048_v16  ;;  %v426_v34 = vsel %vm8998_vm3, %v421_v22, %v425_v62  ;;  %v463_v36 = vrot.slane %v461_v25, 5  ;;  %v9110_v22 = vld [vmem:[%s8963_s10 + $0x54] sm:$0xf] }
  0x26   : > { %v444_v35 = vor.u32 %v443_v23, %v439_v11  ;;  %v471_v37 = vshll.u32 %v9055_v19, 16  ;;  %v9072_v40 = vcombine.low %v416_v17, %v426_v34  ;;  %v440_v41 = vsel %vm8998_vm3, %v435_v28, %v439_v11 }
  0x27   : > { %v458_v42 = vor.u32 %v457_v30, %v454_v29  ;;  %v467_v43 = vrot.slane %v465_v32, 4  ;;  %v476_v48 = vshrl.u32 %v9062_v33, 16  ;;  %v479_v49 = vshll.u32 %v9062_v33, 16  ;;  %v9115_v29 = vld [vmem:[%s8963_s10 + $0x58] sm:$0xf] }
  0x28   : > { %11278 = vst [vmem:[#allocation7_spill] sm:$0xff] %v9072_v40  ;;  %v445_v46 = vrot.slane %v444_v35, 4  ;;  %v473_v47 = vrot.slane %v471_v37, 5  ;;  %7569 = vmatprep.mubr.msk.bf16.mxu0 %vm787_vm4, %v9072_v40  ;;  %v485_v53 = vshll.u32 %v9070_v39, 16  ;;  %v489_v54 = vshrl.u32 %v9070_v39, 16 }
  0x29   : > { %v459_v51 = vrot.slane %v458_v42, 4  ;;  %v468_v52 = vor.u32 %v467_v43, %v463_v36  ;;  %v478_v58 = vrot.slane %v476_v48, 4  ;;  %v481_v59 = vrot.slane %v479_v49, 5  ;;  %v9125_v48 = vld [vmem:[%s8963_s10 + $0x5c] sm:$0x1] }
  0x2a   : > { %v450_v56 = vsel %vm8998_vm3, %v445_v46, %v449_v24  ;;  %v495_v60 = vshll.u32 %v9077_v44, 16  ;;  %v487_v6 = vrot.slane %v485_v53, 5  ;;  %v491_v9 = vrot.slane %v489_v54, 4 }
  0x2b   : > { %v9094_v62 = vcombine.low %v440_v41, %v450_v56  ;;  %v464_v63 = vsel %vm8998_vm3, %v459_v51, %v463_v36  ;;  %v469_v2 = vrot.slane %v468_v52, 4  ;;  %v482_v7 = vor.u32 %v481_v59, %v478_v58  ;;  %v9129_v51 = vld [vmem:[%s8963_s10 + $0x60] sm:$0xf]  ;;  %v9135_v58 = vld [vmem:[%s8963_s10 + $0x64] sm:$0xf] }
  0x2c   : > { %v497_v11 = vrot.slane %v495_v60, 5  ;;  %v500_v15 = vshrl.u32 %v9086_v55, 16  ;;  %v503_v18 = vshll.u32 %v9086_v55, 16  ;;  %v509_v20 = vshll.u32 %v9092_v61, 16 }
  0x2d   : > { %11279 = vst [vmem:[#allocation8_spill] sm:$0xff] %v9094_v62  ;;  %7570 = vmatmul.mubr.msk.bf16.gmra.mrb[4].mxu0 %vm787_vm4, %v9094_v62  ;;  %v474_v17 = vsel %vm8998_vm3, %v469_v2, %v473_v47  ;;  %v513_v21 = vshrl.u32 %v9092_v61, 16  ;;  %v483_v24 = vrot.slane %v482_v7, 4  ;;  %v492_v25 = vor.u32 %v491_v9, %v487_v6  ;;  %v9247_v62 = vld [vmem:[%s8963_s10 + $0xa0] sm:$0xf] }
  0x2e   : > { %v9112_v23 = vcombine.low %v464_v63, %v474_v17  ;;  %v502_v28 = vrot.slane %v500_v15, 4  ;;  %v505_v30 = vrot.slane %v503_v18, 5  ;;  %v511_v32 = vrot.slane %v509_v20, 5  ;;  %v9148_v18 = vld [vmem:[%s8963_s10 + $0x68] sm:$0x1] }
  0x2f   : > { %v515_v34 = vrot.slane %v513_v21, 4  ;;  %v519_v35 = vshll.u32 %v9099_v14, 16  ;;  %v488_v36 = vsel %vm8998_vm3, %v483_v24, %v487_v6  ;;  %v493_v37 = vrot.slane %v492_v25, 4  ;;  %11282 = vst [vmem:[#allocation11_spill] sm:$0xff] %v9148_v18  ;;  %v9153_v24 = vld [vmem:[%s8963_s10 + $0x6c] sm:$0xf] }
  0x30   : > { %11280 = vst [vmem:[#allocation9_spill] sm:$0xff] %v9112_v23  ;;  %7573 = vmatprep.mubr.msk.bf16.mxu0 %vm787_vm4, %v9112_v23  ;;  %v524_v41 = vshrl.u32 %v9110_v22, 16  ;;  %v527_v42 = vshll.u32 %v9110_v22, 16  ;;  %v506_v43 = vor.u32 %v505_v30, %v502_v28  ;;  %v533_v49 = vshll.u32 %v9115_v29, 16 }
  0x31   : > { %v516_v46 = vor.u32 %v515_v34, %v511_v32  ;;  %v521_v47 = vrot.slane %v519_v35, 5  ;;  %v498_v52 = vsel %vm8998_vm3, %v493_v37, %v497_v11  ;;  %v537_v56 = vshrl.u32 %v9115_v29, 16  ;;  %v9158_v35 = vld [vmem:[%s8963_s10 + $0x70] sm:$0xf] }
  0x32   : > { %v526_v53 = vrot.slane %v524_v41, 4  ;;  %v529_v54 = vrot.slane %v527_v42, 5  ;;  %v9137_v59 = vcombine.low %v488_v36, %v498_v52  ;;  %v507_v60 = vrot.slane %v506_v43, 4 }
  0x33   : > { %v517_v63 = vrot.slane %v516_v46, 4  ;;  %v535_v2 = vrot.slane %v533_v49, 5  ;;  %v539_v7 = vrot.slane %v537_v56, 4  ;;  %v543_v9 = vshll.u32 %v9125_v48, 16 }
  0x34   : > { %11281 = vst [vmem:[#allocation10_spill] sm:$0xff] %v9137_v59  ;;  %v530_v6 = vor.u32 %v529_v54, %v526_v53  ;;  %v548_v11 = vshrl.u32 %v9129_v51, 16  ;;  %v512_v15 = vsel %vm8998_vm3, %v507_v60, %v511_v32  ;;  %v551_v20 = vshll.u32 %v9129_v51, 16  ;;  %v9173_v60 = vld [vmem:[%s8963_s10 + $0x78] sm:$0xf] }
  0x35   : > { %7574 = vmatmul.mubr.msk.bf16.gmra.mrb[8].mxu0 %vm787_vm4, %v9137_v59  ;;  %v522_v17 = vsel %vm8998_vm3, %v517_v63, %v521_v47  ;;  %v557_v21 = vshll.u32 %v9135_v58, 16  ;;  %v540_v30 = vor.u32 %v539_v7, %v535_v2  ;;  %v545_v34 = vrot.slane %v543_v9, 5  ;;  %v9167_v47 = vld [vmem:[%s8963_s10 + $0x74] sm:$0x1]  ;;  %v9241_v59 = vld [vmem:[%s8963_s10 + $0x9c] sm:$0xf] }
  0x36   : > { %v9155_v25 = vcombine.low %v512_v15, %v522_v17  ;;  %v531_v28 = vrot.slane %v530_v6, 4  ;;  %v550_v32 = vrot.slane %v548_v11, 4  ;;  %v553_v36 = vrot.slane %v551_v20, 5  ;;  %11284 = vst [vmem:[#allocation13_spill] sm:$0xff] %v9167_v47  ;;  %v9181_v20 = vld [vmem:[%s8963_s10 + $0x7c] sm:$0xf] }
  0x37   : > { %v559_v37 = vrot.slane %v557_v21, 5  ;;  %v561_v41 = vshrl.u32 %v9135_v58, 16  ;;  %v541_v43 = vrot.slane %v540_v30, 4  ;;  %v567_v46 = vshll.u32 %v9148_v18, 16 }
  0x38   : > { %11283 = vst [vmem:[#allocation12_spill] sm:$0xff] %v9155_v25  ;;  %7577 = vmatprep.mubr.msk.bf16.mxu0 %vm787_vm4, %v9155_v25  ;;  %v536_v42 = vsel %vm8998_vm3, %v531_v28, %v535_v2  ;;  %v572_v49 = vshrl.u32 %v9153_v24, 16  ;;  %v554_v52 = vor.u32 %v553_v36, %v550_v32  ;;  %v575_v54 = vshll.u32 %v9153_v24, 16 }
  0x39   : > { %v563_v53 = vrot.slane %v561_v41, 4  ;;  %v581_v56 = vshll.u32 %v9158_v35, 16  ;;  %v546_v63 = vsel %vm8998_vm3, %v541_v43, %v545_v34  ;;  %v569_v2 = vrot.slane %v567_v46, 5 }
  0x3a   : > { %v574_v6 = vrot.slane %v572_v49, 4  ;;  %v585_v7 = vshrl.u32 %v9158_v35, 16  ;;  %v9178_v9 = vcombine.low %v536_v42, %v546_v63  ;;  %v555_v11 = vrot.slane %v554_v52, 4  ;;  %v9190_v42 = vld [vmem:[%s8963_s10 + $0x80] sm:$0x1] }
  0x3b   : > { %v564_v15 = vor.u32 %v563_v53, %v559_v37  ;;  %v577_v17 = vrot.slane %v575_v54, 5  ;;  %v583_v21 = vrot.slane %v581_v56, 5  ;;  %v591_v30 = vshll.u32 %v9167_v47, 16  ;;  %11286 = vst [vmem:[#allocation15_spill] sm:$0xff] %v9190_v42  ;;  %v9195_v54 = vld [vmem:[%s8963_s10 + $0x84] sm:$0xf] }
  0x3c   : > { %11285 = vst [vmem:[#allocation14_spill] sm:$0xff] %v9178_v9  ;;  %v587_v28 = vrot.slane %v585_v7, 4  ;;  %v596_v32 = vshrl.u32 %v9173_v60, 16  ;;  %v560_v34 = vsel %vm8998_vm3, %v555_v11, %v559_v37  ;;  %v599_v43 = vshll.u32 %v9173_v60, 16 }
  0x3d   : > { %7578 = vmatmul.mubr.msk.bf16.gmra.mrb[12].mxu0 %vm787_vm4, %v9178_v9  ;;  %v565_v36 = vrot.slane %v564_v15, 4  ;;  %v578_v41 = vor.u32 %v577_v17, %v574_v6  ;;  %v593_v49 = vrot.slane %v591_v30, 5  ;;  %v605_v53 = vshll.u32 %v9181_v20, 16  ;;  %v9201_v6 = vld [vmem:[%s8963_s10 + $0x88] sm:$0xf] }
  0x3e   : > { %v588_v46 = vor.u32 %v587_v28, %v583_v21  ;;  %v598_v52 = vrot.slane %v596_v32, 4  ;;  %v601_v7 = vrot.slane %v599_v43, 5  ;;  %v609_v37 = vshrl.u32 %v9181_v20, 16 }
  0x3f   : > { %v570_v56 = vsel %vm8998_vm3, %v565_v36, %v569_v2  ;;  %v579_v63 = vrot.slane %v578_v41, 4  ;;  %v607_v17 = vrot.slane %v605_v53, 5  ;;  %v615_v28 = vshll.u32 %v9190_v42, 16  ;;  %v9209_v2 = vld [vmem:[%s8963_s10 + $0x8c] sm:$0x1] }
  0x40   : > { %v9203_v11 = vcombine.low %v560_v34, %v570_v56  ;;  %v589_v15 = vrot.slane %v588_v46, 4  ;;  %v602_v32 = vor.u32 %v601_v7, %v598_v52  ;;  %v611_v9 = vrot.slane %v609_v37, 4  ;;  %11288 = vst [vmem:[#allocation17_spill] sm:$0xff] %v9209_v2  ;;  %v9219_v53 = vld [vmem:[%s8963_s10 + $0x90] sm:$0xf] }
  0x41   : > { %v584_v30 = vsel %vm8998_vm3, %v579_v63, %v583_v21  ;;  %v620_v36 = vshrl.u32 %v9195_v54, 16  ;;  %v617_v41 = vrot.slane %v615_v28, 5  ;;  %v623_v43 = vshll.u32 %v9195_v54, 16  ;;  %v9224_v7 = vld [vmem:[%s8963_s10 + $0x94] sm:$0xf] }
  0x42   : > { %11287 = vst [vmem:[#allocation16_spill] sm:$0xff] %v9203_v11  ;;  %7581 = vmatprep.mubr.msk.bf16.mxu0 %vm787_vm4, %v9203_v11  ;;  %v594_v34 = vsel %vm8998_vm3, %v589_v15, %v593_v49  ;;  %v629_v46 = vshll.u32 %v9201_v6, 16  ;;  %v603_v52 = vrot.slane %v602_v32, 4  ;;  %v612_v56 = vor.u32 %v611_v9, %v607_v17  ;;  %v9233_v32 = vld [vmem:[%s8963_s10 + $0x98] sm:$0x1] }
  0x43   : > { %v9221_v21 = vcombine.low %v584_v30, %v594_v34  ;;  %v622_v63 = vrot.slane %v620_v36, 4  ;;  %v625_v37 = vrot.slane %v623_v43, 5  ;;  %v633_v49 = vshrl.u32 %v9201_v6, 16  ;;  %11290 = vst [vmem:[#allocation19_spill] sm:$0xff] %v9233_v32  ;;  %v9303_v42 = vld [vmem:[%s8963_s10 + $0xbc] sm:$0x1] }
  0x44   : > { %v631_v11 = vrot.slane %v629_v46, 5  ;;  %v639_v15 = vshll.u32 %v9209_v2, 16  ;;  %v608_v28 = vsel %vm8998_vm3, %v603_v52, %v607_v17  ;;  %v613_v30 = vrot.slane %v612_v56, 4 }
  0x45   : > { %11289 = vst [vmem:[#allocation18_spill] sm:$0xff] %v9221_v21  ;;  %7582 = vmatmul.mubr.msk.bf16.gmra.mrb[16].mxu0 %vm787_vm4, %v9221_v21  ;;  %v644_v9 = vshrl.u32 %v9219_v53, 16  ;;  %v647_v36 = vshll.u32 %v9219_v53, 16  ;;  %7887 = vmatprep.mubr.msk.bf16.mxu1 %vm787_vm4, %v9221_v21  ;;  %v626_v34 = vor.u32 %v625_v37, %v622_v63  ;;  %v635_v43 = vrot.slane %v633_v49, 4 }
  0x46   : > { %v641_v46 = vrot.slane %v639_v15, 5  ;;  %v653_v25 = vshll.u32 %v9224_v7, 16  ;;  %v618_v17 = vsel %vm8998_vm3, %v613_v30, %v617_v41  ;;  %v657_v23 = vshrl.u32 %v9224_v7, 16 }
  0x47   : > { %v646_v52 = vrot.slane %v644_v9, 4  ;;  %v649_v56 = vrot.slane %v647_v36, 5  ;;  %v9249_v40 = vcombine.low %v608_v28, %v618_v17  ;;  %v627_v21 = vrot.slane %v626_v34, 4  ;;  %v9258_v28 = vld [vmem:[%s8963_s10 + $0xa4] sm:$0x1] }
  0x48   : > { %v636_v63 = vor.u32 %v635_v43, %v631_v11  ;;  %v655_v37 = vrot.slane %v653_v25, 5  ;;  %v659_v15 = vrot.slane %v657_v23, 4  ;;  %v663_v1 = vshll.u32 %v9233_v32, 16  ;;  %11292 = vst [vmem:[#allocation21_spill] sm:$0xff] %v9258_v28  ;;  %v9263_v17 = vld [vmem:[%s8963_s10 + $0xa8] sm:$0xf] }
  0x49   : > { %11291 = vst [vmem:[#allocation20_spill] sm:$0xff] %v9249_v40  ;;  %v650_v49 = vor.u32 %v649_v56, %v646_v52  ;;  %v668_v38 = vshrl.u32 %v9241_v59, 16  ;;  %7585 = vmatprep.mubr.msk.bf16.mxu0 %vm787_vm4, %v9249_v40  ;;  %v632_v41 = vsel %vm8998_vm3, %v627_v21, %v631_v11  ;;  %v671_v9 = vshll.u32 %v9241_v59, 16  ;;  %v9269_v21 = vld [vmem:[%s8963_s10 + $0xac] sm:$0xf] }
  0x4a   : > { %v637_v30 = vrot.slane %v636_v63, 4  ;;  %v677_v25 = vshll.u32 %v9247_v62, 16  ;;  %v660_v23 = vor.u32 %v659_v15, %v655_v37  ;;  %v665_v34 = vrot.slane %v663_v1, 5  ;;  %v9277_v32 = vld [vmem:[%s8963_s10 + $0xb0] sm:$0x1] }
  0x4b   : > { %v651_v36 = vrot.slane %v650_v49, 4  ;;  %v670_v43 = vrot.slane %v668_v38, 4  ;;  %v673_v56 = vrot.slane %v671_v9, 5  ;;  %v681_v11 = vshrl.u32 %v9247_v62, 16  ;;  %11294 = vst [vmem:[#allocation23_spill] sm:$0xff] %v9277_v32 }
  0x4c   : > { %v642_v52 = vsel %vm8998_vm3, %v637_v30, %v641_v46  ;;  %v679_v40 = vrot.slane %v677_v25, 5  ;;  %v661_v15 = vrot.slane %v660_v23, 4  ;;  %v687_v38 = vshll.u32 %v9258_v28, 16 }
  0x4d   : > { %v9271_v63 = vcombine.low %v632_v41, %v642_v52  ;;  %v656_v49 = vsel %vm8998_vm3, %v651_v36, %v655_v37  ;;  %v674_v1 = vor.u32 %v673_v56, %v670_v43  ;;  %v683_v5 = vrot.slane %v681_v11, 4  ;;  %v9288_v36 = vld [vmem:[%s8963_s10 + $0xb4] sm:$0xf]  ;;  %v9293_v11 = vld [vmem:[%s8963_s10 + $0xb8] sm:$0xf] }
  0x4e   : > { %v692_v46 = vshrl.u32 %v9263_v17, 16  ;;  %v695_v30 = vshll.u32 %v9263_v17, 16  ;;  %v666_v41 = vsel %vm8998_vm3, %v661_v15, %v665_v34  ;;  %v689_v9 = vrot.slane %v687_v38, 5 }
  0x4f   : > { %11293 = vst [vmem:[#allocation22_spill] sm:$0xff] %v9271_v63  ;;  %7586 = vmatmul.mubr.msk.bf16.gmra.mrb[20].mxu0 %vm787_vm4, %v9271_v63  ;;  %v701_v37 = vshll.u32 %v9269_v21, 16  ;;  %v705_v25 = vshrl.u32 %v9269_v21, 16  ;;  %v9290_v23 = vcombine.low %v656_v49, %v666_v41  ;;  %v675_v43 = vrot.slane %v674_v1, 4 }
  0x50   : > { %v684_v52 = vor.u32 %v683_v5, %v679_v40  ;;  %v694_v56 = vrot.slane %v692_v46, 4  ;;  %v697_v28 = vrot.slane %v695_v30, 5  ;;  %v711_v34 = vshll.u32 %v9277_v32, 16 }
  0x51   : > { %11295 = vst [vmem:[#allocation24_spill] sm:$0xff] %v9290_v23  ;;  %v703_v63 = vrot.slane %v701_v37, 5  ;;  %v707_v2 = vrot.slane %v705_v25, 4  ;;  %7589 = vmatprep.mubr.msk.bf16.mxu0 %vm787_vm4, %v9290_v23  ;;  %v680_v15 = vsel %vm8998_vm3, %v675_v43, %v679_v40  ;;  %v716_v49 = vshrl.u32 %v9288_v36, 16 }
  0x52   : > { %v685_v38 = vrot.slane %v684_v52, 4  ;;  %v719_v1 = vshll.u32 %v9288_v36, 16  ;;  %v698_v5 = vor.u32 %v697_v28, %v694_v56  ;;  %v713_v41 = vrot.slane %v711_v34, 5 }
  0x53   : > { %v708_v46 = vor.u32 %v707_v2, %v703_v63  ;;  %v725_v30 = vshll.u32 %v9293_v11, 16  ;;  %v718_v25 = vrot.slane %v716_v49, 4  ;;  %v729_v32 = vshrl.u32 %v9293_v11, 16 }
  0x54   : > { %v690_v37 = vsel %vm8998_vm3, %v685_v38, %v689_v9  ;;  %v721_v23 = vrot.slane %v719_v1, 5  ;;  %v699_v43 = vrot.slane %v698_v5, 4  ;;  %v735_v2 = vshll.u32 %v9303_v42, 16 }
  0x55   : > { %v9309_v40 = vcombine.low %v680_v15, %v690_v37  ;;  %v709_v52 = vrot.slane %v708_v46, 4  ;;  %v727_v47 = vrot.slane %v725_v30, 5  ;;  %v731_v28 = vrot.slane %v729_v32, 4 }
  0x56   : > { %v722_v18 = vor.u32 %v721_v23, %v718_v25  ;;  %v6754_v56 = vcombine.low %v8966_v3, %v8969_v4  ;;  %v1321_v34 = vrot.slane %v8983_v12, 5  ;;  %v1324_v9 = vrot.slane %v8986_v13, 5 }
  0x57   : > { %11296 = vst [vmem:[#allocation25_spill] sm:$0xff] %v9309_v40  ;;  %7590 = vmatmul.mubr.msk.bf16.gmra.mrb[24].mxu0 %vm787_vm4, %v9309_v40  ;;  %v704_v15 = vsel %vm8998_vm3, %v699_v43, %v703_v63  ;;  %v714_v38 = vsel %vm8998_vm3, %v709_v52, %v713_v41  ;;  %v732_v49 = vor.u32 %v731_v28, %v727_v47  ;;  %v737_v1 = vrot.slane %v735_v2, 5 }
  0x58   : > { %v9322_v23 = vcombine.low %v704_v15, %v714_v38  ;;  %v723_v32 = vrot.slane %v722_v18, 4  ;;  %v9326_v5 = vcombine.low %v9036_v0, %v9041_v8  ;;  %v9330_v13 = vcombine.low %v9062_v33, %v9070_v39 }
  0x59   : > { %v9334_v46 = vcombine.low %v9086_v55, %v9092_v61  ;;  %v9338_v63 = vcombine.low %v9110_v22, %v9115_v29  ;;  %v733_v41 = vrot.slane %v732_v49, 4  ;;  %v9346_v30 = vcombine.low %v9129_v51, %v9135_v58 }
  0x5a   : > { %11297 = vst [vmem:[#allocation26_spill] sm:$0xff] %v9322_v23  ;;  %7593 = vmatprep.mubr.msk.bf16.mxu0 %vm787_vm4, %v9322_v23  ;;  %v728_v18 = vsel %vm8998_vm3, %v723_v32, %v727_v47  ;;  %v9350_v37 = vcombine.low %v9153_v24, %v9158_v35  ;;  %v9354_v25 = vcombine.low %v9173_v60, %v9181_v20  ;;  %v6787_v49 = vrot.slane %v8979_v10, 9 }
  0x5b   : > { %v9358_v43 = vcombine.low %v9195_v54, %v9201_v6  ;;  %v9362_v47 = vcombine.low %v9219_v53, %v9224_v7  ;;  %v9366_v52 = vcombine.low %v9241_v59, %v9247_v62  ;;  %v738_v28 = vsel %vm8998_vm3, %v733_v41, %v737_v1 }
  0x5c   : > { %v9372_v2 = vcombine.low %v9263_v17, %v9269_v21  ;;  %v9376_v15 = vcombine.low %v9288_v36, %v9293_v11  ;;  %v9378_v38 = vcombine.low %v728_v18, %v738_v28  ;;  %v1323_v27 = vrot.slane %v1321_v34, 4 }
  0x5d   : > { %v1322_v1 = vsel %vm9380_vm7, %v6787_v49, %v1321_v34  ;;  %v6789_v41 = vrot.slane %v9017_v45, 9  ;;  %v1335_v28 = vrot.slane %v9020_v50, 5  ;;  %v1521_v23 = vsel %vm836_vm0, %v9048_v16, 0 }
  0x5e   : > { %11298 = vst [vmem:[#allocation27_spill] sm:$0xff] %v9378_v38  ;;  %v1325_v18 = vsel %vm9380_vm7, %v1323_v27, %v1324_v9  ;;  %v1338_v49 = vrot.slane %v9028_v57, 5  ;;  %v9407_v27 = vcombine.low %v8994_v26, %v9003_v31  ;;  %v6790_v9 = vrot.slane %v9036_v0, 9 }
  0x5f   : > { %7594 = vmatmul.mubr.msk.bf16.gmra.mrb[28].mxu0 %vm787_vm4, %v9378_v38  ;;  %v9396_v40 = vcombine.low %v1322_v1, %v1325_v18  ;;  %v9400_v38 = vcombine.low %v8979_v10, %v8983_v12  ;;  %v1337_v34 = vrot.slane %v1335_v28, 4  ;;  %v1342_v16 = vrot.slane %v9041_v8, 5 }
  0x60   : > { %7599 = vmatprep.mubr.msk.bf16.mxu0 %vm787_vm4, %v6754_v56  ;;  %v1336_v56 = vsel %vm9380_vm7, %v6789_v41, %v1335_v28  ;;  %v1345_v1 = vrot.slane %v9055_v19, 5  ;;  %v9414_v10 = vcombine.low %v9017_v45, %v9020_v50  ;;  %v6791_v18 = vrot.slane %v9062_v33, 9  ;;  %v9428_v45 = vld [vmem:[%s11193_s1 + $0x6] sm:$0x3] }
  0x61   : > { %v1339_v12 = vsel %vm9380_vm7, %v1337_v34, %v1338_v49  ;;  %v1349_v57 = vrot.slane %v9070_v39, 5  ;;  %v1343_v0 = vsel %vm9380_vm7, %v6790_v9, %v1342_v16  ;;  %v1344_v28 = vrot.slane %v1342_v16, 4 }
  0x62   : > { %v9420_v41 = vcombine.low %v1336_v56, %v1339_v12  ;;  %v1352_v8 = vrot.slane %v9077_v44, 5  ;;  %v6792_v33 = vrot.slane %v9086_v55, 9  ;;  %v1356_v39 = vrot.slane %v9092_v61, 5 }
  0x63   : > { %v1350_v50 = vsel %vm9380_vm7, %v6791_v18, %v1349_v57  ;;  %v1351_v19 = vrot.slane %v1349_v57, 4  ;;  %v1346_v56 = vsel %vm9380_vm7, %v1344_v28, %v1345_v1  ;;  %v1359_v44 = vrot.slane %v9099_v14, 5  ;;  %v11301_v57 = vld [vmem:[#allocation11_spill] sm:$0xff] }
  0x64   : > { %v6793_v34 = vrot.slane %v9110_v22, 9  ;;  %v1363_v49 = vrot.slane %v9115_v29, 5  ;;  %v9443_v9 = vcombine.low %v1343_v0, %v1346_v56  ;;  %v1357_v61 = vsel %vm9380_vm7, %v6792_v33, %v1356_v39 }
  0x65   : > { %v1353_v55 = vsel %vm9380_vm7, %v1351_v19, %v1352_v8  ;;  %v1358_v16 = vrot.slane %v1356_v39, 4  ;;  %v6794_v12 = vrot.slane %v9129_v51, 9  ;;  %v1370_v18 = vrot.slane %v9135_v58, 5  ;;  %v11302_v51 = vld [vmem:[#allocation13_spill] sm:$0xff] }
  0x66   : > { %v9451_v14 = vcombine.low %v1350_v50, %v1353_v55  ;;  %v1364_v22 = vsel %vm9380_vm7, %v6793_v34, %v1363_v49  ;;  %v1365_v29 = vrot.slane %v1363_v49, 4  ;;  %v1373_v0 = vrot.slane %v11301_v57, 5 }
  0x67   : > { %7600 = vmatmul.mubr.msk.bf16.vlgmr.msra.gmra.mrb[0].mxu0 %vm787_vm4, %v9400_v38  ;;  %v1360_v1 = vsel %vm9380_vm7, %v1358_v16, %v1359_v44  ;;  %v6795_v50 = vrot.slane %v9153_v24, 9  ;;  %v1377_v19 = vrot.slane %v9158_v35, 5  ;;  %v1372_v39 = vrot.slane %v1370_v18, 4  ;;  %v11303_v35 = vld [vmem:[#allocation15_spill] sm:$0xff] }
  0x68   : > { %7632 = vmatpush3.bf16.msra.mxu0 %v1521_v23  ;;  %7603 = vmatprep.mubr.msk.bf16.mxu0 %vm787_vm4, %v9407_v27  ;;  %v1366_v23 = vrot.slane %v9125_v48, 5  ;;  %v9461_v28 = vcombine.low %v1357_v61, %v1360_v1  ;;  %v1371_v48 = vsel %vm9380_vm7, %v6794_v12, %v1370_v18  ;;  %v1380_v56 = vrot.slane %v11302_v51, 5  ;;  %v11304_v1 = vld [vmem:[#allocation17_spill] sm:$0xff] }
  0x69   : > { %8822 = vmatprep.subr.msk.bf16.mxu0 %vm836_vm0, %v9428_v45  ;;  %v1378_v58 = vsel %vm9380_vm7, %v6795_v50, %v1377_v19  ;;  %v1379_v44 = vrot.slane %v1377_v19, 4  ;;  %v6796_v34 = vrot.slane %v9173_v60, 9  ;;  %v1384_v49 = vrot.slane %v9181_v20, 5 }
  0x6a   : > { %v1367_v8 = vsel %vm9380_vm7, %v1365_v29, %v1366_v23  ;;  %v1374_v24 = vsel %vm9380_vm7, %v1372_v39, %v1373_v0  ;;  %v1387_v55 = vrot.slane %v11303_v35, 5  ;;  %v6797_v61 = vrot.slane %v9195_v54, 9 }
  0x6b   : > { %v9467_v33 = vcombine.low %v1364_v22, %v1367_v8  ;;  %v1391_v16 = vrot.slane %v9201_v6, 5  ;;  %v9483_v22 = vcombine.low %v1371_v48, %v1374_v24  ;;  %v1381_v29 = vsel %vm9380_vm7, %v1379_v44, %v1380_v56  ;;  %v11305_v8 = vld [vmem:[#allocation19_spill] sm:$0xff] }
  0x6c   : > { %v1385_v60 = vsel %vm9380_vm7, %v6796_v34, %v1384_v49  ;;  %v1386_v20 = vrot.slane %v1384_v49, 4  ;;  %v9491_v23 = vcombine.low %v1378_v58, %v1381_v29  ;;  %v1394_v12 = vrot.slane %v11304_v1, 5 }
  0x6d   : > { %v1392_v54 = vsel %vm9380_vm7, %v6797_v61, %v1391_v16  ;;  %v1393_v6 = vrot.slane %v1391_v16, 4  ;;  %v6798_v57 = vrot.slane %v9219_v53, 9  ;;  %v1398_v0 = vrot.slane %v9224_v7, 5  ;;  %v11306_v53 = vld [vmem:[#allocation21_spill] sm:$0xff] }
  0x6e   : > { %v1388_v18 = vsel %vm9380_vm7, %v1386_v20, %v1387_v55  ;;  %v1401_v50 = vrot.slane %v11305_v8, 5  ;;  %v6799_v39 = vrot.slane %v9241_v59, 9  ;;  %v1405_v51 = vrot.slane %v9247_v62, 5  ;;  %v11307_v62 = vld [vmem:[#allocation23_spill] sm:$0xff] }
  0x6f   : > { %7604 = vmatmul.mubr.msk.bf16.gmra.mrb[4].mxu0 %vm787_vm4, %v9414_v10  ;;  %v9501_v19 = vcombine.low %v1385_v60, %v1388_v18  ;;  %v1395_v48 = vsel %vm9380_vm7, %v1393_v6, %v1394_v12  ;;  %v1399_v58 = vsel %vm9380_vm7, %v6798_v57, %v1398_v0  ;;  %v1400_v44 = vrot.slane %v1398_v0, 4  ;;  %v11308_v57 = vld [vmem:[#allocation3_spill] sm:$0xff] }
  0x70   : > { %7607 = vmatprep.mubr.msk.bf16.mxu0 %vm787_vm4, %v9326_v5  ;;  %v9507_v56 = vcombine.low %v1392_v54, %v1395_v48  ;;  %v1408_v34 = vrot.slane %v11306_v53, 5  ;;  %v1406_v7 = vsel %vm9380_vm7, %v6799_v39, %v1405_v51  ;;  %v1407_v49 = vrot.slane %v1405_v51, 4 }
  0x71   : > { %v6800_v24 = vrot.slane %v9263_v17, 9  ;;  %v1412_v35 = vrot.slane %v9269_v21, 5  ;;  %v1402_v59 = vsel %vm9380_vm7, %v1400_v44, %v1401_v50  ;;  %v1415_v55 = vrot.slane %v11307_v62, 5  ;;  %v11310_v62 = vld [vmem:[#allocation6_spill] sm:$0xff] }
  0x72   : > { %v6801_v61 = vrot.slane %v9288_v36, 9  ;;  %v1419_v16 = vrot.slane %v9293_v11, 5  ;;  %v9521_v29 = vcombine.low %v1399_v58, %v1402_v59  ;;  %v1409_v60 = vsel %vm9380_vm7, %v1407_v49, %v1408_v34 }
  0x73   : > { %v1413_v20 = vsel %vm9380_vm7, %v6800_v24, %v1412_v35  ;;  %v1414_v17 = vrot.slane %v1412_v35, 4  ;;  %v9529_v21 = vcombine.low %v1406_v7, %v1409_v60  ;;  %v1422_v11 = vrot.slane %v9303_v42, 5  ;;  %v339_v24 = vld [vmem:[%s11193_s1 + $0xa] sm:$0x3]  ;;  %v9654_v35 = vld [vmem:[%s8963_s10 + $0xc4] sm:$0xf] }
  0x74   : > { %v1420_v54 = vsel %vm9380_vm7, %v6801_v61, %v1419_v16  ;;  %v1421_v36 = vrot.slane %v1419_v16, 4  ;;  %v1314_v42 = vrot.slane %v8969_v4, 5  ;;  %v1317_v0 = vrot.slane %v11308_v57, 5  ;;  %v340_v61 = vld [vmem:[%s11193_s1 + $0xc] sm:$0x3]  ;;  %v11311_v16 = vld [vmem:[#allocation7_spill] sm:$0xff] }
  0x75   : > { %v1416_v6 = vsel %vm9380_vm7, %v1414_v17, %v1415_v55  ;;  %v6786_v8 = vrot.slane %v8966_v3, 9  ;;  %v1328_v51 = vrot.slane %v9003_v31, 5  ;;  %v6788_v58 = vrot.slane %v8994_v26, 9  ;;  %v11309_v3 = vld [vmem:[#allocation5_spill] sm:$0xff]  ;;  %v11312_v60 = vld [vmem:[#allocation8_spill] sm:$0xff]  ;;  %v11314_v17 = vld [vmem:[#allocation10_spill] sm:$0xff] }
  0x76   : > { %v9538_v1 = vcombine.low %v1413_v20, %v1416_v6  ;;  %v1423_v12 = vsel %vm9380_vm7, %v1421_v36, %v1422_v11  ;;  %v1316_v50 = vrot.slane %v1314_v42, 4  ;;  %v1331_v53 = vrot.slane %v11309_v3, 5  ;;  %v338_v26 = vld [vmem:[%s11193_s1 + $0x8] sm:$0x3]  ;;  %v11316_v36 = vld [vmem:[#allocation14_spill] sm:$0xff]  ;;  %v11317_v11 = vld [vmem:[#allocation16_spill] sm:$0xff] }
  0x77   : > { %7608 = vmatmul.mubr.msk.bf16.gmra.mrb[8].mxu0 %vm787_vm4, %v9330_v13  ;;  %v9542_v18 = vcombine.low %v1420_v54, %v1423_v12  ;;  %v1315_v48 = vsel %vm9380_vm7, %v6786_v8, %v1314_v42  ;;  %v1330_v44 = vrot.slane %v1328_v51, 4  ;;  %v1329_v34 = vsel %vm9380_vm7, %v6788_v58, %v1328_v51  ;;  %v11313_v20 = vld [vmem:[#allocation9_spill] sm:$0xff]  ;;  %v11315_v54 = vld [vmem:[#allocation12_spill] sm:$0xff]  ;;  %v11318_v6 = vld [vmem:[#allocation18_spill] sm:$0xff] }
  0x78   : > { %7611 = vmatprep.mubr.msk.bf16.mxu0 %vm787_vm4, %v9334_v46  ;;  %v1318_v39 = vsel %vm9380_vm7, %v1316_v50, %v1317_v0  ;;  %v1725_v31 = vsel %vm836_vm0, %v9428_v45, 0  ;;  %v1951_v45 = vsel %vm836_vm0, %v338_v26, 0  ;;  %v2161_v55 = vsel %vm836_vm0, %v339_v24, 0  ;;  %v11319_v12 = vld [vmem:[#allocation20_spill] sm:$0xff]  ;;  %v11320_v8 = vld [vmem:[#allocation22_spill] sm:$0xff]  ;;  %v11322_v3 = vld [vmem:[#allocation25_spill] sm:$0xff] }
  0x79   : > { %v6802_v4 = vcombine.low %v1315_v48, %v1318_v39  ;;  %v1332_v7 = vsel %vm9380_vm7, %v1330_v44, %v1331_v53  ;;  %v1934_v0 = vshrl.u32 %v9654_v35, 16  ;;  %v1930_v50 = vshll.u32 %v9654_v35, 16  ;;  %v330_v58 = vld [vmem:[%s8963_s10 + $0xc8] sm:$0x1]  ;;  %v11321_v44 = vld [vmem:[#allocation24_spill] sm:$0xff] }
  0x7a   : > { %v9577_v49 = vcombine.low %v1329_v34, %v1332_v7  ;;  %v1940_v7 = vshll.u32 %v330_v58, 16 }
  0x7b   : > { %v1932_v51 = vrot.slane %v1930_v50, 5 }
  0x7f   : > { %7612 = vmatmul.mubr.msk.bf16.gmra.mrb[12].mxu0 %vm787_vm4, %v9338_v63 }
  0x80   : > { %7615 = vmatprep.mubr.msk.bf16.mxu0 %vm787_vm4, %v9346_v30 }
  0x87   : > { %7616 = vmatmul.mubr.msk.bf16.gmra.mrb[16].mxu0 %vm787_vm4, %v9350_v37 }
  0x88   : > { %7619 = vmatprep.mubr.msk.bf16.mxu0 %vm787_vm4, %v9354_v25 }
  0x8f   : > { %7620 = vmatmul.mubr.msk.bf16.gmra.mrb[20].mxu0 %vm787_vm4, %v9358_v43 }
  0x90   : > { %7623 = vmatprep.mubr.msk.bf16.mxu0 %vm787_vm4, %v9362_v47 }
  0x97   : > { %7624 = vmatmul.mubr.msk.bf16.gmra.mrb[24].mxu0 %vm787_vm4, %v9366_v52 }
  0x98   : > { %7627 = vmatprep.mubr.msk.bf16.mxu0 %vm787_vm4, %v9372_v2 }
  0x9f   : > { %7628 = vmatmul.mubr.msk.bf16.gmra.mrb[28].mxu0 %vm787_vm4, %v9376_v15 }
  0xa0   : > { %7633 = vmatprep.mubr.msk.bf16.mxu0 %vm787_vm4, %v6802_v4  ;;  %v1936_v4 = vrot.slane %v1934_v0, 4 }
  0xa2   : > { %v1937_v34 = vor.u32 %v1936_v4, %v1932_v51  ;;  %v2152_v4 = vrot.slane %v330_v58, 5 }
  0xa7   : > { %7634 = vmatmul.mubr.msk.bf16.vlgmr.msra.gmra.mrb[0].mxu0 %vm787_vm4, %v9396_v40 }
  0xa8   : > { %7666 = vmatpush3.bf16.msra.mxu0 %v1725_v31  ;;  %7637 = vmatprep.mubr.msk.bf16.mxu0 %vm787_vm4, %v9577_v49 }
  0xa9   : > { %8823 = vmatprep.subr.msk.bf16.mxu0 %vm836_vm0, %v338_v26  ;;  %v1938_v26 = vrot.slane %v1937_v34, 4 }
  0xaf   : > { %7638 = vmatmul.mubr.msk.bf16.gmra.mrb[4].mxu0 %vm787_vm4, %v9420_v41 }
  0xb0   : > { %7641 = vmatprep.mubr.msk.bf16.mxu0 %vm787_vm4, %v9443_v9 }
  0xb7   : > { %7642 = vmatmul.mubr.msk.bf16.gmra.mrb[8].mxu0 %vm787_vm4, %v9451_v14 }
  0xb8   : > { %7645 = vmatprep.mubr.msk.bf16.mxu0 %vm787_vm4, %v9461_v28 }
  0xbf   : > { %7646 = vmatmul.mubr.msk.bf16.gmra.mrb[12].mxu0 %vm787_vm4, %v9467_v33 }
  0xc0   : > { %7649 = vmatprep.mubr.msk.bf16.mxu0 %vm787_vm4, %v9483_v22 }
  0xc7   : > { %7650 = vmatmul.mubr.msk.bf16.gmra.mrb[16].mxu0 %vm787_vm4, %v9491_v23 }
  0xc8   : > { %7653 = vmatprep.mubr.msk.bf16.mxu0 %vm787_vm4, %v9501_v19 }
  0xcf   : > { %7654 = vmatmul.mubr.msk.bf16.gmra.mrb[20].mxu0 %vm787_vm4, %v9507_v56 }
  0xd0   : > { %7657 = vmatprep.mubr.msk.bf16.mxu0 %vm787_vm4, %v9521_v29 }
  0xd7   : > { %7658 = vmatmul.mubr.msk.bf16.gmra.mrb[24].mxu0 %vm787_vm4, %v9529_v21 }
  0xd8   : > { %7661 = vmatprep.mubr.msk.bf16.mxu0 %vm787_vm4, %v9538_v1 }
  0xdf   : > { %7662 = vmatmul.mubr.msk.bf16.gmra.mrb[28].mxu0 %vm787_vm4, %v9542_v18 }
  0xe0   : > { %7667 = vmatprep.mubr.msk.bf16.mxu0 %vm787_vm4, %v9400_v38  ;;  %v9651_v38 = vld [vmem:[%s8963_s10 + $0xc0] sm:$0xf] }
  0xe1   : > { %v9658_v59 = vcombine.low %v9651_v38, %v9654_v35  ;;  %v1921_v42 = vshrl.u32 %v9651_v38, 16  ;;  %v1924_v57 = vshll.u32 %v9651_v38, 16 }
  0xe3   : > { %v1923_v48 = vrot.slane %v1921_v42, 4  ;;  %v1926_v39 = vrot.slane %v1924_v57, 5 }
  0xe5   : > { %v1927_v53 = vor.u32 %v1926_v39, %v1923_v48  ;;  %v2365_v48 = vsel %vm836_vm0, %v340_v61, 0  ;;  %v341_v39 = vld [vmem:[%s11193_s1 + $0xe] sm:$0x3] }
  0xe7   : > { %7668 = vmatmul.mubr.msk.bf16.vlgmr.msra.gmra.mrb[0].mxu0 %vm787_vm4, %v9407_v27  ;;  %v1928_v31 = vrot.slane %v1927_v53, 4 }
  0xe8   : > { %7700 = vmatpush3.bf16.msra.mxu0 %v1951_v45  ;;  %7671 = vmatprep.mubr.msk.bf16.mxu0 %vm787_vm4, %v9414_v10  ;;  %v1942_v45 = vrot.slane %v1940_v7, 5 }
  0xe9   : > { %8824 = vmatprep.subr.msk.bf16.mxu0 %vm836_vm0, %v339_v24  ;;  %v11323_v24 = vld [vmem:[#allocation26_spill] sm:$0xff]  ;;  %v1933_v57 = vsel %vm8998_vm3, %v1928_v31, %v1932_v51 }
  0xea   : > { %v1943_v0 = vsel %vm8998_vm3, %v1938_v26, %v1942_v45 }
  0xeb   : > { %v9706_v50 = vcombine.low %v1933_v57, %v1943_v0 }
  0xef   : > { %7672 = vmatmul.mubr.msk.bf16.gmra.mrb[4].mxu0 %vm787_vm4, %v9326_v5 }
  0xf0   : > { %7675 = vmatprep.mubr.msk.bf16.mxu0 %vm787_vm4, %v9330_v13 }
  0xf7   : > { %7676 = vmatmul.mubr.msk.bf16.gmra.mrb[8].mxu0 %vm787_vm4, %v9334_v46 }
  0xf8   : > { %7679 = vmatprep.mubr.msk.bf16.mxu0 %vm787_vm4, %v9338_v63 }
  0xff   : > { %7680 = vmatmul.mubr.msk.bf16.gmra.mrb[12].mxu0 %vm787_vm4, %v9346_v30 }
 0x100   : > { %7683 = vmatprep.mubr.msk.bf16.mxu0 %vm787_vm4, %v9350_v37 }
 0x107   : > { %7684 = vmatmul.mubr.msk.bf16.gmra.mrb[16].mxu0 %vm787_vm4, %v9354_v25 }
 0x108   : > { %7687 = vmatprep.mubr.msk.bf16.mxu0 %vm787_vm4, %v9358_v43 }
 0x10f   : > { %7688 = vmatmul.mubr.msk.bf16.gmra.mrb[20].mxu0 %vm787_vm4, %v9362_v47 }
 0x110   : > { %7691 = vmatprep.mubr.msk.bf16.mxu0 %vm787_vm4, %v9366_v52 }
 0x117   : > { %7692 = vmatmul.mubr.msk.bf16.gmra.mrb[24].mxu0 %vm787_vm4, %v9372_v2 }
 0x118   : > { %7695 = vmatprep.mubr.msk.bf16.mxu0 %vm787_vm4, %v9376_v15 }
 0x11f   : > { %7696 = vmatmul.mubr.msk.bf16.gmra.mrb[28].mxu0 %vm787_vm4, %v9658_v59 }
 0x120   : > { %7701 = vmatprep.mubr.msk.bf16.mxu0 %vm787_vm4, %v11310_v62 }
 0x127   : > { %7702 = vmatmul.mubr.msk.bf16.vlgmr.msra.gmra.mrb[0].mxu0 %vm787_vm4, %v11311_v16 }
 0x128   : > { %7734 = vmatpush3.bf16.msra.mxu0 %v2161_v55  ;;  %7705 = vmatprep.mubr.msk.bf16.mxu0 %vm787_vm4, %v11312_v60  ;;  %v11324_v55 = vld [vmem:[#allocation27_spill] sm:$0xff] }
 0x129   : > { %8825 = vmatprep.subr.msk.bf16.mxu0 %vm836_vm0, %v340_v61  ;;  %v6868_v61 = vrot.slane %v9651_v38, 9  ;;  %v2591_v38 = vsel %vm836_vm0, %v341_v39, 0 }
 0x12f   : > { %7706 = vmatmul.mubr.msk.bf16.gmra.mrb[4].mxu0 %vm787_vm4, %v11313_v20 }
 0x130   : > { %7709 = vmatprep.mubr.msk.bf16.mxu0 %vm787_vm4, %v11314_v17 }
 0x137   : > { %7710 = vmatmul.mubr.msk.bf16.gmra.mrb[8].mxu0 %vm787_vm4, %v11315_v54 }
 0x138   : > { %7713 = vmatprep.mubr.msk.bf16.mxu0 %vm787_vm4, %v11316_v36 }
 0x13f   : > { %7714 = vmatmul.mubr.msk.bf16.gmra.mrb[12].mxu0 %vm787_vm4, %v11317_v11 }
 0x140   : > { %7717 = vmatprep.mubr.msk.bf16.mxu0 %vm787_vm4, %v11318_v6 }
 0x147   : > { %7718 = vmatmul.mubr.msk.bf16.gmra.mrb[16].mxu0 %vm787_vm4, %v11319_v12 }
 0x148   : > { %7721 = vmatprep.mubr.msk.bf16.mxu0 %vm787_vm4, %v11320_v8 }
 0x14f   : > { %7722 = vmatmul.mubr.msk.bf16.gmra.mrb[20].mxu0 %vm787_vm4, %v11321_v44 }
 0x150   : > { %7725 = vmatprep.mubr.msk.bf16.mxu0 %vm787_vm4, %v11322_v3 }
 0x157   : > { %7726 = vmatmul.mubr.msk.bf16.gmra.mrb[24].mxu0 %vm787_vm4, %v11323_v24 }
 0x158   : > { %7729 = vmatprep.mubr.msk.bf16.mxu0 %vm787_vm4, %v11324_v55 }
 0x15f   : > { %7730 = vmatmul.mubr.msk.bf16.gmra.mrb[28].mxu0 %vm787_vm4, %v9706_v50 }
 0x160   : > { %7735 = vmatprep.mubr.msk.bf16.mxu0 %vm787_vm4, %v9396_v40  ;;  %v2149_v40 = vrot.slane %v9654_v35, 5  ;;  %v342_v35 = vld [vmem:[%s11193_s1 + $0x10] sm:$0x3] }
 0x162   : > { %v2151_v51 = vrot.slane %v2149_v40, 4  ;;  %v2150_v53 = vsel %vm9380_vm7, %v6868_v61, %v2149_v40  ;;  %v9985_v61 = vld [vmem:[%s11195_s3] sm:$0xf] }
 0x164   : > { %v2153_v34 = vsel %vm9380_vm7, %v2151_v51, %v2152_v4  ;;  %v9992_v51 = vld [vmem:[%s11196_s4] ss:$0 sm:$0xff] }
 0x165   : > { %v9751_v7 = vcombine.low %v2150_v53, %v2153_v34 }
 0x167   : > { %7736 = vmatmul.mubr.msk.bf16.vlgmr.msra.gmra.mrb[0].mxu0 %vm787_vm4, %v9577_v49 }
 0x168   : > { %7768 = vmatpush3.bf16.msra.mxu0 %v2365_v48  ;;  %7739 = vmatprep.mubr.msk.bf16.mxu0 %vm787_vm4, %v9420_v41 }
 0x169   : > { %8826 = vmatprep.subr.msk.bf16.mxu0 %vm836_vm0, %v341_v39 }
 0x16f   : > { %7740 = vmatmul.mubr.msk.bf16.gmra.mrb[4].mxu0 %vm787_vm4, %v9443_v9 }
 0x170   : > { %7743 = vmatprep.mubr.msk.bf16.mxu0 %vm787_vm4, %v9451_v14 }
 0x177   : > { %7744 = vmatmul.mubr.msk.bf16.gmra.mrb[8].mxu0 %vm787_vm4, %v9461_v28 }
 0x178   : > { %7747 = vmatprep.mubr.msk.bf16.mxu0 %vm787_vm4, %v9467_v33 }
 0x17f   : > { %7748 = vmatmul.mubr.msk.bf16.gmra.mrb[12].mxu0 %vm787_vm4, %v9483_v22 }
 0x180   : > { %7751 = vmatprep.mubr.msk.bf16.mxu0 %vm787_vm4, %v9491_v23 }
 0x187   : > { %7752 = vmatmul.mubr.msk.bf16.gmra.mrb[16].mxu0 %vm787_vm4, %v9501_v19 }
 0x188   : > { %7755 = vmatprep.mubr.msk.bf16.mxu0 %vm787_vm4, %v9507_v56 }
 0x18f   : > { %7756 = vmatmul.mubr.msk.bf16.gmra.mrb[20].mxu0 %vm787_vm4, %v9521_v29 }
 0x190   : > { %7759 = vmatprep.mubr.msk.bf16.mxu0 %vm787_vm4, %v9529_v21 }
 0x197   : > { %7760 = vmatmul.mubr.msk.bf16.gmra.mrb[24].mxu0 %vm787_vm4, %v9538_v1 }
 0x198   : > { %7763 = vmatprep.mubr.msk.bf16.mxu0 %vm787_vm4, %v9542_v18 }
 0x19f   : > { %7764 = vmatmul.mubr.msk.bf16.gmra.mrb[28].mxu0 %vm787_vm4, %v9751_v7 }
 0x1a0   : > { %7769 = vmatprep.mubr.msk.bf16.mxu0 %vm787_vm4, %v9407_v27 }
 0x1a7   : > { %7770 = vmatmul.mubr.msk.bf16.vlgmr.msra.gmra.mrb[0].mxu0 %vm787_vm4, %v9414_v10  ;;  %v333_v10 = vld [vmem:[%s8963_s10 + $0xd4] sm:$0x1] }
 0x1a8   : > { %7802 = vmatpush3.bf16.msra.mxu0 %v2591_v38  ;;  %7773 = vmatprep.mubr.msk.bf16.mxu0 %vm787_vm4, %v9326_v5  ;;  %v9791_v5 = vld [vmem:[%s8963_s10 + $0xcc] sm:$0xf]  ;;  %v2580_v58 = vshll.u32 %v333_v10, 16 }
 0x1a9   : > { %8827 = vmatprep.subr.msk.bf16.mxu0 %vm836_vm0, %v342_v35 }
 0x1aa   : > { %v2582_v45 = vrot.slane %v2580_v58, 5 }
 0x1af   : > { %7774 = vmatmul.mubr.msk.bf16.gmra.mrb[4].mxu0 %vm787_vm4, %v9330_v13  ;;  %v9794_v13 = vld [vmem:[%s8963_s10 + $0xd0] sm:$0xf] }
 0x1b0   : > { %7777 = vmatprep.mubr.msk.bf16.mxu0 %vm787_vm4, %v9334_v46  ;;  %v6886_v46 = vcombine.low %v9791_v5, %v9794_v13 }
 0x1b7   : > { %7778 = vmatmul.mubr.msk.bf16.gmra.mrb[8].mxu0 %vm787_vm4, %v9338_v63  ;;  %v9802_v63 = vld [vmem:[%s11194_s2] sm:$0x3] }
 0x1b8   : > { %7781 = vmatprep.mubr.msk.bf16.mxu0 %vm787_vm4, %v9346_v30  ;;  %8829 = vmatprep.subr.msk.bf16.mxu1 %vm836_vm0, %v9802_v63  ;;  %v2801_v30 = vsel %vm836_vm0, %v342_v35, 0 }
 0x1bf   : > { %7782 = vmatmul.mubr.msk.bf16.gmra.mrb[12].mxu0 %vm787_vm4, %v9350_v37  ;;  %v2561_v37 = vshrl.u32 %v9791_v5, 16 }
 0x1c0   : > { %7785 = vmatprep.mubr.msk.bf16.mxu0 %vm787_vm4, %v9354_v25  ;;  %v2564_v25 = vshll.u32 %v9791_v5, 16 }
 0x1c7   : > { %7786 = vmatmul.mubr.msk.bf16.gmra.mrb[16].mxu0 %vm787_vm4, %v9358_v43  ;;  %v2574_v43 = vshrl.u32 %v9794_v13, 16 }
 0x1c8   : > { %7789 = vmatprep.mubr.msk.bf16.mxu0 %vm787_vm4, %v9362_v47  ;;  %v2570_v47 = vshll.u32 %v9794_v13, 16 }
 0x1c9   : > { %v2576_v27 = vrot.slane %v2574_v43, 4 }
 0x1cf   : > { %7790 = vmatmul.mubr.msk.bf16.gmra.mrb[20].mxu0 %vm787_vm4, %v9366_v52  ;;  %v2563_v52 = vrot.slane %v2561_v37, 4 }
 0x1d0   : > { %7793 = vmatprep.mubr.msk.bf16.mxu0 %vm787_vm4, %v9372_v2  ;;  %v2566_v2 = vrot.slane %v2564_v25, 5 }
 0x1d7   : > { %7794 = vmatmul.mubr.msk.bf16.gmra.mrb[24].mxu0 %vm787_vm4, %v9376_v15  ;;  %v2572_v15 = vrot.slane %v2570_v47, 5 }
 0x1d8   : > { %7797 = vmatprep.mubr.msk.bf16.mxu0 %vm787_vm4, %v9658_v59  ;;  %v2567_v59 = vor.u32 %v2566_v2, %v2563_v52 }
 0x1da   : > { %v2568_v31 = vrot.slane %v2567_v59, 4 }
 0x1dc   : > { %v2573_v57 = vsel %vm8998_vm3, %v2568_v31, %v2572_v15 }
 0x1df   : > { %7798 = vmatmul.mubr.msk.bf16.gmra.mrb[28].mxu0 %vm787_vm4, %v6886_v46 }
 0x1e0   : > { %7803 = vmatprep.mubr.msk.bf16.mxu0 %vm787_vm4, %v11311_v16 }
 0x1e7   : > { %7804 = vmatmul.mubr.msk.bf16.vlgmr.msra.gmra.mrb[0].mxu0 %vm787_vm4, %v11312_v60 }
 0x1e8   : > { %7836 = vmatpush3.bf16.msra.mxu0 %v2801_v30  ;;  %7807 = vmatprep.mubr.msk.bf16.mxu0 %vm787_vm4, %v11313_v20 }
 0x1e9   : > { %8828 = vmatprep.subr.msk.bf16.mxu0 %vm836_vm0, %v9802_v63 }
 0x1ef   : > { %7808 = vmatmul.mubr.msk.bf16.gmra.mrb[4].mxu0 %vm787_vm4, %v11314_v17 }
 0x1f0   : > { %7811 = vmatprep.mubr.msk.bf16.mxu0 %vm787_vm4, %v11315_v54 }
 0x1f7   : > { %7812 = vmatmul.mubr.msk.bf16.gmra.mrb[8].mxu0 %vm787_vm4, %v11316_v36 }
 0x1f8   : > { %7815 = vmatprep.mubr.msk.bf16.mxu0 %vm787_vm4, %v11317_v11 }
 0x1ff   : > { %7816 = vmatmul.mubr.msk.bf16.gmra.mrb[12].mxu0 %vm787_vm4, %v11318_v6  ;;  %v2577_v6 = vor.u32 %v2576_v27, %v2572_v15 }
 0x200   : > { %7819 = vmatprep.mubr.msk.bf16.mxu0 %vm787_vm4, %v11319_v12 }
 0x201   : > { %v2578_v26 = vrot.slane %v2577_v6, 4 }
 0x203   : > { %v2583_v0 = vsel %vm8998_vm3, %v2578_v26, %v2582_v45 }
 0x204   : > { %v6903_v48 = vcombine.low %v2573_v57, %v2583_v0 }
 0x207   : > { %7820 = vmatmul.mubr.msk.bf16.gmra.mrb[16].mxu0 %vm787_vm4, %v11320_v8 }
 0x208   : > { %7823 = vmatprep.mubr.msk.bf16.mxu0 %vm787_vm4, %v11321_v44 }
 0x20f   : > { %7824 = vmatmul.mubr.msk.bf16.gmra.mrb[20].mxu0 %vm787_vm4, %v11322_v3 }
 0x210   : > { %7827 = vmatprep.mubr.msk.bf16.mxu0 %vm787_vm4, %v11323_v24 }
 0x217   : > { %7828 = vmatmul.mubr.msk.bf16.gmra.mrb[24].mxu0 %vm787_vm4, %v11324_v55 }
 0x218   : > { %7831 = vmatprep.mubr.msk.bf16.mxu0 %vm787_vm4, %v9706_v50 }
 0x21f   : > { %7832 = vmatmul.mubr.msk.bf16.gmra.mrb[28].mxu0 %vm787_vm4, %v6903_v48 }
 0x220   : > { %7837 = vmatprep.mubr.msk.bf16.mxu0 %vm787_vm4, %v9577_v49 }
 0x227   : > { %7838 = vmatmul.mubr.msk.bf16.vlgmr.msra.gmra.mrb[0].mxu0 %vm787_vm4, %v9420_v41  ;;  %v2789_v41 = vrot.slane %v9794_v13, 5 }
 0x228   : > { %7841 = vmatprep.mubr.msk.bf16.mxu0 %vm787_vm4, %v9443_v9  ;;  %v6920_v9 = vrot.slane %v9791_v5, 9 }
 0x22f   : > { %7842 = vmatmul.mubr.msk.bf16.gmra.mrb[4].mxu0 %vm787_vm4, %v9451_v14  ;;  %v2791_v14 = vrot.slane %v2789_v41, 4 }
 0x230   : > { %7845 = vmatprep.mubr.msk.bf16.mxu0 %vm787_vm4, %v9461_v28  ;;  %v2792_v28 = vrot.slane %v333_v10, 5 }
 0x237   : > { %7846 = vmatmul.mubr.msk.bf16.gmra.mrb[8].mxu0 %vm787_vm4, %v9467_v33  ;;  %v2790_v33 = vsel %vm9380_vm7, %v6920_v9, %v2789_v41 }
 0x238   : > { %7849 = vmatprep.mubr.msk.bf16.mxu0 %vm787_vm4, %v9483_v22  ;;  %v2793_v22 = vsel %vm9380_vm7, %v2791_v14, %v2792_v28 }
 0x23f   : > { %7850 = vmatmul.mubr.msk.bf16.gmra.mrb[12].mxu0 %vm787_vm4, %v9491_v23  ;;  %v6921_v23 = vcombine.low %v2790_v33, %v2793_v22 }
 0x240   : > { %7853 = vmatprep.mubr.msk.bf16.mxu0 %vm787_vm4, %v9501_v19  ;;  %v3076_v19 = vsel %vm836_vm0, %v9802_v63, 0  ;;  %vm10008_vm0 = vmor %vm3391_vm13, %vm3392_vm14 }
 0x241   : > { %8210 = vmatpush3.bf16.msra.mxu1 %v3076_v19  ;;  %7870 = vmatpush3.bf16.msra.mxu0 %v3076_v19 }
 0x244   : > { %7888 = vmatmul.mubr.msk.bf16.vlgmr.msra.gmra.mrb[0].mxu1 %vm787_vm4, %v11319_v12 }
 0x245   : > { %7891 = vmatprep.mubr.msk.bf16.mxu1 %vm787_vm4, %v11320_v8 }
 0x247   : > { %7854 = vmatmul.mubr.msk.bf16.gmra.mrb[16].mxu0 %vm787_vm4, %v9507_v56  ;;  %v8899_v56 = vmov 0  }
 0x248   : > { %7857 = vmatprep.mubr.msk.bf16.mxu0 %vm787_vm4, %v9521_v29  ;;  %3247 = vst.msk [vmem:[#allocation2 + $0x18] sm:$0xf] %vm3239_vm8, %v8899_v56  ;;  %3240 = vst.msk [vmem:[#allocation2] sm:$0xf] %vm3239_vm8, %v8899_v56  ;;  %v344_v29 = vld [vmem:[%s11195_s3 + $0x4] sm:$0xf] }
 0x249   : > { %3241 = vst.msk [vmem:[#allocation2 + $0x4] sm:$0xf] %vm3239_vm8, %v8899_v56  ;;  %3244 = vst.msk [vmem:[#allocation2 + $0xc] sm:$0xf] %vm3239_vm8, %v8899_v56  ;;  %8830 = vmatprep.subr.msk.bf16.mxu1 %vm4367_vm10, %v344_v29 }
 0x24a   : > { %3245 = vst.msk [vmem:[#allocation2 + $0x10] sm:$0xf] %vm3239_vm8, %v8899_v56  ;;  %3248 = vst.msk [vmem:[#allocation2 + $0x1c] sm:$0xf] %vm3239_vm8, %v8899_v56 }
 0x24b   : > { %3250 = vst.msk [vmem:[#allocation2 + $0x24] sm:$0xf] %vm3239_vm8, %v8899_v56  ;;  %3251 = vst.msk [vmem:[#allocation2 + $0x28] sm:$0xf] %vm3239_vm8, %v8899_v56 }
 0x24c   : > { %3253 = vst.msk [vmem:[#allocation2 + $0x30] sm:$0xf] %vm3239_vm8, %v8899_v56  ;;  %3254 = vst.msk [vmem:[#allocation2 + $0x34] sm:$0xf] %vm3239_vm8, %v8899_v56  ;;  %7892 = vmatmul.mubr.msk.bf16.gmra.mrb[4].mxu1 %vm787_vm4, %v11321_v44 }
 0x24d   : > { %3256 = vst.msk [vmem:[#allocation2 + $0x3c] sm:$0xf] %vm3239_vm8, %v8899_v56  ;;  %3257 = vst.msk [vmem:[#allocation2 + $0x40] sm:$0xf] %vm3239_vm8, %v8899_v56  ;;  %7895 = vmatprep.mubr.msk.bf16.mxu1 %vm787_vm4, %v11322_v3 }
 0x24e   : > { %3259 = vst.msk [vmem:[#allocation2 + $0x48] sm:$0xf] %vm3239_vm8, %v8899_v56  ;;  %3260 = vst.msk [vmem:[#allocation2 + $0x4c] sm:$0xf] %vm3239_vm8, %v8899_v56 }
 0x24f   : > { %7858 = vmatmul.mubr.msk.bf16.gmra.mrb[20].mxu0 %vm787_vm4, %v9529_v21  ;;  %3262 = vst.msk [vmem:[#allocation2 + $0x54] sm:$0xf] %vm3239_vm8, %v8899_v56  ;;  %3263 = vst.msk [vmem:[#allocation2 + $0x58] sm:$0xf] %vm3239_vm8, %v8899_v56  ;;  %v4369_v21 = vsel %vm4367_vm10, %v344_v29, 0 }
 0x250   : > { %7861 = vmatprep.mubr.msk.bf16.mxu0 %vm787_vm4, %v9538_v1  ;;  %3265 = vst.msk [vmem:[#allocation2 + $0x60] sm:$0xf] %vm3239_vm8, %v8899_v56  ;;  %3266 = vst.msk [vmem:[#allocation2 + $0x64] sm:$0xf] %vm3239_vm8, %v8899_v56  ;;  %7904 = vmatpush3.bf16.msra.mxu1 %v4369_v21  ;;  %v3832_v1 = vld [vmem:[#allocation2] sm:$0xf] }
 0x251   : > { %3268 = vst.msk [vmem:[#allocation2 + $0x6c] sm:$0xf] %vm3239_vm8, %v8899_v56  ;;  %3269 = vst.msk [vmem:[#allocation2 + $0x70] sm:$0xf] %vm3239_vm8, %v8899_v56  ;;  %v3887_v49 = vshrl.u32 %v3832_v1, 16  ;;  %8831 = vmatprep.subr.msk.bf16.mxu1 %vm4367_vm10, %v9985_v61 }
 0x252   : > { %3271 = vst.msk [vmem:[#allocation2 + $0x78] sm:$0xf] %vm3239_vm8, %v8899_v56  ;;  %3272 = vst.msk [vmem:[#allocation2 + $0x7c] sm:$0xf] %vm3239_vm8, %v8899_v56  ;;  %v3727_v0 = vld [vmem:[#allocation2 + $0x18] sm:$0xf] }
 0x253   : > { %3274 = vst.msk [vmem:[#allocation2 + $0x84] sm:$0xf] %vm3239_vm8, %v8899_v56  ;;  %3275 = vst.msk [vmem:[#allocation2 + $0x88] sm:$0xf] %vm3239_vm8, %v8899_v56 }
 0x254   : > { %3277 = vst.msk [vmem:[#allocation2 + $0x90] sm:$0xf] %vm3239_vm8, %v8899_v56  ;;  %3278 = vst.msk [vmem:[#allocation2 + $0x94] sm:$0xf] %vm3239_vm8, %v8899_v56  ;;  %7896 = vmatmul.mubr.msk.bf16.gmra.mrb[8].mxu1 %vm787_vm4, %v11323_v24 }
 0x255   : > { %3280 = vst.msk [vmem:[#allocation2 + $0x9c] sm:$0xf] %vm3239_vm8, %v8899_v56  ;;  %3281 = vst.msk [vmem:[#allocation2 + $0xa0] sm:$0xf] %vm3239_vm8, %v8899_v56  ;;  %7899 = vmatprep.mubr.msk.bf16.mxu1 %vm787_vm4, %v11324_v55 }
 0x256   : > { %3283 = vst.msk [vmem:[#allocation2 + $0xa8] sm:$0xf] %vm3239_vm8, %v8899_v56  ;;  %3284 = vst.msk [vmem:[#allocation2 + $0xac] sm:$0xf] %vm3239_vm8, %v8899_v56 }
 0x257   : > { %7862 = vmatmul.mubr.msk.bf16.gmra.mrb[24].mxu0 %vm787_vm4, %v9542_v18  ;;  %3286 = vst.msk [vmem:[#allocation2 + $0xb4] sm:$0xf] %vm3239_vm8, %v8899_v56  ;;  %3287 = vst.msk [vmem:[#allocation2 + $0xb8] sm:$0xf] %vm3239_vm8, %v8899_v56  ;;  %v3833_v18 = vld [vmem:[#allocation2 + $0x4] sm:$0xf] }
 0x258   : > { %7865 = vmatprep.mubr.msk.bf16.mxu0 %vm787_vm4, %v9751_v7  ;;  %3289 = vst.msk [vmem:[#allocation2 + $0xc0] sm:$0xf] %vm3239_vm8, %v8899_v56  ;;  %3290 = vst.msk [vmem:[#allocation2 + $0xc4] sm:$0xf] %vm3239_vm8, %v8899_v56 }
 0x259   : > { %3292 = vst.msk [vmem:[#allocation2 + $0xcc] sm:$0xf] %vm3239_vm8, %v8899_v56  ;;  %3293 = vst.msk [vmem:[#allocation2 + $0xd0] sm:$0xf] %vm3239_vm8, %v8899_v56 }
 0x25a   : > { %3249 = vst.msk [vmem:[#allocation2 + $0x20] sm:$0x1] %vm3242_vm9, %v8899_v56  ;;  %3243 = vst.msk [vmem:[#allocation2 + $0x8] sm:$0x1] %vm3242_vm9, %v8899_v56 }
 0x25b   : > { %3246 = vst.msk [vmem:[#allocation2 + $0x14] sm:$0x1] %vm3242_vm9, %v8899_v56  ;;  %3252 = vst.msk [vmem:[#allocation2 + $0x2c] sm:$0x1] %vm3242_vm9, %v8899_v56 }
 0x25c   : > { %3255 = vst.msk [vmem:[#allocation2 + $0x38] sm:$0x1] %vm3242_vm9, %v8899_v56  ;;  %3258 = vst.msk [vmem:[#allocation2 + $0x44] sm:$0x1] %vm3242_vm9, %v8899_v56  ;;  %7900 = vmatmul.mubr.msk.bf16.gmra.mrb[12].mxu1 %vm787_vm4, %v9706_v50 }
 0x25d   : > { %3261 = vst.msk [vmem:[#allocation2 + $0x50] sm:$0x1] %vm3242_vm9, %v8899_v56  ;;  %3264 = vst.msk [vmem:[#allocation2 + $0x5c] sm:$0x1] %vm3242_vm9, %v8899_v56 }
 0x25e   : > { %3267 = vst.msk [vmem:[#allocation2 + $0x68] sm:$0x1] %vm3242_vm9, %v8899_v56  ;;  %3270 = vst.msk [vmem:[#allocation2 + $0x74] sm:$0x1] %vm3242_vm9, %v8899_v56 }
 0x25f   : > { %7866 = vmatmul.mubr.msk.bf16.gmra.mrb[28].mxu0 %vm787_vm4, %v6921_v23  ;;  %3273 = vst.msk [vmem:[#allocation2 + $0x80] sm:$0x1] %vm3242_vm9, %v8899_v56  ;;  %3276 = vst.msk [vmem:[#allocation2 + $0x8c] sm:$0x1] %vm3242_vm9, %v8899_v56  ;;  %v3718_v23 = vld [vmem:[#allocation2 + $0xc] sm:$0xf] }
 0x260   : > { %7871 = vmatprep.mubr.msk.bf16.mxu0 %vm787_vm4, %v11310_v62  ;;  %3279 = vst.msk [vmem:[#allocation2 + $0x98] sm:$0x1] %vm3242_vm9, %v8899_v56  ;;  %3282 = vst.msk [vmem:[#allocation2 + $0xa4] sm:$0x1] %vm3242_vm9, %v8899_v56  ;;  %v3890_v62 = vshll.u32 %v3832_v1, 16 }
 0x261   : > { %3285 = vst.msk [vmem:[#allocation2 + $0xb0] sm:$0x1] %vm3242_vm9, %v8899_v56  ;;  %3288 = vst.msk [vmem:[#allocation2 + $0xbc] sm:$0x1] %vm3242_vm9, %v8899_v56  ;;  %v3834_v8 = vld [vmem:[#allocation2 + $0x8] sm:$0x1] }
 0x262   : > { %3291 = vst.msk [vmem:[#allocation2 + $0xc8] sm:$0x1] %vm3242_vm9, %v8899_v56  ;;  %3294 = vst.msk [vmem:[#allocation2 + $0xd4] sm:$0x1] %vm3242_vm9, %v8899_v56 }
 0x267   : > { %7872 = vmatmul.mubr.msk.bf16.vlgmr.msra.gmra.mrb[32].mxu0 %vm787_vm4, %v11311_v16  ;;  %v3896_v16 = vshll.u32 %v3833_v18, 16 }
 0x268   : > { %7875 = vmatprep.mubr.msk.bf16.mxu0 %vm787_vm4, %v11312_v60  ;;  %v3900_v60 = vshrl.u32 %v3833_v18, 16 }
 0x26a   : > { %v3902_v12 = vrot.slane %v3900_v60, 4 }
 0x26f   : > { %7876 = vmatmul.mubr.msk.bf16.gmra.mrb[36].mxu0 %vm787_vm4, %v11313_v20  ;;  %v3889_v20 = vrot.slane %v3887_v49, 4 }
 0x270   : > { %7879 = vmatprep.mubr.msk.bf16.mxu0 %vm787_vm4, %v11314_v17  ;;  %v3892_v17 = vrot.slane %v3890_v62, 5  ;;  %v3731_v62 = vld [vmem:[#allocation2 + $0x20] sm:$0x1] }
 0x272   : > { %v3893_v44 = vor.u32 %v3892_v17, %v3889_v20 }
 0x274   : > { %v3894_v24 = vrot.slane %v3893_v44, 4 }
 0x277   : > { %7880 = vmatmul.mubr.msk.bf16.gmra.mrb[40].mxu0 %vm787_vm4, %v11315_v54  ;;  %v3898_v54 = vrot.slane %v3896_v16, 5 }
 0x278   : > { %7883 = vmatprep.mubr.msk.bf16.mxu0 %vm787_vm4, %v11316_v36  ;;  %v3906_v36 = vshll.u32 %v3834_v8, 16 }
 0x279   : > { %v3903_v3 = vor.u32 %v3902_v12, %v3898_v54  ;;  %v3724_v12 = vld [vmem:[#allocation2 + $0x14] sm:$0x1] }
 0x27a   : > { %v3908_v50 = vrot.slane %v3906_v36, 5 }
 0x27b   : > { %v3904_v55 = vrot.slane %v3903_v3, 4 }
 0x27d   : > { %v3909_v39 = vsel %vm8998_vm3, %v3904_v55, %v3908_v50 }
 0x27f   : > { %7884 = vmatmul.mubr.msk.bf16.gmra.mrb[44].mxu0 %vm787_vm4, %v11317_v11  ;;  %v3899_v11 = vsel %vm8998_vm3, %v3894_v24, %v3898_v54 }
 0x280   : > { %v6988_v40 = vcombine.low %v3899_v11, %v3909_v39 }
 0x282   : > { %7905 = vmatprep.mubr.msk.bf16.mxu1 %vm4318_vm11, %v6988_v40 }
 0x2fa   : > { %v7839_v4 = vpop.f32.mrb[0].mxu0 }
 0x2fb   : > { %v3005_v53 = vadd.f32 %v7839_v4, %v9992_v51  ;;  %v2837_v34 = vpop.f32.mrb[1].mxu0 }
 0x2fc   : > { %v3003_v7 = vadd.f32 %v9992_v51, %v2837_v34  ;;  %v7840_v38 = vpop.f32.mrb[2].mxu0 }
 0x2fd   : > { %v3037_v35 = vmax.f32 %v3005_v53, 0.0  ;;  %v3006_v5 = vadd.f32 %v7840_v38, %v9992_v51  ;;  %v2840_v13 = vpop.f32.mrb[3].mxu0 }
 0x2fe   : > { %v3035_v46 = vmax.f32 %v3003_v7, 0.0  ;;  %v3004_v63 = vadd.f32 %v9992_v51, %v2840_v13 }
 0x2ff   : > { %v7210_v30 = vpack.c.bf16 %v3037_v35, %v3037_v35  ;;  %v3038_v37 = vmax.f32 %v3006_v5, 0.0 }
 0x300   : > { %v7208_v25 = vpack.c.bf16 %v3035_v46, %v3035_v46  ;;  %v3036_v43 = vmax.f32 %v3004_v63, 0.0  ;;  %v3741_v46 = vld [vmem:[#allocation2 + $0x30] sm:$0xf] }
 0x301   : > { %v3412_v47 = vshrl.u32 %v7210_v30, 16  ;;  %v7211_v52 = vpack.c.bf16 %v3038_v37, %v3038_v37  ;;  %v3415_v2 = vshll.u32 %v7210_v30, 16 }
 0x302   : > { %v3395_v15 = vshrl.u32 %v7208_v25, 16  ;;  %v3398_v27 = vshll.u32 %v7208_v25, 16  ;;  %v7209_v10 = vpack.c.bf16 %v3036_v43, %v3036_v43  ;;  %v7843_v59 = vpop.f32.mrb[4].mxu0  ;;  %v10040_v43 = vsel %vm4367_vm10, %v9985_v61, 0 }
 0x303   : > { %v3414_v6 = vrot.slane %v3412_v47, 7  ;;  %v3420_v58 = vshrl.u32 %v7211_v52, 16  ;;  %v3423_v31 = vshll.u32 %v7211_v52, 16  ;;  %v3009_v26 = vadd.f32 %v7843_v59, %v9992_v51  ;;  %v2853_v45 = vpop.f32.mrb[5].mxu0 }
 0x304   : > { %v3397_v48 = vrot.slane %v3395_v15, 7  ;;  %v3403_v41 = vshrl.u32 %v7209_v10, 16  ;;  %v3406_v9 = vshll.u32 %v7209_v10, 16  ;;  %v3007_v14 = vadd.f32 %v9992_v51, %v2853_v45  ;;  %v7844_v28 = vpop.f32.mrb[6].mxu0 }
 0x305   : > { %v3417_v33 = vor.u32 %v3415_v2, %v3414_v6  ;;  %v3418_v22 = vrot.slane %v3414_v6, 4  ;;  %v3422_v56 = vrot.slane %v3420_v58, 7  ;;  %v3041_v29 = vmax.f32 %v3009_v26, 0.0  ;;  %v2856_v21 = vpop.f32.mrb[7].mxu0  ;;  %v3734_v2 = vld [vmem:[#allocation2 + $0x24] sm:$0xf] }
 0x306   : > { %v3400_v1 = vor.u32 %v3398_v27, %v3397_v48  ;;  %v3401_v18 = vrot.slane %v3397_v48, 4  ;;  %v3405_v16 = vrot.slane %v3403_v41, 7  ;;  %v3039_v60 = vmax.f32 %v3007_v14, 0.0 }
 0x307   : > { %v3728_v20 = vsel %vm10001_vm15, %v3417_v33, %v3727_v0  ;;  %v3425_v17 = vor.u32 %v3423_v31, %v3422_v56  ;;  %v3427_v54 = vrot.slane %v3422_v56, 4  ;;  %v7214_v8 = vpack.c.bf16 %v3041_v29, %v3041_v29  ;;  %v3745_v56 = vld [vmem:[#allocation2 + $0x38] sm:$0x1]  ;;  %v3738_v29 = vld [vmem:[#allocation2 + $0x2c] sm:$0x1] }
 0x308   : > { %3729 = vst [vmem:[#allocation2 + $0x18] sm:$0xf] %v3728_v20  ;;  %v3719_v44 = vsel %vm10001_vm15, %v3400_v1, %v3718_v23  ;;  %v3408_v3 = vor.u32 %v3406_v9, %v3405_v16  ;;  %v3410_v36 = vrot.slane %v3405_v16, 4  ;;  %v7212_v24 = vpack.c.bf16 %v3039_v60, %v3039_v60 }
 0x309   : > { %3720 = vst [vmem:[#allocation2 + $0xc] sm:$0xf] %v3719_v44  ;;  %v3426_v55 = vsel %vm10008_vm0, %v3418_v22, %v3425_v17  ;;  %v3732_v50 = vsel %vm10014_vm1, %v3427_v54, %v3731_v62  ;;  %v3446_v11 = vshrl.u32 %v7214_v8, 16  ;;  %v3449_v4 = vshll.u32 %v7214_v8, 16  ;;  %v3755_v44 = vld [vmem:[#allocation2 + $0x48] sm:$0xf] }
 0x30a   : > { %3730 = vst.msk [vmem:[#allocation2 + $0x1c] sm:$0xf] %vm3239_vm8, %v3426_v55  ;;  %3733 = vst [vmem:[#allocation2 + $0x20] sm:$0x1] %v3732_v50  ;;  %v3409_v39 = vsel %vm10008_vm0, %v3401_v18, %v3408_v3  ;;  %v3725_v40 = vsel %vm10014_vm1, %v3410_v36, %v3724_v12  ;;  %v3429_v53 = vshrl.u32 %v7212_v24, 16  ;;  %v7847_v34 = vpop.f32.mrb[8].mxu0  ;;  %v3010_v38 = vadd.f32 %v7844_v28, %v9992_v51 }
 0x30b   : > { %3721 = vst.msk [vmem:[#allocation2 + $0x10] sm:$0xf] %vm3239_vm8, %v3409_v39  ;;  %3726 = vst [vmem:[#allocation2 + $0x14] sm:$0x1] %v3725_v40  ;;  %v10032_v7 = vrot.slane %v3446_v11, 7  ;;  %v3008_v35 = vadd.f32 %v9992_v51, %v2856_v21  ;;  %v3013_v5 = vadd.f32 %v7847_v34, %v9992_v51  ;;  %v2869_v13 = vpop.f32.mrb[9].mxu0 }
 0x30c   : > { %v3431_v63 = vrot.slane %v3429_v53, 7  ;;  %v3432_v30 = vshll.u32 %v7212_v24, 16  ;;  %v3011_v37 = vadd.f32 %v9992_v51, %v2869_v13  ;;  %v7848_v25 = vpop.f32.mrb[10].mxu0  ;;  %v3042_v15 = vmax.f32 %v3010_v38, 0.0 }
 0x30d   : > { %v3451_v47 = vor.u32 %v3449_v4, %v10032_v7  ;;  %v3452_v52 = vrot.slane %v10032_v7, 4  ;;  %v3040_v27 = vmax.f32 %v3008_v35, 0.0  ;;  %v2872_v10 = vpop.f32.mrb[11].mxu0  ;;  %v3045_v58 = vmax.f32 %v3013_v5, 0.0  ;;  %v3748_v4 = vld [vmem:[#allocation2 + $0x3c] sm:$0xf] }
 0x30e   : > { %v3434_v59 = vor.u32 %v3432_v30, %v3431_v63  ;;  %v3435_v6 = vrot.slane %v3431_v63, 4  ;;  %v3043_v31 = vmax.f32 %v3011_v37, 0.0  ;;  %v7215_v45 = vpack.c.bf16 %v3042_v15, %v3042_v15 }
 0x30f   : > { %v3742_v26 = vsel %vm10001_vm15, %v3451_v47, %v3741_v46  ;;  %v7213_v0 = vpack.c.bf16 %v3040_v27, %v3040_v27  ;;  %v3014_v61 = vadd.f32 %v7848_v25, %v9992_v51  ;;  %v7218_v41 = vpack.c.bf16 %v3045_v58, %v3045_v58 }
 0x310   : > { %3743 = vst [vmem:[#allocation2 + $0x30] sm:$0xf] %v3742_v26  ;;  %v3735_v48 = vsel %vm10001_vm15, %v3434_v59, %v3734_v2  ;;  %v7216_v9 = vpack.c.bf16 %v3043_v31, %v3043_v31  ;;  %v3012_v14 = vadd.f32 %v9992_v51, %v2872_v10  ;;  %v3454_v28 = vshrl.u32 %v7215_v45, 16  ;;  %v3759_v26 = vld [vmem:[#allocation2 + $0x50] sm:$0x1] }
 0x311   : > { %3736 = vst [vmem:[#allocation2 + $0x24] sm:$0xf] %v3735_v48  ;;  %v3457_v33 = vshll.u32 %v7215_v45, 16  ;;  %v3437_v22 = vshrl.u32 %v7213_v0, 16  ;;  %v3440_v23 = vshll.u32 %v7213_v0, 16  ;;  %v3480_v21 = vshrl.u32 %v7218_v41, 16 }
 0x312   : > { %v3483_v1 = vshll.u32 %v7218_v41, 16  ;;  %v3463_v18 = vshrl.u32 %v7216_v9, 16  ;;  %v3466_v62 = vshll.u32 %v7216_v9, 16  ;;  %v7851_v16 = vpop.f32.mrb[12].mxu0  ;;  %v3456_v60 = vrot.slane %v3454_v28, 7 }
 0x313   : > { %v3439_v20 = vrot.slane %v3437_v22, 7  ;;  %v3046_v17 = vmax.f32 %v3014_v61, 0.0  ;;  %v3044_v54 = vmax.f32 %v3012_v14, 0.0  ;;  %v2885_v12 = vpop.f32.mrb[13].mxu0  ;;  %v10050_v8 = vrot.slane %v3480_v21, 7 }
 0x314   : > { %v10052_v3 = vrot.slane %v3463_v18, 7  ;;  %v3017_v36 = vadd.f32 %v7851_v16, %v9992_v51  ;;  %v3015_v24 = vadd.f32 %v9992_v51, %v2885_v12  ;;  %v7852_v55 = vpop.f32.mrb[14].mxu0  ;;  %v3459_v50 = vor.u32 %v3457_v33, %v3456_v60  ;;  %v3752_v28 = vld [vmem:[#allocation2 + $0x44] sm:$0x1] }
 0x315   : > { %v3461_v11 = vrot.slane %v3456_v60, 4  ;;  %v3442_v39 = vor.u32 %v3440_v23, %v3439_v20  ;;  %v3444_v40 = vrot.slane %v3439_v20, 4  ;;  %v2888_v53 = vpop.f32.mrb[15].mxu0  ;;  %v3485_v34 = vor.u32 %v3483_v1, %v10050_v8 }
 0x316   : > { %v3486_v7 = vrot.slane %v10050_v8, 4  ;;  %v3468_v38 = vor.u32 %v3466_v62, %v10052_v3  ;;  %v3469_v35 = vrot.slane %v10052_v3, 4  ;;  %v3460_v5 = vsel %vm10008_vm0, %v3452_v52, %v3459_v50  ;;  %v3762_v50 = vld [vmem:[#allocation2 + $0x54] sm:$0xf] }
 0x317   : > { %v3746_v13 = vsel %vm10014_vm1, %v3461_v11, %v3745_v56  ;;  %v3443_v46 = vsel %vm10008_vm0, %v3435_v6, %v3442_v39  ;;  %v3739_v63 = vsel %vm10014_vm1, %v3444_v40, %v3738_v29  ;;  %3744 = vst.msk [vmem:[#allocation2 + $0x34] sm:$0xf] %vm3239_vm8, %v3460_v5  ;;  %v3756_v30 = vsel %vm10001_vm15, %v3485_v34, %v3755_v44 }
 0x318   : > { %3747 = vst [vmem:[#allocation2 + $0x38] sm:$0x1] %v3746_v13  ;;  %3737 = vst.msk [vmem:[#allocation2 + $0x28] sm:$0xf] %vm3239_vm8, %v3443_v46  ;;  %v3749_v37 = vsel %vm10001_vm15, %v3468_v38, %v3748_v4  ;;  %v7219_v25 = vpack.c.bf16 %v3046_v17, %v3046_v17  ;;  %v7217_v47 = vpack.c.bf16 %v3044_v54, %v3044_v54  ;;  %v3049_v52 = vmax.f32 %v3017_v36, 0.0 }
 0x319   : > { %3740 = vst [vmem:[#allocation2 + $0x2c] sm:$0x1] %v3739_v63  ;;  %3757 = vst [vmem:[#allocation2 + $0x48] sm:$0xf] %v3756_v30  ;;  %v3047_v2 = vmax.f32 %v3015_v24, 0.0  ;;  %v3018_v15 = vadd.f32 %v7852_v55, %v9992_v51  ;;  %v3016_v27 = vadd.f32 %v9992_v51, %v2888_v53 }
 0x31a   : > { %3750 = vst [vmem:[#allocation2 + $0x3c] sm:$0xf] %v3749_v37  ;;  %v3488_v10 = vshrl.u32 %v7219_v25, 16  ;;  %v3491_v59 = vshll.u32 %v7219_v25, 16  ;;  %v3471_v6 = vshrl.u32 %v7217_v47, 16  ;;  %v3474_v58 = vshll.u32 %v7217_v47, 16 }
 0x31b   : > { %v7855_v31 = vpop.f32.mrb[16].mxu0  ;;  %v7222_v45 = vpack.c.bf16 %v3049_v52, %v3049_v52  ;;  %v7220_v0 = vpack.c.bf16 %v3047_v2, %v3047_v2  ;;  %v3050_v61 = vmax.f32 %v3018_v15, 0.0  ;;  %v3048_v48 = vmax.f32 %v3016_v27, 0.0  ;;  %v3769_v55 = vld [vmem:[#allocation2 + $0x60] sm:$0xf] }
 0x31c   : > { %v2901_v41 = vpop.f32.mrb[17].mxu0  ;;  %v3490_v9 = vrot.slane %v3488_v10, 7  ;;  %v3473_v14 = vrot.slane %v3471_v6, 7  ;;  %v3021_v33 = vadd.f32 %v7855_v31, %v9992_v51  ;;  %v3835_v53 = vld [vmem:[#allocation2 + $0xc] sm:$0xf] }
 0x31d   : > { %v3019_v22 = vadd.f32 %v9992_v51, %v2901_v41  ;;  %v7856_v23 = vpop.f32.mrb[18].mxu0  ;;  %v3514_v56 = vshrl.u32 %v7222_v45, 16  ;;  %v3517_v29 = vshll.u32 %v7222_v45, 16  ;;  %v3497_v21 = vshrl.u32 %v7220_v0, 16  ;;  %v3773_v47 = vld [vmem:[#allocation2 + $0x68] sm:$0x1] }
 0x31e   : > { %v3500_v1 = vshll.u32 %v7220_v0, 16  ;;  %v2904_v18 = vpop.f32.mrb[19].mxu0  ;;  %v3493_v62 = vor.u32 %v3491_v59, %v3490_v9  ;;  %v3495_v16 = vrot.slane %v3490_v9, 4  ;;  %v3476_v60 = vor.u32 %v3474_v58, %v3473_v14  ;;  %v3766_v10 = vld [vmem:[#allocation2 + $0x5c] sm:$0x1] }
 0x31f   : > { %v3478_v20 = vrot.slane %v3473_v14, 4  ;;  %v3516_v17 = vrot.slane %v3514_v56, 7  ;;  %v3499_v54 = vrot.slane %v3497_v21, 7  ;;  %v7223_v12 = vpack.c.bf16 %v3050_v61, %v3050_v61  ;;  %v3783_v21 = vld [vmem:[#allocation2 + $0x78] sm:$0xf] }
 0x320   : > { %v7221_v8 = vpack.c.bf16 %v3048_v48, %v3048_v48  ;;  %v3494_v44 = vsel %vm10008_vm0, %v3486_v7, %v3493_v62  ;;  %v3760_v3 = vsel %vm10014_vm1, %v3495_v16, %v3759_v26  ;;  %v3477_v36 = vsel %vm10008_vm0, %v3469_v35, %v3476_v60 }
 0x321   : > { %v3753_v24 = vsel %vm10014_vm1, %v3478_v20, %v3752_v28  ;;  %3758 = vst.msk [vmem:[#allocation2 + $0x4c] sm:$0xf] %vm3239_vm8, %v3494_v44  ;;  %3761 = vst [vmem:[#allocation2 + $0x50] sm:$0x1] %v3760_v3  ;;  %v3519_v11 = vor.u32 %v3517_v29, %v3516_v17  ;;  %v3520_v39 = vrot.slane %v3516_v17, 4  ;;  %v3502_v40 = vor.u32 %v3500_v1, %v3499_v54 }
 0x322   : > { %3751 = vst.msk [vmem:[#allocation2 + $0x40] sm:$0xf] %vm3239_vm8, %v3477_v36  ;;  %3754 = vst [vmem:[#allocation2 + $0x44] sm:$0x1] %v3753_v24  ;;  %v3503_v4 = vrot.slane %v3499_v54, 4  ;;  %v3522_v34 = vshrl.u32 %v7223_v12, 16  ;;  %v3022_v2 = vadd.f32 %v7856_v23, %v9992_v51  ;;  %v3020_v15 = vadd.f32 %v9992_v51, %v2904_v18 }
 0x323   : > { %v3525_v7 = vshll.u32 %v7223_v12, 16  ;;  %v3505_v38 = vshrl.u32 %v7221_v8, 16  ;;  %v3508_v35 = vshll.u32 %v7221_v8, 16  ;;  %v10088_v5 = vpop.f32.mrb[20].mxu0  ;;  %v3770_v13 = vsel %vm10001_vm15, %v3519_v11, %v3769_v55  ;;  %v3776_v1 = vld [vmem:[#allocation2 + $0x6c] sm:$0xf] }
 0x324   : > { %v3763_v46 = vsel %vm10001_vm15, %v3502_v40, %v3762_v50  ;;  %v3053_v63 = vmax.f32 %v3021_v33, 0.0  ;;  %v3051_v30 = vmax.f32 %v3019_v22, 0.0  ;;  %v10094_v37 = vpop.f32.mrb[21].mxu0  ;;  %3771 = vst [vmem:[#allocation2 + $0x60] sm:$0xf] %v3770_v13  ;;  %v3524_v25 = vrot.slane %v3522_v34, 7 }
 0x325   : > { %3764 = vst [vmem:[#allocation2 + $0x54] sm:$0xf] %v3763_v46  ;;  %v3507_v52 = vrot.slane %v3505_v38, 7  ;;  %v10098_v27 = vpop.f32.mrb[22].mxu0  ;;  %v3911_v58 = vshrl.u32 %v3835_v53, 16  ;;  %v3914_v31 = vshll.u32 %v3835_v53, 16 }
 0x326   : > { %v7226_v59 = vpack.c.bf16 %v3053_v63, %v3053_v63  ;;  %v7224_v6 = vpack.c.bf16 %v3051_v30, %v3051_v30  ;;  %v10100_v26 = vpop.f32.mrb[23].mxu0  ;;  %v3527_v45 = vor.u32 %v3525_v7, %v3524_v25  ;;  %v3529_v0 = vrot.slane %v3524_v25, 4  ;;  %v3836_v33 = vld [vmem:[#allocation2 + $0x10] sm:$0xf]  ;;  %v3837_v20 = vld [vmem:[#allocation2 + $0x14] sm:$0x1] }
 0x327   : > { %v3510_v61 = vor.u32 %v3508_v35, %v3507_v52  ;;  %v3512_v48 = vrot.slane %v3507_v52, 4  ;;  %v3054_v16 = vmax.f32 %v3022_v2, 0.0  ;;  %v3052_v60 = vmax.f32 %v3020_v15, 0.0  ;;  %v10116_v53 = vld [vmem:[#allocation2 + $0x18] sm:$0xf] }
 0x328   : > { %v3548_v41 = vshrl.u32 %v7226_v59, 16  ;;  %v3551_v9 = vshll.u32 %v7226_v59, 16  ;;  %v3531_v14 = vshrl.u32 %v7224_v6, 16  ;;  %v3534_v28 = vshll.u32 %v7224_v6, 16  ;;  %v10124_v46 = vld [vmem:[#allocation2 + $0x1c] sm:$0xf] }
 0x329   : > { %v3528_v22 = vsel %vm10008_vm0, %v3520_v39, %v3527_v45  ;;  %v3774_v23 = vsel %vm10014_vm1, %v3529_v0, %v3773_v47  ;;  %v3511_v56 = vsel %vm10008_vm0, %v3503_v4, %v3510_v61  ;;  %v3767_v29 = vsel %vm10014_vm1, %v3512_v48, %v3766_v10  ;;  %v3780_v61 = vld [vmem:[#allocation2 + $0x74] sm:$0x1] }
 0x32a   : > { %3772 = vst.msk [vmem:[#allocation2 + $0x64] sm:$0xf] %vm3239_vm8, %v3528_v22  ;;  %3775 = vst [vmem:[#allocation2 + $0x68] sm:$0x1] %v3774_v23  ;;  %v3550_v18 = vrot.slane %v3548_v41, 7  ;;  %v3533_v62 = vrot.slane %v3531_v14, 7  ;;  %v7227_v11 = vpack.c.bf16 %v3054_v16, %v3054_v16  ;;  %v7225_v39 = vpack.c.bf16 %v3052_v60, %v3052_v60 }
 0x32b   : > { %3765 = vst.msk [vmem:[#allocation2 + $0x58] sm:$0xf] %vm3239_vm8, %v3511_v56  ;;  %3768 = vst [vmem:[#allocation2 + $0x5c] sm:$0x1] %v3767_v29  ;;  %v3913_v17 = vrot.slane %v3911_v58, 4  ;;  %v3916_v54 = vrot.slane %v3914_v31, 5 }
 0x32c   : > { %v3920_v12 = vshll.u32 %v3836_v33, 16  ;;  %v3924_v8 = vshrl.u32 %v3836_v33, 16  ;;  %v10112_v44 = vpop.f32.mrb[24].mxu0  ;;  %v3553_v3 = vor.u32 %v3551_v9, %v3550_v18  ;;  %v3554_v36 = vrot.slane %v3550_v18, 4  ;;  %v3787_v58 = vld [vmem:[#allocation2 + $0x80] sm:$0x1] }
 0x32d   : > { %v3536_v24 = vor.u32 %v3534_v28, %v3533_v62  ;;  %v3537_v55 = vrot.slane %v3533_v62, 4  ;;  %v10114_v50 = vpop.f32.mrb[25].mxu0  ;;  %v3917_v40 = vor.u32 %v3916_v54, %v3913_v17  ;;  %v3930_v13 = vshll.u32 %v3837_v20, 16  ;;  %v3840_v56 = vld [vmem:[#allocation2 + $0x20] sm:$0x1] }
 0x32e   : > { %v3922_v4 = vrot.slane %v3920_v12, 5  ;;  %v10118_v34 = vpop.f32.mrb[26].mxu0  ;;  %v3784_v7 = vsel %vm10001_vm15, %v3553_v3, %v3783_v21  ;;  %v3926_v35 = vrot.slane %v3924_v8, 4  ;;  %v3556_v30 = vshrl.u32 %v7227_v11, 16  ;;  %v10148_v12 = vld [vmem:[#allocation2 + $0x24] sm:$0xf] }
 0x32f   : > { %v3777_v38 = vsel %vm10001_vm15, %v3536_v24, %v3776_v1  ;;  %v10126_v63 = vpop.f32.mrb[27].mxu0  ;;  %3785 = vst [vmem:[#allocation2 + $0x78] sm:$0xf] %v3784_v7  ;;  %v3559_v25 = vshll.u32 %v7227_v11, 16  ;;  %v3539_v47 = vshrl.u32 %v7225_v39, 16  ;;  %v3542_v52 = vshll.u32 %v7225_v39, 16 }
 0x330   : > { %3778 = vst [vmem:[#allocation2 + $0x6c] sm:$0xf] %v3777_v38  ;;  %v3918_v2 = vrot.slane %v3917_v40, 4  ;;  %v3927_v15 = vor.u32 %v3926_v35, %v3922_v4  ;;  %v3932_v10 = vrot.slane %v3930_v13, 5  ;;  %v3935_v59 = vshrl.u32 %v10116_v53, 16 }
 0x331   : > { %v3558_v6 = vrot.slane %v3556_v30, 7  ;;  %v3541_v31 = vrot.slane %v3539_v47, 7  ;;  %v3938_v45 = vshll.u32 %v10116_v53, 16  ;;  %v3944_v0 = vshll.u32 %v10124_v46, 16  ;;  %v10169_v38 = vld [vmem:[%s11195_s3 + $0x8] sm:$0xf] }
 0x332   : > { %v3923_v48 = vsel %vm8998_vm3, %v3918_v2, %v3922_v4  ;;  %v3928_v41 = vrot.slane %v3927_v15, 4  ;;  %v3937_v9 = vrot.slane %v3935_v59, 4  ;;  %v3948_v14 = vshrl.u32 %v10124_v46, 16  ;;  %v10134_v29 = vpop.f32.mrb[28].mxu0 }
 0x333   : > { %v3561_v28 = vor.u32 %v3559_v25, %v3558_v6  ;;  %v3563_v33 = vrot.slane %v3558_v6, 4  ;;  %v3544_v22 = vor.u32 %v3542_v52, %v3541_v31  ;;  %v3546_v23 = vrot.slane %v3541_v31, 4  ;;  %v10138_v16 = vpop.f32.mrb[29].mxu0 }
 0x334   : > { %v3933_v21 = vsel %vm8998_vm3, %v3928_v41, %v3932_v10  ;;  %v3940_v1 = vrot.slane %v3938_v45, 5  ;;  %v3946_v18 = vrot.slane %v3944_v0, 5  ;;  %v3950_v62 = vrot.slane %v3948_v14, 4  ;;  %v10150_v8 = vpop.f32.mrb[30].mxu0 }
 0x335   : > { %v3562_v60 = vsel %vm10008_vm0, %v3554_v36, %v3561_v28  ;;  %v3788_v20 = vsel %vm10014_vm1, %v3563_v33, %v3787_v58  ;;  %v3545_v17 = vsel %vm10008_vm0, %v3537_v55, %v3544_v22  ;;  %v3781_v54 = vsel %vm10014_vm1, %v3546_v23, %v3780_v61  ;;  %v10156_v39 = vpop.f32.mrb[31].mxu0  ;;  %v3843_v28 = vld [vmem:[#allocation2 + $0x2c] sm:$0x1] }
 0x336   : > { %3786 = vst.msk [vmem:[#allocation2 + $0x7c] sm:$0xf] %vm3239_vm8, %v3562_v60  ;;  %3789 = vst [vmem:[#allocation2 + $0x80] sm:$0x1] %v3788_v20  ;;  %v10154_v3 = vcombine.low %v3923_v48, %v3933_v21  ;;  %v3941_v36 = vor.u32 %v3940_v1, %v3937_v9  ;;  %v3951_v24 = vor.u32 %v3950_v62, %v3946_v18  ;;  %v3954_v11 = vshll.u32 %v3840_v56, 16 }
 0x337   : > { %3779 = vst.msk [vmem:[#allocation2 + $0x70] sm:$0xf] %vm3239_vm8, %v3545_v17  ;;  %3782 = vst [vmem:[#allocation2 + $0x74] sm:$0x1] %v3781_v54  ;;  %v3025_v55 = vadd.f32 %v10088_v5, %v9992_v51  ;;  %v3023_v40 = vadd.f32 %v9992_v51, %v10094_v37  ;;  %v3026_v4 = vadd.f32 %v10098_v27, %v9992_v51  ;;  %v3959_v30 = vshrl.u32 %v10148_v12, 16 }
 0x338   : > { %11332 = vst [vmem:[#allocation11_spill] sm:$0xff] %v10154_v3  ;;  %v3024_v7 = vadd.f32 %v9992_v51, %v10100_v26  ;;  %7906 = vmatmul.mubr.msk.bf16.vlgmr.msra.gmra.mrb[16].mxu1 %vm4318_vm11, %v10154_v3  ;;  %v3942_v35 = vrot.slane %v3941_v36, 4  ;;  %v3952_v13 = vrot.slane %v3951_v24, 4  ;;  %v3956_v5 = vrot.slane %v3954_v11, 5  ;;  %v10175_v26 = vld [vmem:[#allocation2 + $0x28] sm:$0xf] }
 0x339   : > { %7938 = vmatpush3.bf16.msra.mxu1 %v10040_v43  ;;  %v3057_v37 = vmax.f32 %v3025_v55, 0.0  ;;  %v3055_v27 = vmax.f32 %v3023_v40, 0.0  ;;  %v3058_v25 = vmax.f32 %v3026_v4, 0.0  ;;  %v3961_v15 = vrot.slane %v3959_v30, 4  ;;  %v3797_v1 = vld [vmem:[#allocation2 + $0x90] sm:$0xf] }
 0x33a   : > { %v3056_v47 = vmax.f32 %v3024_v7, 0.0  ;;  %v3947_v52 = vsel %vm8998_vm3, %v3942_v35, %v3946_v18  ;;  %v3957_v2 = vsel %vm8998_vm3, %v3952_v13, %v3956_v5  ;;  %v3962_v10 = vshll.u32 %v10148_v12, 16  ;;  %8832 = vmatprep.subr.msk.bf16.mxu1 %vm4367_vm10, %v10169_v38  ;;  %v3790_v20 = vld [vmem:[#allocation2 + $0x84] sm:$0xf]  ;;  %v3801_v7 = vld [vmem:[#allocation2 + $0x98] sm:$0x1] }
 0x33b   : > { %v10184_v59 = vcombine.low %v3947_v52, %v3957_v2  ;;  %v7230_v43 = vpack.c.bf16 %v3057_v37, %v3057_v37  ;;  %v7228_v6 = vpack.c.bf16 %v3055_v27, %v3055_v27  ;;  %v7231_v58 = vpack.c.bf16 %v3058_v25, %v3058_v25  ;;  %v3794_v35 = vld [vmem:[#allocation2 + $0x8c] sm:$0x1]  ;;  %v10190_v27 = vld [vmem:[#allocation2 + $0x30] sm:$0xf] }
 0x33c   : > { %v7229_v31 = vpack.c.bf16 %v3056_v47, %v3056_v47  ;;  %v3964_v45 = vrot.slane %v3962_v10, 5  ;;  %v3968_v0 = vshll.u32 %v10175_v26, 16  ;;  %v3972_v61 = vshrl.u32 %v10175_v26, 16  ;;  %v10198_v10 = vld [vmem:[#allocation2 + $0x38] sm:$0x1] }
 0x33d   : > { %11333 = vst [vmem:[#allocation13_spill] sm:$0xff] %v10184_v59  ;;  %7909 = vmatprep.mubr.msk.bf16.mxu1 %vm4318_vm11, %v10184_v59  ;;  %v3582_v48 = vshrl.u32 %v7230_v43, 16  ;;  %v3585_v41 = vshll.u32 %v7230_v43, 16  ;;  %v3565_v9 = vshrl.u32 %v7228_v6, 16  ;;  %v3568_v14 = vshll.u32 %v7228_v6, 16  ;;  %11334 = vst [vmem:[#allocation15_spill] sm:$0xff] %v10198_v10 }
 0x33e   : > { %v3590_v33 = vshrl.u32 %v7231_v58, 16  ;;  %v3593_v22 = vshll.u32 %v7231_v58, 16  ;;  %v3573_v23 = vshrl.u32 %v7229_v31, 16  ;;  %v3576_v56 = vshll.u32 %v7229_v31, 16 }
 0x33f   : > { %v3584_v21 = vrot.slane %v3582_v48, 7  ;;  %v3567_v18 = vrot.slane %v3565_v9, 7  ;;  %v3965_v62 = vor.u32 %v3964_v45, %v3961_v15  ;;  %v3970_v60 = vrot.slane %v3968_v0, 5  ;;  %v10196_v15 = vld [vmem:[#allocation2 + $0x34] sm:$0xf] }
 0x340   : > { %v3592_v17 = vrot.slane %v3590_v33, 7  ;;  %v3575_v54 = vrot.slane %v3573_v23, 7  ;;  %v3974_v36 = vrot.slane %v3972_v61, 4  ;;  %v3978_v24 = vshll.u32 %v3843_v28, 16 }
 0x341   : > { %v3587_v11 = vor.u32 %v3585_v41, %v3584_v21  ;;  %v3588_v55 = vrot.slane %v3584_v21, 4  ;;  %v3570_v40 = vor.u32 %v3568_v14, %v3567_v18  ;;  %v3571_v4 = vrot.slane %v3567_v18, 4  ;;  %v10223_v21 = vld [vmem:[#allocation2 + $0x3c] sm:$0xf] }
 0x342   : > { %v3595_v13 = vor.u32 %v3593_v22, %v3592_v17  ;;  %v3597_v5 = vrot.slane %v3592_v17, 4  ;;  %v3578_v30 = vor.u32 %v3576_v56, %v3575_v54  ;;  %v3580_v37 = vrot.slane %v3575_v54, 4 }
 0x343   : > { %v3798_v25 = vsel %vm10001_vm15, %v3587_v11, %v3797_v1  ;;  %v3791_v47 = vsel %vm10001_vm15, %v3570_v40, %v3790_v20  ;;  %v3966_v52 = vrot.slane %v3965_v62, 4  ;;  %v3975_v2 = vor.u32 %v3974_v36, %v3970_v60 }
 0x344   : > { %3799 = vst [vmem:[#allocation2 + $0x90] sm:$0xf] %v3798_v25  ;;  %3792 = vst [vmem:[#allocation2 + $0x84] sm:$0xf] %v3791_v47  ;;  %v3596_v43 = vsel %vm10008_vm0, %v3588_v55, %v3595_v13  ;;  %v3802_v6 = vsel %vm10014_vm1, %v3597_v5, %v3801_v7  ;;  %v3579_v58 = vsel %vm10008_vm0, %v3571_v4, %v3578_v30  ;;  %v3980_v61 = vrot.slane %v3978_v24, 5 }
 0x345   : > { %v3795_v31 = vsel %vm10014_vm1, %v3580_v37, %v3794_v35  ;;  %3800 = vst.msk [vmem:[#allocation2 + $0x94] sm:$0xf] %vm3239_vm8, %v3596_v43  ;;  %3803 = vst [vmem:[#allocation2 + $0x98] sm:$0x1] %v3802_v6  ;;  %v3971_v45 = vsel %vm8998_vm3, %v3966_v52, %v3970_v60  ;;  %v3976_v0 = vrot.slane %v3975_v2, 4  ;;  %v3983_v48 = vshrl.u32 %v10190_v27, 16 }
 0x346   : > { %3793 = vst.msk [vmem:[#allocation2 + $0x88] sm:$0xf] %vm3239_vm8, %v3579_v58  ;;  %3796 = vst [vmem:[#allocation2 + $0x8c] sm:$0x1] %v3795_v31  ;;  %v3986_v41 = vshll.u32 %v10190_v27, 16  ;;  %v3992_v9 = vshll.u32 %v10196_v15, 16  ;;  %v3029_v23 = vadd.f32 %v10112_v44, %v9992_v51  ;;  %v3027_v56 = vadd.f32 %v9992_v51, %v10114_v50 }
 0x347   : > { %v3996_v14 = vshrl.u32 %v10196_v15, 16  ;;  %v4002_v28 = vshll.u32 %v10198_v10, 16  ;;  %v3981_v33 = vsel %vm8998_vm3, %v3976_v0, %v3980_v61  ;;  %v3985_v22 = vrot.slane %v3983_v48, 4  ;;  %v3811_v2 = vld [vmem:[#allocation2 + $0xa8] sm:$0xf] }
 0x348   : > { %v10225_v1 = vcombine.low %v3971_v45, %v3981_v33  ;;  %v3988_v18 = vrot.slane %v3986_v41, 5  ;;  %v3994_v62 = vrot.slane %v3992_v9, 5  ;;  %v3061_v17 = vmax.f32 %v3029_v23, 0.0  ;;  %v3804_v43 = vld [vmem:[#allocation2 + $0x9c] sm:$0xf] }
 0x349   : > { %v3998_v60 = vrot.slane %v3996_v14, 4  ;;  %v4004_v20 = vrot.slane %v4002_v28, 5  ;;  %v3059_v54 = vmax.f32 %v3027_v56, 0.0  ;;  %v3030_v36 = vadd.f32 %v10118_v34, %v9992_v51  ;;  %v10241_v61 = vld [vmem:[#allocation2 + $0x40] sm:$0xf] }
 0x34a   : > { %11335 = vst [vmem:[#allocation17_spill] sm:$0xff] %v10225_v1  ;;  %7910 = vmatmul.mubr.msk.bf16.gmra.mrb[20].mxu1 %vm4318_vm11, %v10225_v1  ;;  %v3989_v44 = vor.u32 %v3988_v18, %v3985_v22  ;;  %v3028_v50 = vadd.f32 %v9992_v51, %v10126_v63  ;;  %v4007_v11 = vshrl.u32 %v10223_v21, 16  ;;  %v7234_v55 = vpack.c.bf16 %v3061_v17, %v3061_v17  ;;  %v10243_v33 = vld [vmem:[#allocation2 + $0x44] sm:$0x1] }
 0x34b   : > { %v3999_v24 = vor.u32 %v3998_v60, %v3994_v62  ;;  %v7232_v40 = vpack.c.bf16 %v3059_v54, %v3059_v54  ;;  %v3062_v4 = vmax.f32 %v3030_v36, 0.0  ;;  %v4010_v7 = vshll.u32 %v10223_v21, 16  ;;  %11337 = vst [vmem:[#allocation21_spill] sm:$0xff] %v10243_v33 }
 0x34c   : > { %v3990_v35 = vrot.slane %v3989_v44, 4  ;;  %v3060_v5 = vmax.f32 %v3028_v50, 0.0  ;;  %v4009_v30 = vrot.slane %v4007_v11, 4  ;;  %v3616_v34 = vshrl.u32 %v7234_v55, 16  ;;  %v3815_v44 = vld [vmem:[#allocation2 + $0xb0] sm:$0x1] }
 0x34d   : > { %v4000_v13 = vrot.slane %v3999_v24, 4  ;;  %v3619_v37 = vshll.u32 %v7234_v55, 16  ;;  %v3599_v25 = vshrl.u32 %v7232_v40, 16  ;;  %v3602_v47 = vshll.u32 %v7232_v40, 16  ;;  %v3808_v24 = vld [vmem:[#allocation2 + $0xa4] sm:$0x1] }
 0x34e   : > { %v3995_v52 = vsel %vm8998_vm3, %v3990_v35, %v3994_v62  ;;  %v7235_v6 = vpack.c.bf16 %v3062_v4, %v3062_v4  ;;  %v7233_v58 = vpack.c.bf16 %v3060_v5, %v3060_v5  ;;  %v3618_v45 = vrot.slane %v3616_v34, 7  ;;  %v10254_v35 = vld [vmem:[#allocation2 + $0x48] sm:$0xf] }
 0x34f   : > { %v4005_v63 = vsel %vm8998_vm3, %v4000_v13, %v4004_v20  ;;  %v3601_v0 = vrot.slane %v3599_v25, 7  ;;  %v4012_v48 = vrot.slane %v4010_v7, 5  ;;  %v4016_v17 = vshll.u32 %v10241_v61, 16  ;;  %v10256_v13 = vld [vmem:[#allocation2 + $0x4c] sm:$0xf] }
 0x350   : > { %v10239_v31 = vcombine.low %v3995_v52, %v4005_v63  ;;  %v3624_v41 = vshrl.u32 %v7235_v6, 16  ;;  %v3627_v9 = vshll.u32 %v7235_v6, 16  ;;  %v3607_v14 = vshrl.u32 %v7233_v58, 16  ;;  %v10258_v25 = vld [vmem:[#allocation2 + $0x50] sm:$0x1] }
 0x351   : > { %v3610_v28 = vshll.u32 %v7233_v58, 16  ;;  %v3621_v22 = vor.u32 %v3619_v37, %v3618_v45  ;;  %v3622_v23 = vrot.slane %v3618_v45, 4  ;;  %v3604_v56 = vor.u32 %v3602_v47, %v3601_v0  ;;  %11338 = vst [vmem:[#allocation23_spill] sm:$0xff] %v10258_v25 }
 0x352   : > { %11336 = vst [vmem:[#allocation19_spill] sm:$0xff] %v10239_v31  ;;  %7913 = vmatprep.mubr.msk.bf16.mxu1 %vm4318_vm11, %v10239_v31  ;;  %v3605_v18 = vrot.slane %v3601_v0, 4  ;;  %v3626_v62 = vrot.slane %v3624_v41, 7  ;;  %v3609_v60 = vrot.slane %v3607_v14, 7  ;;  %v4013_v20 = vor.u32 %v4012_v48, %v4009_v30 }
 0x353   : > { %v3812_v54 = vsel %vm10001_vm15, %v3621_v22, %v3811_v2  ;;  %v3805_v36 = vsel %vm10001_vm15, %v3604_v56, %v3804_v43  ;;  %v4020_v50 = vshrl.u32 %v10241_v61, 16  ;;  %v4026_v11 = vshll.u32 %v10243_v33, 16 }
 0x354   : > { %3813 = vst [vmem:[#allocation2 + $0xa8] sm:$0xf] %v3812_v54  ;;  %3806 = vst [vmem:[#allocation2 + $0x9c] sm:$0xf] %v3805_v36  ;;  %v3629_v55 = vor.u32 %v3627_v9, %v3626_v62  ;;  %v3631_v40 = vrot.slane %v3626_v62, 4  ;;  %v3612_v4 = vor.u32 %v3610_v28, %v3609_v60  ;;  %v3614_v7 = vrot.slane %v3609_v60, 4 }
 0x355   : > { %v4014_v5 = vrot.slane %v4013_v20, 4  ;;  %v4018_v30 = vrot.slane %v4016_v17, 5  ;;  %v4022_v34 = vrot.slane %v4020_v50, 4  ;;  %v4028_v37 = vrot.slane %v4026_v11, 5  ;;  %v10281_v20 = vld [vmem:[#allocation2 + $0x54] sm:$0xf] }
 0x356   : > { %v3630_v47 = vsel %vm10008_vm0, %v3622_v23, %v3629_v55  ;;  %v3816_v52 = vsel %vm10014_vm1, %v3631_v40, %v3815_v44  ;;  %v3613_v63 = vsel %vm10008_vm0, %v3605_v18, %v3612_v4  ;;  %v3809_v2 = vsel %vm10014_vm1, %v3614_v7, %v3808_v24 }
 0x357   : > { %3814 = vst.msk [vmem:[#allocation2 + $0xac] sm:$0xf] %vm3239_vm8, %v3630_v47  ;;  %3817 = vst [vmem:[#allocation2 + $0xb0] sm:$0x1] %v3816_v52  ;;  %v4019_v43 = vsel %vm8998_vm3, %v4014_v5, %v4018_v30  ;;  %v4023_v6 = vor.u32 %v4022_v34, %v4018_v30  ;;  %v4031_v58 = vshrl.u32 %v10254_v35, 16  ;;  %v4034_v45 = vshll.u32 %v10254_v35, 16 }
 0x358   : > { %3807 = vst.msk [vmem:[#allocation2 + $0xa0] sm:$0xf] %vm3239_vm8, %v3613_v63  ;;  %3810 = vst [vmem:[#allocation2 + $0xa4] sm:$0x1] %v3809_v2  ;;  %v4040_v0 = vshll.u32 %v10256_v13, 16  ;;  %v4044_v48 = vshrl.u32 %v10256_v13, 16  ;;  %v3033_v9 = vadd.f32 %v10134_v29, %v9992_v51  ;;  %v3031_v23 = vadd.f32 %v9992_v51, %v10138_v16 }
 0x359   : > { %v4050_v41 = vshll.u32 %v10258_v25, 16  ;;  %v4024_v14 = vrot.slane %v4023_v6, 4  ;;  %v4033_v28 = vrot.slane %v4031_v58, 4  ;;  %v4036_v22 = vrot.slane %v4034_v45, 5  ;;  %v3825_v63 = vld [vmem:[#allocation2 + $0xc0] sm:$0xf] }
 0x35a   : > { %v4042_v56 = vrot.slane %v4040_v0, 5  ;;  %v4046_v18 = vrot.slane %v4044_v48, 4  ;;  %v3065_v60 = vmax.f32 %v3033_v9, 0.0  ;;  %v3063_v36 = vmax.f32 %v3031_v23, 0.0  ;;  %v10300_v48 = vld [vmem:[#allocation2 + $0x58] sm:$0xf] }
 0x35b   : > { %v4052_v62 = vrot.slane %v4050_v41, 5  ;;  %v4029_v17 = vsel %vm8998_vm3, %v4024_v14, %v4028_v37  ;;  %v4037_v54 = vor.u32 %v4036_v22, %v4033_v28  ;;  %v3034_v29 = vadd.f32 %v10150_v8, %v9992_v51  ;;  %v3818_v14 = vld [vmem:[#allocation2 + $0xb4] sm:$0xf] }
 0x35c   : > { %v10287_v44 = vcombine.low %v4019_v43, %v4029_v17  ;;  %v4047_v24 = vor.u32 %v4046_v18, %v4042_v56  ;;  %v7238_v50 = vpack.c.bf16 %v3065_v60, %v3065_v60  ;;  %v3032_v16 = vadd.f32 %v9992_v51, %v10156_v39 }
 0x35d   : > { %v4038_v11 = vrot.slane %v4037_v54, 4  ;;  %v7236_v55 = vpack.c.bf16 %v3063_v36, %v3063_v36  ;;  %v3066_v40 = vmax.f32 %v3034_v29, 0.0  ;;  %v4055_v4 = vshrl.u32 %v10281_v20, 16  ;;  %v10307_v36 = vld [vmem:[#allocation2 + $0x5c] sm:$0x1] }
 0x35e   : > { %11339 = vst [vmem:[#allocation3_spill] sm:$0xff] %v10287_v44  ;;  %7914 = vmatmul.mubr.msk.bf16.gmra.mrb[24].mxu1 %vm4318_vm11, %v10287_v44  ;;  %v4048_v7 = vrot.slane %v4047_v24, 4  ;;  %v3650_v5 = vshrl.u32 %v7238_v50, 16  ;;  %v3653_v30 = vshll.u32 %v7238_v50, 16  ;;  %v3064_v34 = vmax.f32 %v3032_v16, 0.0 }
 0x35f   : > { %v4043_v8 = vsel %vm8998_vm3, %v4038_v11, %v4042_v56  ;;  %v3633_v37 = vshrl.u32 %v7236_v55, 16  ;;  %v3636_v47 = vshll.u32 %v7236_v55, 16  ;;  %v7239_v52 = vpack.c.bf16 %v3066_v40, %v3066_v40  ;;  %v3822_v55 = vld [vmem:[#allocation2 + $0xbc] sm:$0x1] }
 0x360   : > { %v4053_v51 = vsel %vm8998_vm3, %v4048_v7, %v4052_v62  ;;  %v3652_v39 = vrot.slane %v3650_v5, 7  ;;  %v7237_v2 = vpack.c.bf16 %v3064_v34, %v3064_v34  ;;  %v4057_v43 = vrot.slane %v4055_v4, 4  ;;  %v3829_v62 = vld [vmem:[#allocation2 + $0xc8] sm:$0x1]  ;;  %v10313_v4 = vld [vmem:[#allocation2 + $0x60] sm:$0xf] }
 0x361   : > { %v10298_v6 = vcombine.low %v4043_v8, %v4053_v51  ;;  %v3635_v58 = vrot.slane %v3633_v37, 7  ;;  %v3658_v45 = vshrl.u32 %v7239_v52, 16  ;;  %v3661_v0 = vshll.u32 %v7239_v52, 16  ;;  %v10315_v8 = vld [vmem:[#allocation2 + $0x64] sm:$0xf] }
 0x362   : > { %v3655_v41 = vor.u32 %v3653_v30, %v3652_v39  ;;  %v3656_v9 = vrot.slane %v3652_v39, 4  ;;  %v3641_v28 = vshrl.u32 %v7237_v2, 16  ;;  %v3644_v22 = vshll.u32 %v7237_v2, 16  ;;  %v10322_v51 = vld [vmem:[#allocation2 + $0x68] sm:$0x1] }
 0x363   : > { %11340 = vst [vmem:[#allocation5_spill] sm:$0xff] %v10298_v6  ;;  %7917 = vmatprep.mubr.msk.bf16.mxu1 %vm4318_vm11, %v10298_v6  ;;  %v3638_v23 = vor.u32 %v3636_v47, %v3635_v58  ;;  %v3639_v56 = vrot.slane %v3635_v58, 4  ;;  %v3660_v18 = vrot.slane %v3658_v45, 7  ;;  %v4058_v60 = vshll.u32 %v10281_v20, 16  ;;  %v10330_v45 = vld [vmem:[#allocation2 + $0x6c] sm:$0xf] }
 0x364   : > { %v3826_v17 = vsel %vm10001_vm15, %v3655_v41, %v3825_v63  ;;  %v3643_v54 = vrot.slane %v3641_v28, 7  ;;  %v4064_v29 = vshll.u32 %v10300_v48, 16  ;;  %v4068_v24 = vshrl.u32 %v10300_v48, 16 }
 0x365   : > { %3827 = vst [vmem:[#allocation2 + $0xc0] sm:$0xf] %v3826_v17  ;;  %v3819_v50 = vsel %vm10001_vm15, %v3638_v23, %v3818_v14  ;;  %v3663_v16 = vor.u32 %v3661_v0, %v3660_v18  ;;  %v3665_v11 = vrot.slane %v3660_v18, 4  ;;  %v4060_v40 = vrot.slane %v4058_v60, 5 }
 0x366   : > { %3820 = vst [vmem:[#allocation2 + $0xb4] sm:$0xf] %v3819_v50  ;;  %v3646_v7 = vor.u32 %v3644_v22, %v3643_v54  ;;  %v3648_v5 = vrot.slane %v3643_v54, 4  ;;  %v4066_v30 = vrot.slane %v4064_v29, 5  ;;  %v4070_v34 = vrot.slane %v4068_v24, 4 }
 0x367   : > { %v3664_v37 = vsel %vm10008_vm0, %v3656_v9, %v3663_v16  ;;  %v3830_v57 = vsel %vm10014_vm1, %v3665_v11, %v3829_v62  ;;  %v4061_v47 = vor.u32 %v4060_v40, %v4057_v43  ;;  %v4074_v52 = vshll.u32 %v10307_v36, 16  ;;  %v10337_v22 = vld [vmem:[#allocation2 + $0x70] sm:$0xf]  ;;  %v10341_v62 = vld [vmem:[#allocation2 + $0x74] sm:$0x1] }
 0x368   : > { %3828 = vst.msk [vmem:[#allocation2 + $0xc4] sm:$0xf] %vm3239_vm8, %v3664_v37  ;;  %3831 = vst [vmem:[#allocation2 + $0xc8] sm:$0x1] %v3830_v57  ;;  %v3647_v39 = vsel %vm10008_vm0, %v3639_v56, %v3646_v7  ;;  %v3823_v63 = vsel %vm10014_vm1, %v3648_v5, %v3822_v55  ;;  %v4071_v2 = vor.u32 %v4070_v34, %v4066_v30  ;;  %v4079_v58 = vshrl.u32 %v10313_v4, 16 }
 0x369   : > { %3821 = vst.msk [vmem:[#allocation2 + $0xb8] sm:$0xf] %vm3239_vm8, %v3647_v39  ;;  %3824 = vst [vmem:[#allocation2 + $0xbc] sm:$0x1] %v3823_v63  ;;  %v4062_v43 = vrot.slane %v4061_v47, 4  ;;  %v4076_v0 = vrot.slane %v4074_v52, 5 }
 0x36a   : > { %v4082_v41 = vshll.u32 %v10313_v4, 16  ;;  %v4088_v9 = vshll.u32 %v10315_v8, 16  ;;  %v4072_v14 = vrot.slane %v4071_v2, 4  ;;  %v4081_v19 = vrot.slane %v4079_v58, 4  ;;  %v10347_v50 = vld [vmem:[#allocation2 + $0x78] sm:$0xf] }
 0x36b   : > { %v4092_v28 = vshrl.u32 %v10315_v8, 16  ;;  %v4098_v49 = vshll.u32 %v10322_v51, 16  ;;  %v4067_v23 = vsel %vm8998_vm3, %v4062_v43, %v4066_v30  ;;  %v4103_v60 = vshrl.u32 %v10330_v45, 16  ;;  %v10354_v37 = vld [vmem:[#allocation2 + $0x7c] sm:$0xf] }
 0x36c   : > { %v4084_v56 = vrot.slane %v4082_v41, 5  ;;  %v4090_v18 = vrot.slane %v4088_v9, 5  ;;  %v4077_v17 = vsel %vm8998_vm3, %v4072_v14, %v4076_v0  ;;  %v4106_v24 = vshll.u32 %v10330_v45, 16  ;;  %v10360_v0 = vld [vmem:[#allocation2 + $0x80] sm:$0x1] }
 0x36d   : > { %v4094_v54 = vrot.slane %v4092_v28, 4  ;;  %v4100_v29 = vrot.slane %v4098_v49, 5  ;;  %v10349_v16 = vcombine.low %v4067_v23, %v4077_v17  ;;  %v4105_v55 = vrot.slane %v4103_v60, 4  ;;  %v10365_v28 = vld [vmem:[#allocation2 + $0x84] sm:$0xf] }
 0x36e   : > { %v4085_v11 = vor.u32 %v4084_v56, %v4081_v19  ;;  %v4112_v40 = vshll.u32 %v10337_v22, 16  ;;  %v4108_v5 = vrot.slane %v4106_v24, 5  ;;  %v4116_v30 = vshrl.u32 %v10337_v22, 16  ;;  %v10370_v17 = vld [vmem:[#allocation2 + $0x88] sm:$0xf] }
 0x36f   : > { %11341 = vst [vmem:[#allocation6_spill] sm:$0xff] %v10349_v16  ;;  %v4095_v7 = vor.u32 %v4094_v54, %v4090_v18  ;;  %v4122_v34 = vshll.u32 %v10341_v62, 16  ;;  %7918 = vmatmul.mubr.msk.bf16.gmra.mrb[28].mxu1 %vm4318_vm11, %v10349_v16  ;;  %v4127_v52 = vshrl.u32 %v10347_v50, 16  ;;  %v4130_v39 = vshll.u32 %v10347_v50, 16 }
 0x370   : > { %v4086_v57 = vrot.slane %v4085_v11, 4  ;;  %v4114_v47 = vrot.slane %v4112_v40, 5  ;;  %v4109_v2 = vor.u32 %v4108_v5, %v4105_v55  ;;  %v4118_v58 = vrot.slane %v4116_v30, 4 }
 0x371   : > { %v4096_v63 = vrot.slane %v4095_v7, 4  ;;  %v4124_v43 = vrot.slane %v4122_v34, 5  ;;  %v4129_v9 = vrot.slane %v4127_v52, 4  ;;  %v4132_v14 = vrot.slane %v4130_v39, 5 }
 0x372   : > { %v4091_v41 = vsel %vm8998_vm3, %v4086_v57, %v4090_v18  ;;  %v4136_v19 = vshll.u32 %v10354_v37, 16  ;;  %v4110_v23 = vrot.slane %v4109_v2, 4  ;;  %v4119_v56 = vor.u32 %v4118_v58, %v4114_v47  ;;  %v10382_v57 = vld [vmem:[#allocation2 + $0x8c] sm:$0x1] }
 0x373   : > { %v4101_v49 = vsel %vm8998_vm3, %v4096_v63, %v4100_v29  ;;  %v4140_v60 = vshrl.u32 %v10354_v37, 16  ;;  %v4133_v24 = vor.u32 %v4132_v14, %v4129_v9  ;;  %v4146_v18 = vshll.u32 %v10360_v0, 16  ;;  %v10378_v29 = vld [vmem:[#allocation2 + $0x90] sm:$0xf] }
 0x374   : > { %v10372_v54 = vcombine.low %v4091_v41, %v4101_v49  ;;  %v4138_v11 = vrot.slane %v4136_v19, 5  ;;  %v4115_v55 = vsel %vm8998_vm3, %v4110_v23, %v4114_v47  ;;  %v4120_v40 = vrot.slane %v4119_v56, 4  ;;  %v10389_v41 = vld [vmem:[#allocation2 + $0x94] sm:$0xf] }
 0x375   : > { %v4142_v7 = vrot.slane %v4140_v60, 4  ;;  %v4151_v5 = vshrl.u32 %v10365_v28, 16  ;;  %v4134_v30 = vrot.slane %v4133_v24, 4  ;;  %v4148_v34 = vrot.slane %v4146_v18, 5  ;;  %v10396_v24 = vld [vmem:[#allocation2 + $0x98] sm:$0x1] }
 0x376   : > { %11342 = vst [vmem:[#allocation7_spill] sm:$0xff] %v10372_v54  ;;  %7921 = vmatprep.mubr.msk.bf16.mxu1 %vm4318_vm11, %v10372_v54  ;;  %v4154_v52 = vshll.u32 %v10365_v28, 16  ;;  %v4160_v39 = vshll.u32 %v10370_v17, 16  ;;  %v4125_v47 = vsel %vm8998_vm3, %v4120_v40, %v4124_v43  ;;  %v4164_v58 = vshrl.u32 %v10370_v17, 16 }
 0x377   : > { %v4143_v63 = vor.u32 %v4142_v7, %v4138_v11  ;;  %v4153_v2 = vrot.slane %v4151_v5, 4  ;;  %v10391_v9 = vcombine.low %v4115_v55, %v4125_v47  ;;  %v4139_v14 = vsel %vm8998_vm3, %v4134_v30, %v4138_v11  ;;  %v10404_v7 = vld [vmem:[#allocation2 + $0x9c] sm:$0xf]  ;;  %v10408_v47 = vld [vmem:[#allocation2 + $0xa0] sm:$0xf] }
 0x378   : > { %v4156_v19 = vrot.slane %v4154_v52, 5  ;;  %v4162_v49 = vrot.slane %v4160_v39, 5  ;;  %v4166_v56 = vrot.slane %v4164_v58, 4  ;;  %v4170_v60 = vshll.u32 %v10382_v57, 16 }
 0x379   : > { %11343 = vst [vmem:[#allocation8_spill] sm:$0xff] %v10391_v9  ;;  %v4144_v23 = vrot.slane %v4143_v63, 4  ;;  %v4175_v43 = vshrl.u32 %v10378_v29, 16  ;;  %7922 = vmatmul.mubr.msk.bf16.gmra.mrb[0].mxu1 %vm4318_vm11, %v10391_v9  ;;  %v4178_v55 = vshll.u32 %v10378_v29, 16  ;;  %v4184_v40 = vshll.u32 %v10389_v41, 16 }
 0x37a   : > { %v4157_v18 = vor.u32 %v4156_v19, %v4153_v2  ;;  %v4188_v11 = vshrl.u32 %v10389_v41, 16  ;;  %v4167_v30 = vor.u32 %v4166_v56, %v4162_v49  ;;  %v4172_v52 = vrot.slane %v4170_v60, 5  ;;  %v10418_v60 = vld [vmem:[#allocation2 + $0xa8] sm:$0xf] }
 0x37b   : > { %v4149_v5 = vsel %vm8998_vm3, %v4144_v23, %v4148_v34  ;;  %v4177_v39 = vrot.slane %v4175_v43, 4  ;;  %v4180_v2 = vrot.slane %v4178_v55, 5  ;;  %v4186_v19 = vrot.slane %v4184_v40, 5  ;;  %v10424_v55 = vld [vmem:[#allocation2 + $0xa4] sm:$0x1] }
 0x37c   : > { %v10410_v63 = vcombine.low %v4139_v14, %v4149_v5  ;;  %v4158_v58 = vrot.slane %v4157_v18, 4  ;;  %v4168_v9 = vrot.slane %v4167_v30, 4  ;;  %v4190_v54 = vrot.slane %v4188_v11, 4  ;;  %v10426_v11 = vld [vmem:[#allocation2 + $0xac] sm:$0xf] }
 0x37d   : > { %v4194_v16 = vshll.u32 %v10396_v24, 16  ;;  %v4199_v6 = vshrl.u32 %v10404_v7, 16  ;;  %v4181_v34 = vor.u32 %v4180_v2, %v4177_v39  ;;  %v4202_v23 = vshll.u32 %v10404_v7, 16 }
 0x37e   : > { %11344 = vst [vmem:[#allocation9_spill] sm:$0xff] %v10410_v63  ;;  %7925 = vmatprep.mubr.msk.bf16.mxu1 %vm4318_vm11, %v10410_v63  ;;  %v4208_v56 = vshll.u32 %v10408_v47, 16  ;;  %v4163_v14 = vsel %vm8998_vm3, %v4158_v58, %v4162_v49  ;;  %v4173_v43 = vsel %vm8998_vm3, %v4168_v9, %v4172_v52  ;;  %v4191_v18 = vor.u32 %v4190_v54, %v4186_v19  ;;  %v10437_v58 = vld [vmem:[#allocation2 + $0xb4] sm:$0xf] }
 0x37f   : > { %v4201_v40 = vrot.slane %v4199_v6, 4  ;;  %v10428_v5 = vcombine.low %v4163_v14, %v4173_v43  ;;  %v4182_v30 = vrot.slane %v4181_v34, 4  ;;  %v4196_v39 = vrot.slane %v4194_v16, 5  ;;  %v10443_v14 = vld [vmem:[#allocation2 + $0xb8] sm:$0xf] }
 0x380   : > { %v4204_v2 = vrot.slane %v4202_v23, 5  ;;  %v4192_v63 = vrot.slane %v4191_v18, 4  ;;  %v4210_v44 = vrot.slane %v4208_v56, 5  ;;  %v4212_v31 = vshrl.u32 %v10408_v47, 16 }
 0x381   : > { %11345 = vst [vmem:[#allocation10_spill] sm:$0xff] %v10428_v5  ;;  %v4223_v49 = vshrl.u32 %v10418_v60, 16  ;;  %7926 = vmatmul.mubr.msk.bf16.gmra.mrb[4].mxu1 %vm4318_vm11, %v10428_v5  ;;  %v4218_v9 = vshll.u32 %v10424_v55, 16  ;;  %v4226_v6 = vshll.u32 %v10418_v60, 16  ;;  %v4232_v52 = vshll.u32 %v10426_v11, 16 }
 0x382   : > { %v4205_v54 = vor.u32 %v4204_v2, %v4201_v40  ;;  %v4187_v16 = vsel %vm8998_vm3, %v4182_v30, %v4186_v19  ;;  %v4197_v34 = vsel %vm8998_vm3, %v4192_v63, %v4196_v39  ;;  %v4214_v23 = vrot.slane %v4212_v31, 4  ;;  %v10447_v40 = vld [vmem:[#allocation2 + $0xb0] sm:$0x1]  ;;  %v10453_v19 = vld [vmem:[#allocation2 + $0xbc] sm:$0x1] }
 0x383   : > { %v4225_v56 = vrot.slane %v4223_v49, 4  ;;  %v10445_v43 = vcombine.low %v4187_v16, %v4197_v34  ;;  %v4228_v2 = vrot.slane %v4226_v6, 5  ;;  %v4234_v1 = vrot.slane %v4232_v52, 5 }
 0x384   : > { %v4206_v18 = vrot.slane %v4205_v54, 4  ;;  %v4215_v5 = vor.u32 %v4214_v23, %v4210_v44  ;;  %v4236_v59 = vshrl.u32 %v10426_v11, 16  ;;  %v4247_v3 = vshrl.u32 %v10437_v58, 16 }
 0x385   : > { %11346 = vst [vmem:[#allocation12_spill] sm:$0xff] %v10445_v43  ;;  %7929 = vmatprep.mubr.msk.bf16.mxu1 %vm4318_vm11, %v10445_v43  ;;  %v4220_v63 = vrot.slane %v4218_v9, 5  ;;  %v4229_v31 = vor.u32 %v4228_v2, %v4225_v56  ;;  %v4250_v30 = vshll.u32 %v10437_v58, 16  ;;  %v4256_v39 = vshll.u32 %v10443_v14, 16 }
 0x386   : > { %v4216_v49 = vrot.slane %v4215_v5, 4  ;;  %v4238_v54 = vrot.slane %v4236_v59, 4  ;;  %v4242_v6 = vshll.u32 %v10447_v40, 16  ;;  %v4249_v52 = vrot.slane %v4247_v3, 4 }
 0x387   : > { %v4211_v16 = vsel %vm8998_vm3, %v4206_v18, %v4210_v44  ;;  %v4252_v34 = vrot.slane %v4250_v30, 5  ;;  %v4258_v23 = vrot.slane %v4256_v39, 5  ;;  %v4260_v43 = vshrl.u32 %v10443_v14, 16 }
 0x388   : > { %v4221_v9 = vsel %vm8998_vm3, %v4216_v49, %v4220_v63  ;;  %v4230_v56 = vrot.slane %v4229_v31, 4  ;;  %v4239_v2 = vor.u32 %v4238_v54, %v4234_v1  ;;  %v4266_v25 = vshll.u32 %v10453_v19, 16 }
 0x389   : > { %v10464_v33 = vcombine.low %v4211_v16, %v4221_v9  ;;  %v4253_v59 = vor.u32 %v4252_v34, %v4249_v52  ;;  %v4262_v5 = vrot.slane %v4260_v43, 4  ;;  %v4244_v3 = vrot.slane %v4242_v6, 5 }
 0x38a   : > { %v4240_v10 = vrot.slane %v4239_v2, 4  ;;  %v4235_v30 = vsel %vm8998_vm3, %v4230_v56, %v4234_v1  ;;  %v4268_v31 = vrot.slane %v4266_v25, 5  ;;  %v10478_v54 = vcombine.low %v10281_v20, %v10300_v48  ;;  %v10514_v56 = vld [vmem:[#allocation2] sm:$0xf]  ;;  %v10516_v2 = vld [vmem:[#allocation2 + $0x4] sm:$0xf] }
 0x38b   : > { %7930 = vmatmul.mubr.msk.bf16.gmra.mrb[8].mxu1 %vm4318_vm11, %v10464_v33  ;;  %v4254_v44 = vrot.slane %v4253_v59, 4  ;;  %v4263_v18 = vor.u32 %v4262_v5, %v4258_v23  ;;  %v10482_v6 = vcombine.low %v10313_v4, %v10315_v8  ;;  %v10486_v1 = vcombine.low %v10330_v45, %v10337_v22 }
 0x38c   : > { %v4245_v63 = vsel %vm8998_vm3, %v4240_v10, %v4244_v3  ;;  %v10490_v10 = vcombine.low %v10347_v50, %v10354_v37  ;;  %v10494_v25 = vcombine.low %v10365_v28, %v10370_v17  ;;  %v10502_v16 = vcombine.low %v10378_v29, %v10389_v41  ;;  %v10527_v3 = vld [vmem:[#allocation2 + $0xc] sm:$0xf] }
 0x38d   : > { %v10472_v39 = vcombine.low %v4235_v30, %v4245_v63  ;;  %v4259_v49 = vsel %vm8998_vm3, %v4254_v44, %v4258_v23  ;;  %v4264_v43 = vrot.slane %v4263_v18, 4  ;;  %v10506_v34 = vcombine.low %v10404_v7, %v10408_v47  ;;  %v10529_v44 = vld [vmem:[#allocation2 + $0x10] sm:$0xf] }
 0x38e   : > { %v10510_v23 = vcombine.low %v10418_v60, %v10426_v11  ;;  %v7020_v59 = vcombine.low %v10514_v56, %v10516_v2  ;;  %v10522_v5 = vcombine.low %v10437_v58, %v10443_v14  ;;  %v10533_v18 = vcombine.low %v10527_v3, %v10529_v44 }
 0x38f   : > { %11347 = vst [vmem:[#allocation14_spill] sm:$0xff] %v10472_v39  ;;  %7933 = vmatprep.mubr.msk.bf16.mxu1 %vm4318_vm11, %v10472_v39  ;;  %v4269_v52 = vsel %vm8998_vm3, %v4264_v43, %v4268_v31  ;;  %v5049_v30 = vsel %vm4367_vm10, %v10169_v38, 0  ;;  %v10539_v63 = vcombine.low %v10116_v53, %v10124_v46  ;;  %v10544_v31 = vld [vmem:[%s11195_s3 + $0xc] sm:$0xf]  ;;  %v4891_v43 = vrot.slane %v10300_v48, 5 }
 0x390   : > { %v10512_v9 = vcombine.low %v4259_v49, %v4269_v52  ;;  %v7059_v49 = vrot.slane %v10281_v20, 9  ;;  %v10554_v53 = vcombine.low %v10148_v12, %v10175_v26  ;;  %v10558_v46 = vcombine.low %v10190_v27, %v10196_v15 }
 0x391   : > { %v4893_v20 = vrot.slane %v4891_v43, 4  ;;  %v4894_v48 = vrot.slane %v10307_v36, 5  ;;  %v10567_v52 = vcombine.low %v10223_v21, %v10241_v61  ;;  %v10571_v12 = vcombine.low %v10254_v35, %v10256_v13 }
 0x392   : > { %11348 = vst [vmem:[#allocation16_spill] sm:$0xff] %v10512_v9  ;;  %v4892_v38 = vsel %vm9380_vm7, %v7059_v49, %v4891_v43  ;;  %v7060_v26 = vrot.slane %v10313_v4, 9  ;;  %v4898_v27 = vrot.slane %v10315_v8, 5  ;;  %v7061_v49 = vrot.slane %v10330_v45, 9 }
 0x393   : > { %7934 = vmatmul.mubr.msk.bf16.gmra.mrb[12].mxu1 %vm4318_vm11, %v10512_v9  ;;  %v4905_v36 = vrot.slane %v10337_v22, 5  ;;  %v4908_v39 = vrot.slane %v10341_v62, 5  ;;  %v4915_v22 = vrot.slane %v10360_v0, 5 }
 0x394   : > { %7939 = vmatprep.mubr.msk.bf16.mxu1 %vm4318_vm11, %v7020_v59  ;;  %v4895_v59 = vsel %vm9380_vm7, %v4893_v20, %v4894_v48  ;;  %v4899_v42 = vsel %vm9380_vm7, %v7060_v26, %v4898_v27  ;;  %v4900_v9 = vrot.slane %v4898_v27, 4  ;;  %v7062_v20 = vrot.slane %v10347_v50, 9 }
 0x395   : > { %v10580_v43 = vcombine.low %v4892_v38, %v4895_v59  ;;  %v4906_v4 = vsel %vm9380_vm7, %v7061_v49, %v4905_v36  ;;  %v4907_v8 = vrot.slane %v4905_v36, 4  ;;  %v7063_v38 = vrot.slane %v10365_v28, 9 }
 0x396   : > { %v4919_v48 = vrot.slane %v10370_v17, 5  ;;  %v4926_v27 = vrot.slane %v10389_v41, 5  ;;  %v4929_v59 = vrot.slane %v10396_v24, 5  ;;  %v7065_v36 = vrot.slane %v10404_v7, 9 }
 0x397   : > { %v4909_v26 = vsel %vm9380_vm7, %v4907_v8, %v4908_v39  ;;  %v7064_v39 = vrot.slane %v10378_v29, 9  ;;  %v4936_v29 = vrot.slane %v10424_v55, 5 }
 0x398   : > { %v10604_v0 = vcombine.low %v4906_v4, %v4909_v26  ;;  %v4920_v28 = vsel %vm9380_vm7, %v7063_v38, %v4919_v48  ;;  %v4921_v17 = vrot.slane %v4919_v48, 4  ;;  %v4933_v4 = vrot.slane %v10408_v47, 5 }
 0x399   : > { %v4943_v47 = vrot.slane %v10447_v40, 5  ;;  %v4947_v38 = vrot.slane %v10443_v14, 5  ;;  %v4950_v14 = vrot.slane %v10453_v19, 5 }
 0x39a   : > { %v4934_v41 = vsel %vm9380_vm7, %v7065_v36, %v4933_v4  ;;  %v4935_v24 = vrot.slane %v4933_v4, 4 }
 0x39b   : > { %7940 = vmatmul.mubr.msk.bf16.vlgmr.msra.gmra.mrb[16].mxu1 %vm4318_vm11, %v10533_v18 }
 0x39c   : > { %7972 = vmatpush3.bf16.msra.mxu1 %v5049_v30  ;;  %7943 = vmatprep.mubr.msk.bf16.mxu1 %vm4318_vm11, %v10539_v63  ;;  %v4901_v30 = vrot.slane %v10322_v51, 5  ;;  %v4912_v51 = vrot.slane %v10354_v37, 5  ;;  %v4937_v55 = vsel %vm9380_vm7, %v4935_v24, %v4936_v29  ;;  %v7052_v29 = vrot.slane %v10514_v56, 9  ;;  %v8882_v24 = vld [vmem:[#allocation2 + $0x8] sm:$0x1] }
 0x39d   : > { %8833 = vmatprep.subr.msk.bf16.mxu1 %vm4367_vm10, %v10544_v31 }
 0x39e   : > { %v4902_v45 = vsel %vm9380_vm7, %v4900_v9, %v4901_v30  ;;  %v4913_v50 = vsel %vm9380_vm7, %v7062_v20, %v4912_v51  ;;  %v4914_v37 = vrot.slane %v4912_v51, 4  ;;  %v4922_v9 = vrot.slane %v10382_v57, 5 }
 0x39f   : > { %v10596_v62 = vcombine.low %v4899_v42, %v4902_v45  ;;  %v4927_v57 = vsel %vm9380_vm7, %v7064_v39, %v4926_v27  ;;  %v4928_v20 = vrot.slane %v4926_v27, 4  ;;  %v7066_v51 = vrot.slane %v10418_v60, 9  ;;  %v10661_v39 = vld [vmem:[#allocation2 + $0xc8] sm:$0x1] }
 0x3a0   : > { %v4916_v42 = vsel %vm9380_vm7, %v4914_v37, %v4915_v22  ;;  %v4923_v49 = vsel %vm9380_vm7, %v4921_v17, %v4922_v9  ;;  %v4940_v45 = vrot.slane %v10426_v11, 5  ;;  %v7067_v22 = vrot.slane %v10437_v58, 9  ;;  %v10651_v37 = vld [vmem:[#allocation2 + $0xc0] sm:$0xf] }
 0x3a1   : > { %v10614_v30 = vcombine.low %v4913_v50, %v4916_v42  ;;  %v10620_v8 = vcombine.low %v4920_v28, %v4923_v49  ;;  %v4930_v7 = vsel %vm9380_vm7, %v4928_v20, %v4929_v59  ;;  %v10642_v11 = vcombine.low %v4934_v41, %v4937_v55  ;;  %v10653_v28 = vld [vmem:[#allocation2 + $0xc4] sm:$0xf] }
 0x3a2   : > { %v10634_v48 = vcombine.low %v4927_v57, %v4930_v7  ;;  %v4941_v26 = vsel %vm9380_vm7, %v7066_v51, %v4940_v45  ;;  %v4942_v60 = vrot.slane %v4940_v45, 4  ;;  %v4948_v40 = vsel %vm9380_vm7, %v7067_v22, %v4947_v38 }
 0x3a3   : > { %7944 = vmatmul.mubr.msk.bf16.gmra.mrb[20].mxu1 %vm4318_vm11, %v10554_v53  ;;  %v4949_v58 = vrot.slane %v4947_v38, 4  ;;  %v7134_v19 = vrot.slane %v10651_v37, 9  ;;  %v5677_v27 = vrot.slane %v10653_v28, 5  ;;  %v5680_v36 = vrot.slane %v10661_v39, 5 }
 0x3a4   : > { %7947 = vmatprep.mubr.msk.bf16.mxu1 %vm4318_vm11, %v10558_v46  ;;  %v4944_v50 = vsel %vm9380_vm7, %v4942_v60, %v4943_v47  ;;  %v4842_v20 = vrot.slane %v10516_v2, 5  ;;  %v4845_v51 = vrot.slane %v8882_v24, 5  ;;  %v4849_v47 = vrot.slane %v10529_v44, 5  ;;  %v8883_v2 = vld [vmem:[#allocation2 + $0x1c] sm:$0xf] }
 0x3a5   : > { %v10655_v17 = vcombine.low %v4941_v26, %v4944_v50  ;;  %v4951_v9 = vsel %vm9380_vm7, %v4949_v58, %v4950_v14  ;;  %v5678_v59 = vsel %vm9380_vm7, %v7134_v19, %v5677_v27  ;;  %v5679_v49 = vrot.slane %v5677_v27, 4  ;;  %v8884_v26 = vld [vmem:[#allocation2 + $0x14] sm:$0x1]  ;;  %v8886_v44 = vld [vmem:[#allocation2 + $0x28] sm:$0xf] }
 0x3a6   : > { %v10659_v42 = vcombine.low %v4948_v40, %v4951_v9  ;;  %v4844_v41 = vrot.slane %v4842_v20, 4  ;;  %v4843_v45 = vsel %vm9380_vm7, %v7052_v29, %v4842_v20  ;;  %v4856_v22 = vrot.slane %v8883_v2, 5  ;;  %v8885_v40 = vld [vmem:[#allocation2 + $0x20] sm:$0x1]  ;;  %v8887_v19 = vld [vmem:[#allocation2 + $0x18] sm:$0xf] }
 0x3a7   : > { %v5681_v4 = vsel %vm9380_vm7, %v5679_v49, %v5680_v36  ;;  %v4851_v38 = vrot.slane %v4849_v47, 4  ;;  %v4852_v60 = vrot.slane %v8884_v26, 5  ;;  %v4859_v58 = vrot.slane %v8885_v40, 5  ;;  %v347_v24 = vld [vmem:[%s11195_s3 + $0x10] sm:$0xf] }
 0x3a8   : > { %v10674_v57 = vcombine.low %v5678_v59, %v5681_v4  ;;  %v4846_v7 = vsel %vm9380_vm7, %v4844_v41, %v4845_v51  ;;  %v4858_v55 = vrot.slane %v4856_v22, 4  ;;  %v7053_v14 = vrot.slane %v10527_v3, 9  ;;  %v8888_v51 = vld [vmem:[#allocation2 + $0x2c] sm:$0x1] }
 0x3a9   : > { %v7068_v56 = vcombine.low %v4843_v45, %v4846_v7  ;;  %v4853_v50 = vsel %vm9380_vm7, %v4851_v38, %v4852_v60  ;;  %v4863_v9 = vrot.slane %v8886_v44, 5  ;;  %v7054_v27 = vrot.slane %v8887_v19, 9  ;;  %v11349_v45 = vld [vmem:[#allocation15_spill] sm:$0xff]  ;;  %v8890_v38 = vld [vmem:[#allocation2 + $0x30] sm:$0xf]  ;;  %v11350_v19 = vld [vmem:[#allocation21_spill] sm:$0xff] }
 0x3aa   : > { %v4860_v59 = vsel %vm9380_vm7, %v4858_v55, %v4859_v58  ;;  %v4870_v49 = vrot.slane %v10196_v15, 5  ;;  %v4850_v36 = vsel %vm9380_vm7, %v7053_v14, %v4849_v47  ;;  %v5253_v3 = vsel %vm4367_vm10, %v10544_v31, 0  ;;  %v8889_v47 = vld [vmem:[#allocation2 + $0x24] sm:$0xf] }
 0x3ab   : > { %7948 = vmatmul.mubr.msk.bf16.gmra.mrb[24].mxu1 %vm4318_vm11, %v10567_v52  ;;  %v10706_v4 = vcombine.low %v4850_v36, %v4853_v50  ;;  %v4857_v20 = vsel %vm9380_vm7, %v7054_v27, %v4856_v22  ;;  %v4865_v41 = vrot.slane %v4863_v9, 4  ;;  %v4866_v31 = vrot.slane %v8888_v51, 5  ;;  %v11351_v27 = vld [vmem:[#allocation23_spill] sm:$0xff] }
 0x3ac   : > { %7951 = vmatprep.mubr.msk.bf16.mxu1 %vm4318_vm11, %v10571_v12  ;;  %v10712_v29 = vcombine.low %v4857_v20, %v4860_v59  ;;  %v4872_v15 = vrot.slane %v4870_v49, 4  ;;  %v4873_v7 = vrot.slane %v11349_v45, 5  ;;  %v7055_v2 = vrot.slane %v8889_v47, 9  ;;  %v349_v45 = vld [vmem:[%s11195_s3 + $0x18] sm:$0xf]  ;;  %v11354_v47 = vld [vmem:[#allocation17_spill] sm:$0xff] }
 0x3ad   : > { %v4867_v22 = vsel %vm9380_vm7, %v4865_v41, %v4866_v31  ;;  %v7056_v55 = vrot.slane %v8890_v38, 9  ;;  %v4884_v60 = vrot.slane %v10256_v13, 5  ;;  %v4880_v13 = vrot.slane %v11350_v19, 5  ;;  %v11358_v38 = vld [vmem:[#allocation6_spill] sm:$0xff] }
 0x3ae   : > { %v4874_v26 = vsel %vm9380_vm7, %v4872_v15, %v4873_v7  ;;  %v4864_v40 = vsel %vm9380_vm7, %v7055_v2, %v4863_v9  ;;  %v4887_v59 = vrot.slane %v11351_v27, 5  ;;  %v7057_v9 = vrot.slane %v10223_v21, 9  ;;  %v11353_v7 = vld [vmem:[#allocation13_spill] sm:$0xff]  ;;  %v11355_v2 = vld [vmem:[#allocation19_spill] sm:$0xff] }
 0x3af   : > { %v10731_v58 = vcombine.low %v4864_v40, %v4867_v22  ;;  %v4871_v14 = vsel %vm9380_vm7, %v7056_v55, %v4870_v49  ;;  %v7058_v49 = vrot.slane %v10254_v35, 9  ;;  %v5479_v21 = vsel %vm4367_vm10, %v347_v24, 0  ;;  %v348_v35 = vld [vmem:[%s11195_s3 + $0x14] sm:$0xf]  ;;  %v11356_v22 = vld [vmem:[#allocation3_spill] sm:$0xff] }
 0x3b0   : > { %v10735_v50 = vcombine.low %v4871_v14, %v4874_v26  ;;  %v5689_v31 = vsel %vm4367_vm10, %v348_v35, 0  ;;  %v11359_v55 = vld [vmem:[#allocation7_spill] sm:$0xff]  ;;  %v11360_v26 = vld [vmem:[#allocation8_spill] sm:$0xff]  ;;  %v11362_v40 = vld [vmem:[#allocation10_spill] sm:$0xff]  ;;  %v5462_v14 = vshrl.u32 %v10653_v28, 16  ;;  %v5452_v19 = vshll.u32 %v10651_v37, 16 }
 0x3b1   : > { %v4885_v15 = vsel %vm9380_vm7, %v7058_v49, %v4884_v60 }
 0x3b2   : > { %v5464_v27 = vrot.slane %v5462_v14, 4 }
 0x3b3   : > { %7952 = vmatmul.mubr.msk.bf16.gmra.mrb[28].mxu1 %vm4318_vm11, %v10478_v54 }
 0x3b4   : > { %7955 = vmatprep.mubr.msk.bf16.mxu1 %vm4318_vm11, %v10482_v6 }
 0x3bb   : > { %7956 = vmatmul.mubr.msk.bf16.gmra.mrb[0].mxu1 %vm4318_vm11, %v10486_v1 }
 0x3bc   : > { %7959 = vmatprep.mubr.msk.bf16.mxu1 %vm4318_vm11, %v10490_v10 }
 0x3c3   : > { %7960 = vmatmul.mubr.msk.bf16.gmra.mrb[4].mxu1 %vm4318_vm11, %v10494_v25 }
 0x3c4   : > { %7963 = vmatprep.mubr.msk.bf16.mxu1 %vm4318_vm11, %v10502_v16 }
 0x3cb   : > { %7964 = vmatmul.mubr.msk.bf16.gmra.mrb[8].mxu1 %vm4318_vm11, %v10506_v34 }
 0x3cc   : > { %7967 = vmatprep.mubr.msk.bf16.mxu1 %vm4318_vm11, %v10510_v23 }
 0x3d3   : > { %7968 = vmatmul.mubr.msk.bf16.gmra.mrb[12].mxu1 %vm4318_vm11, %v10522_v5 }
 0x3d4   : > { %7973 = vmatprep.mubr.msk.bf16.mxu1 %vm4318_vm11, %v7068_v56  ;;  %v4877_v56 = vrot.slane %v10241_v61, 5  ;;  %v4886_v61 = vrot.slane %v4884_v60, 4  ;;  %v11361_v60 = vld [vmem:[#allocation9_spill] sm:$0xff] }
 0x3d6   : > { %v4879_v44 = vrot.slane %v4877_v56, 4  ;;  %v4878_v20 = vsel %vm9380_vm7, %v7057_v9, %v4877_v56  ;;  %v11357_v56 = vld [vmem:[#allocation5_spill] sm:$0xff] }
 0x3d8   : > { %v4881_v36 = vsel %vm9380_vm7, %v4879_v44, %v4880_v13  ;;  %v5458_v44 = vshll.u32 %v10653_v28, 16 }
 0x3d9   : > { %v10751_v41 = vcombine.low %v4878_v20, %v4881_v36  ;;  %v5454_v36 = vrot.slane %v5452_v19, 5  ;;  %v5468_v20 = vshll.u32 %v10661_v39, 16  ;;  %v5893_v39 = vsel %vm4367_vm10, %v349_v45, 0 }
 0x3da   : > { %v5460_v13 = vrot.slane %v5458_v44, 5 }
 0x3db   : > { %7974 = vmatmul.mubr.msk.bf16.vlgmr.msra.gmra.mrb[16].mxu1 %vm4318_vm11, %v10706_v4 }
 0x3dc   : > { %8006 = vmatpush3.bf16.msra.mxu1 %v5253_v3  ;;  %7977 = vmatprep.mubr.msk.bf16.mxu1 %vm4318_vm11, %v10712_v29  ;;  %v4888_v3 = vsel %vm9380_vm7, %v4886_v61, %v4887_v59  ;;  %v5449_v61 = vshrl.u32 %v10651_v37, 16  ;;  %v11363_v59 = vld [vmem:[#allocation12_spill] sm:$0xff]  ;;  %v5465_v49 = vor.u32 %v5464_v27, %v5460_v13 }
 0x3dd   : > { %8834 = vmatprep.subr.msk.bf16.mxu1 %vm4367_vm10, %v347_v24  ;;  %v10755_v51 = vcombine.low %v4885_v15, %v4888_v3  ;;  %v11352_v24 = vld [vmem:[#allocation11_spill] sm:$0xff] }
 0x3de   : > { %v5451_v9 = vrot.slane %v5449_v61, 4  ;;  %v5466_v15 = vrot.slane %v5465_v49, 4  ;;  %v350_v61 = vld [vmem:[%s11195_s3 + $0x1c] sm:$0xf] }
 0x3e0   : > { %v5455_v3 = vor.u32 %v5454_v36, %v5451_v9 }
 0x3e3   : > { %7978 = vmatmul.mubr.msk.bf16.gmra.mrb[20].mxu1 %vm4318_vm11, %v10731_v58 }
 0x3e4   : > { %7981 = vmatprep.mubr.msk.bf16.mxu1 %vm4318_vm11, %v10735_v50 }
 0x3eb   : > { %7982 = vmatmul.mubr.msk.bf16.gmra.mrb[24].mxu1 %vm4318_vm11, %v10751_v41 }
 0x3ec   : > { %7985 = vmatprep.mubr.msk.bf16.mxu1 %vm4318_vm11, %v10755_v51 }
 0x3f3   : > { %7986 = vmatmul.mubr.msk.bf16.gmra.mrb[28].mxu1 %vm4318_vm11, %v10580_v43 }
 0x3f4   : > { %7989 = vmatprep.mubr.msk.bf16.mxu1 %vm4318_vm11, %v10596_v62 }
 0x3fb   : > { %7990 = vmatmul.mubr.msk.bf16.gmra.mrb[0].mxu1 %vm4318_vm11, %v10604_v0 }
 0x3fc   : > { %7993 = vmatprep.mubr.msk.bf16.mxu1 %vm4318_vm11, %v10614_v30 }
 0x403   : > { %7994 = vmatmul.mubr.msk.bf16.gmra.mrb[4].mxu1 %vm4318_vm11, %v10620_v8 }
 0x404   : > { %7997 = vmatprep.mubr.msk.bf16.mxu1 %vm4318_vm11, %v10634_v48 }
 0x40b   : > { %7998 = vmatmul.mubr.msk.bf16.gmra.mrb[8].mxu1 %vm4318_vm11, %v10642_v11 }
 0x40c   : > { %8001 = vmatprep.mubr.msk.bf16.mxu1 %vm4318_vm11, %v10655_v17 }
 0x413   : > { %8002 = vmatmul.mubr.msk.bf16.gmra.mrb[12].mxu1 %vm4318_vm11, %v10659_v42 }
 0x414   : > { %8007 = vmatprep.mubr.msk.bf16.mxu1 %vm4318_vm11, %v10533_v18  ;;  %v10816_v18 = vcombine.low %v10651_v37, %v10653_v28  ;;  %v11364_v28 = vld [vmem:[#allocation14_spill] sm:$0xff]  ;;  %v5456_v37 = vrot.slane %v5455_v3, 4 }
 0x416   : > { %v5461_v14 = vsel %vm8998_vm3, %v5456_v37, %v5460_v13 }
 0x41b   : > { %8008 = vmatmul.mubr.msk.bf16.vlgmr.msra.gmra.mrb[16].mxu1 %vm4318_vm11, %v10539_v63 }
 0x41c   : > { %8040 = vmatpush3.bf16.msra.mxu1 %v5479_v21  ;;  %8011 = vmatprep.mubr.msk.bf16.mxu1 %vm4318_vm11, %v10554_v53  ;;  %v11365_v21 = vld [vmem:[#allocation16_spill] sm:$0xff] }
 0x41d   : > { %8835 = vmatprep.subr.msk.bf16.mxu1 %vm4367_vm10, %v348_v35  ;;  %v5470_v35 = vrot.slane %v5468_v20, 5  ;;  %v11052_v20 = vld [vmem:[%s11198_s6] ss:$0 sm:$0xff] }
 0x423   : > { %8012 = vmatmul.mubr.msk.bf16.gmra.mrb[20].mxu1 %vm4318_vm11, %v10558_v46 }
 0x424   : > { %8015 = vmatprep.mubr.msk.bf16.mxu1 %vm4318_vm11, %v10567_v52 }
 0x42b   : > { %8016 = vmatmul.mubr.msk.bf16.gmra.mrb[24].mxu1 %vm4318_vm11, %v10571_v12 }
 0x42c   : > { %8019 = vmatprep.mubr.msk.bf16.mxu1 %vm4318_vm11, %v10478_v54 }
 0x433   : > { %8020 = vmatmul.mubr.msk.bf16.gmra.mrb[28].mxu1 %vm4318_vm11, %v10482_v6 }
 0x434   : > { %8023 = vmatprep.mubr.msk.bf16.mxu1 %vm4318_vm11, %v10486_v1 }
 0x43b   : > { %8024 = vmatmul.mubr.msk.bf16.gmra.mrb[0].mxu1 %vm4318_vm11, %v10490_v10 }
 0x43c   : > { %8027 = vmatprep.mubr.msk.bf16.mxu1 %vm4318_vm11, %v10494_v25 }
 0x443   : > { %8028 = vmatmul.mubr.msk.bf16.gmra.mrb[4].mxu1 %vm4318_vm11, %v10502_v16 }
 0x444   : > { %8031 = vmatprep.mubr.msk.bf16.mxu1 %vm4318_vm11, %v10506_v34 }
 0x44b   : > { %8032 = vmatmul.mubr.msk.bf16.gmra.mrb[8].mxu1 %vm4318_vm11, %v10510_v23 }
 0x44c   : > { %8035 = vmatprep.mubr.msk.bf16.mxu1 %vm4318_vm11, %v10522_v5 }
 0x453   : > { %8036 = vmatmul.mubr.msk.bf16.gmra.mrb[12].mxu1 %vm4318_vm11, %v10816_v18 }
 0x454   : > { %8041 = vmatprep.mubr.msk.bf16.mxu1 %vm4318_vm11, %v11352_v24 }
 0x45b   : > { %8042 = vmatmul.mubr.msk.bf16.vlgmr.msra.gmra.mrb[16].mxu1 %vm4318_vm11, %v11353_v7 }
 0x45c   : > { %8074 = vmatpush3.bf16.msra.mxu1 %v5689_v31  ;;  %8045 = vmatprep.mubr.msk.bf16.mxu1 %vm4318_vm11, %v11354_v47  ;;  %v5471_v31 = vsel %vm8998_vm3, %v5466_v15, %v5470_v35 }
 0x45d   : > { %8836 = vmatprep.subr.msk.bf16.mxu1 %vm4367_vm10, %v349_v45  ;;  %v10864_v44 = vcombine.low %v5461_v14, %v5471_v31  ;;  %v351_v45 = vld [vmem:[%s11195_s3 + $0x20] sm:$0xf] }
 0x463   : > { %8046 = vmatmul.mubr.msk.bf16.gmra.mrb[20].mxu1 %vm4318_vm11, %v11355_v2 }
 0x464   : > { %8049 = vmatprep.mubr.msk.bf16.mxu1 %vm4318_vm11, %v11356_v22 }
 0x46b   : > { %8050 = vmatmul.mubr.msk.bf16.gmra.mrb[24].mxu1 %vm4318_vm11, %v11357_v56 }
 0x46c   : > { %8053 = vmatprep.mubr.msk.bf16.mxu1 %vm4318_vm11, %v11358_v38 }
 0x473   : > { %8054 = vmatmul.mubr.msk.bf16.gmra.mrb[28].mxu1 %vm4318_vm11, %v11359_v55 }
 0x474   : > { %8057 = vmatprep.mubr.msk.bf16.mxu1 %vm4318_vm11, %v11360_v26 }
 0x47b   : > { %8058 = vmatmul.mubr.msk.bf16.gmra.mrb[0].mxu1 %vm4318_vm11, %v11361_v60 }
 0x47c   : > { %8061 = vmatprep.mubr.msk.bf16.mxu1 %vm4318_vm11, %v11362_v40 }
 0x483   : > { %8062 = vmatmul.mubr.msk.bf16.gmra.mrb[4].mxu1 %vm4318_vm11, %v11363_v59 }
 0x484   : > { %8065 = vmatprep.mubr.msk.bf16.mxu1 %vm4318_vm11, %v10464_v33 }
 0x48b   : > { %8066 = vmatmul.mubr.msk.bf16.gmra.mrb[8].mxu1 %vm4318_vm11, %v11364_v28 }
 0x48c   : > { %8069 = vmatprep.mubr.msk.bf16.mxu1 %vm4318_vm11, %v11365_v21 }
 0x493   : > { %8070 = vmatmul.mubr.msk.bf16.gmra.mrb[12].mxu1 %vm4318_vm11, %v10864_v44 }
 0x494   : > { %8075 = vmatprep.mubr.msk.bf16.mxu1 %vm4318_vm11, %v10706_v4  ;;  %v6119_v4 = vsel %vm4367_vm10, %v350_v61, 0 }
 0x49b   : > { %8076 = vmatmul.mubr.msk.bf16.vlgmr.msra.gmra.mrb[16].mxu1 %vm4318_vm11, %v10712_v29 }
 0x49c   : > { %8108 = vmatpush3.bf16.msra.mxu1 %v5893_v39  ;;  %8079 = vmatprep.mubr.msk.bf16.mxu1 %vm4318_vm11, %v10731_v58 }
 0x49d   : > { %8837 = vmatprep.subr.msk.bf16.mxu1 %vm4367_vm10, %v350_v61 }
 0x4a3   : > { %8080 = vmatmul.mubr.msk.bf16.gmra.mrb[20].mxu1 %vm4318_vm11, %v10735_v50 }
 0x4a4   : > { %8083 = vmatprep.mubr.msk.bf16.mxu1 %vm4318_vm11, %v10751_v41 }
 0x4ab   : > { %8084 = vmatmul.mubr.msk.bf16.gmra.mrb[24].mxu1 %vm4318_vm11, %v10755_v51 }
 0x4ac   : > { %8087 = vmatprep.mubr.msk.bf16.mxu1 %vm4318_vm11, %v10580_v43 }
 0x4b3   : > { %8088 = vmatmul.mubr.msk.bf16.gmra.mrb[28].mxu1 %vm4318_vm11, %v10596_v62 }
 0x4b4   : > { %8091 = vmatprep.mubr.msk.bf16.mxu1 %vm4318_vm11, %v10604_v0 }
 0x4bb   : > { %8092 = vmatmul.mubr.msk.bf16.gmra.mrb[0].mxu1 %vm4318_vm11, %v10614_v30 }
 0x4bc   : > { %8095 = vmatprep.mubr.msk.bf16.mxu1 %vm4318_vm11, %v10620_v8 }
 0x4c3   : > { %8096 = vmatmul.mubr.msk.bf16.gmra.mrb[4].mxu1 %vm4318_vm11, %v10634_v48 }
 0x4c4   : > { %8099 = vmatprep.mubr.msk.bf16.mxu1 %vm4318_vm11, %v10642_v11 }
 0x4cb   : > { %8100 = vmatmul.mubr.msk.bf16.gmra.mrb[8].mxu1 %vm4318_vm11, %v10655_v17 }
 0x4cc   : > { %8103 = vmatprep.mubr.msk.bf16.mxu1 %vm4318_vm11, %v10659_v42 }
 0x4d3   : > { %8104 = vmatmul.mubr.msk.bf16.gmra.mrb[12].mxu1 %vm4318_vm11, %v10674_v57 }
 0x4d4   : > { %8109 = vmatprep.mubr.msk.bf16.mxu1 %vm4318_vm11, %v10539_v63 }
 0x4db   : > { %8110 = vmatmul.mubr.msk.bf16.vlgmr.msra.gmra.mrb[16].mxu1 %vm4318_vm11, %v10554_v53 }
 0x4dc   : > { %8142 = vmatpush3.bf16.msra.mxu1 %v6119_v4  ;;  %8113 = vmatprep.mubr.msk.bf16.mxu1 %vm4318_vm11, %v10558_v46 }
 0x4dd   : > { %8838 = vmatprep.subr.msk.bf16.mxu1 %vm4367_vm10, %v351_v45 }
 0x4e3   : > { %8114 = vmatmul.mubr.msk.bf16.gmra.mrb[20].mxu1 %vm4318_vm11, %v10567_v52 }
 0x4e4   : > { %8117 = vmatprep.mubr.msk.bf16.mxu1 %vm4318_vm11, %v10571_v12 }
 0x4eb   : > { %8118 = vmatmul.mubr.msk.bf16.gmra.mrb[24].mxu1 %vm4318_vm11, %v10478_v54  ;;  %v10940_v54 = vld [vmem:[#allocation2 + $0xcc] sm:$0xf] }
 0x4ec   : > { %8121 = vmatprep.mubr.msk.bf16.mxu1 %vm4318_vm11, %v10482_v6  ;;  %v10942_v6 = vld [vmem:[#allocation2 + $0xd0] sm:$0xf] }
 0x4ed   : > { %v6102_v63 = vshrl.u32 %v10942_v6, 16  ;;  %v6098_v53 = vshll.u32 %v10942_v6, 16 }
 0x4ef   : > { %v6100_v12 = vrot.slane %v6098_v53, 5 }
 0x4f3   : > { %8122 = vmatmul.mubr.msk.bf16.gmra.mrb[28].mxu1 %vm4318_vm11, %v10486_v1  ;;  %v7152_v1 = vcombine.low %v10940_v54, %v10942_v6 }
 0x4f4   : > { %8125 = vmatprep.mubr.msk.bf16.mxu1 %vm4318_vm11, %v10490_v10  ;;  %v10947_v10 = vpop.f32.mrb[32].mxu0 }
 0x4fb   : > { %8126 = vmatmul.mubr.msk.bf16.gmra.mrb[0].mxu1 %vm4318_vm11, %v10494_v25  ;;  %v10951_v25 = vpop.f32.mrb[33].mxu0 }
 0x4fc   : > { %8129 = vmatprep.mubr.msk.bf16.mxu1 %vm4318_vm11, %v10502_v16  ;;  %v10953_v16 = vpop.f32.mrb[34].mxu0 }
 0x503   : > { %8130 = vmatmul.mubr.msk.bf16.gmra.mrb[4].mxu1 %vm4318_vm11, %v10506_v34  ;;  %v6329_v34 = vsel %vm4367_vm10, %v351_v45, 0 }
 0x504   : > { %8133 = vmatprep.mubr.msk.bf16.mxu1 %vm4318_vm11, %v10510_v23  ;;  %v6089_v23 = vshrl.u32 %v10940_v54, 16 }
 0x506   : > { %v6091_v46 = vrot.slane %v6089_v23, 4 }
 0x50b   : > { %8134 = vmatmul.mubr.msk.bf16.gmra.mrb[8].mxu1 %vm4318_vm11, %v10522_v5  ;;  %v6092_v5 = vshll.u32 %v10940_v54, 16 }
 0x50c   : > { %8137 = vmatprep.mubr.msk.bf16.mxu1 %vm4318_vm11, %v10816_v18  ;;  %v6104_v18 = vrot.slane %v6102_v63, 4 }
 0x50d   : > { %v6094_v52 = vrot.slane %v6092_v5, 5 }
 0x513   : > { %8138 = vmatmul.mubr.msk.bf16.gmra.mrb[12].mxu1 %vm4318_vm11, %v7152_v1 }
 0x514   : > { %8143 = vmatprep.mubr.msk.bf16.mxu1 %vm4318_vm11, %v11353_v7  ;;  %v3885_v7 = vld [vmem:[#allocation2 + $0xd4] sm:$0x1] }
 0x51b   : > { %8144 = vmatmul.mubr.msk.bf16.vlgmr.msra.gmra.mrb[16].mxu1 %vm4318_vm11, %v11354_v47  ;;  %v6095_v47 = vor.u32 %v6094_v52, %v6091_v46 }
 0x51c   : > { %8176 = vmatpush3.bf16.msra.mxu1 %v6329_v34  ;;  %8147 = vmatprep.mubr.msk.bf16.mxu1 %vm4318_vm11, %v11355_v2  ;;  %v6105_v2 = vor.u32 %v6104_v18, %v6100_v12 }
 0x523   : > { %8148 = vmatmul.mubr.msk.bf16.gmra.mrb[20].mxu1 %vm4318_vm11, %v11356_v22  ;;  %v6108_v22 = vshll.u32 %v3885_v7, 16 }
 0x524   : > { %8151 = vmatprep.mubr.msk.bf16.mxu1 %vm4318_vm11, %v11357_v56  ;;  %v6096_v56 = vrot.slane %v6095_v47, 4 }
 0x52b   : > { %8152 = vmatmul.mubr.msk.bf16.gmra.mrb[24].mxu1 %vm4318_vm11, %v11358_v38  ;;  %v6106_v38 = vrot.slane %v6105_v2, 4 }
 0x52c   : > { %8155 = vmatprep.mubr.msk.bf16.mxu1 %vm4318_vm11, %v11359_v55  ;;  %v6110_v55 = vrot.slane %v6108_v22, 5 }
 0x533   : > { %8156 = vmatmul.mubr.msk.bf16.gmra.mrb[28].mxu1 %vm4318_vm11, %v11360_v26  ;;  %v6101_v26 = vsel %vm8998_vm3, %v6096_v56, %v6100_v12 }
 0x534   : > { %8159 = vmatprep.mubr.msk.bf16.mxu1 %vm4318_vm11, %v11361_v60 }
 0x53b   : > { %8160 = vmatmul.mubr.msk.bf16.gmra.mrb[0].mxu1 %vm4318_vm11, %v11362_v40 }
 0x53c   : > { %8163 = vmatprep.mubr.msk.bf16.mxu1 %vm4318_vm11, %v11363_v59  ;;  %v11041_v59 = vld [vmem:[%s11197_s5] ss:$0 sm:$0xff] }
 0x53d   : > { %v3121_v9 = vadd.f32 %v10947_v10, %v11041_v59  ;;  %v3113_v36 = vadd.f32 %v11041_v59, %v10951_v25  ;;  %v3124_v49 = vadd.f32 %v10953_v16, %v11041_v59 }
 0x543   : > { %8164 = vmatmul.mubr.msk.bf16.gmra.mrb[4].mxu1 %vm4318_vm11, %v10464_v33  ;;  %v6111_v33 = vsel %vm8998_vm3, %v6106_v38, %v6110_v55 }
 0x544   : > { %8167 = vmatprep.mubr.msk.bf16.mxu1 %vm4318_vm11, %v11364_v28  ;;  %v7169_v60 = vcombine.low %v6101_v26, %v6111_v33 }
 0x54b   : > { %8168 = vmatmul.mubr.msk.bf16.gmra.mrb[8].mxu1 %vm4318_vm11, %v11365_v21 }
 0x54c   : > { %8171 = vmatprep.mubr.msk.bf16.mxu1 %vm4318_vm11, %v10864_v44 }
 0x553   : > { %8172 = vmatmul.mubr.msk.bf16.gmra.mrb[12].mxu1 %vm4318_vm11, %v7169_v60 }
 0x554   : > { %8177 = vmatprep.mubr.msk.bf16.mxu1 %vm4318_vm11, %v10712_v29  ;;  %v6320_v29 = vrot.slane %v3885_v7, 5 }
 0x55b   : > { %8178 = vmatmul.mubr.msk.bf16.vlgmr.msra.gmra.mrb[16].mxu1 %vm4318_vm11, %v10731_v58 }
 0x55c   : > { %8181 = vmatprep.mubr.msk.bf16.mxu1 %vm4318_vm11, %v10735_v50 }
 0x563   : > { %8182 = vmatmul.mubr.msk.bf16.gmra.mrb[20].mxu1 %vm4318_vm11, %v10751_v41 }
 0x564   : > { %8185 = vmatprep.mubr.msk.bf16.mxu1 %vm4318_vm11, %v10755_v51 }
 0x56b   : > { %8186 = vmatmul.mubr.msk.bf16.gmra.mrb[24].mxu1 %vm4318_vm11, %v10580_v43  ;;  %v6317_v43 = vrot.slane %v10942_v6, 5 }
 0x56c   : > { %8189 = vmatprep.mubr.msk.bf16.mxu1 %vm4318_vm11, %v10596_v62  ;;  %v7186_v62 = vrot.slane %v10940_v54, 9 }
 0x573   : > { %8190 = vmatmul.mubr.msk.bf16.gmra.mrb[28].mxu1 %vm4318_vm11, %v10604_v0  ;;  %v6319_v0 = vrot.slane %v6317_v43, 4 }
 0x574   : > { %8193 = vmatprep.mubr.msk.bf16.mxu1 %vm4318_vm11, %v10614_v30  ;;  %v6318_v30 = vsel %vm9380_vm7, %v7186_v62, %v6317_v43 }
 0x57b   : > { %8194 = vmatmul.mubr.msk.bf16.gmra.mrb[0].mxu1 %vm4318_vm11, %v10620_v8  ;;  %v6321_v8 = vsel %vm9380_vm7, %v6319_v0, %v6320_v29 }
 0x57c   : > { %8197 = vmatprep.mubr.msk.bf16.mxu1 %vm4318_vm11, %v10634_v48  ;;  %v7187_v48 = vcombine.low %v6318_v30, %v6321_v8 }
 0x583   : > { %8198 = vmatmul.mubr.msk.bf16.gmra.mrb[4].mxu1 %vm4318_vm11, %v10642_v11  ;;  %v3115_v11 = vpop.f32.mrb[35].mxu0 }
 0x584   : > { %8201 = vmatprep.mubr.msk.bf16.mxu1 %vm4318_vm11, %v10655_v17  ;;  %v7877_v17 = vpop.f32.mrb[36].mxu0  ;;  %v3116_v15 = vadd.f32 %v11041_v59, %v3115_v11 }
 0x585   : > { %v3128_v58 = vpop.f32.mrb[37].mxu0  ;;  %v3137_v45 = vadd.f32 %v7877_v17, %v11041_v59 }
 0x586   : > { %v7878_v50 = vpop.f32.mrb[38].mxu0  ;;  %v3129_v1 = vadd.f32 %v11041_v59, %v3128_v58 }
 0x587   : > { %v3131_v41 = vpop.f32.mrb[39].mxu0  ;;  %v3140_v25 = vadd.f32 %v7878_v50, %v11041_v59 }
 0x588   : > { %v7881_v51 = vpop.f32.mrb[40].mxu0  ;;  %v3132_v23 = vadd.f32 %v11041_v59, %v3131_v41 }
 0x589   : > { %v3153_v56 = vadd.f32 %v7881_v51, %v11041_v59 }
 0x58b   : > { %8202 = vmatmul.mubr.msk.bf16.gmra.mrb[8].mxu1 %vm4318_vm11, %v10659_v42  ;;  %v3144_v42 = vpop.f32.mrb[41].mxu0 }
 0x58c   : > { %8205 = vmatprep.mubr.msk.bf16.mxu1 %vm4318_vm11, %v10674_v57  ;;  %v7882_v40 = vpop.f32.mrb[42].mxu0  ;;  %v3145_v26 = vadd.f32 %v11041_v59, %v3144_v42 }
 0x58d   : > { %v3147_v19 = vpop.f32.mrb[43].mxu0  ;;  %v3156_v60 = vadd.f32 %v7882_v40, %v11041_v59 }
 0x58e   : > { %v11030_v57 = vpop.f32.mrb[44].mxu0  ;;  %v3148_v0 = vadd.f32 %v11041_v59, %v3147_v19 }
 0x58f   : > { %v11032_v13 = vpop.f32.mrb[45].mxu0  ;;  %v3169_v40 = vadd.f32 %v11030_v57, %v11041_v59 }
 0x590   : > { %v11034_v27 = vpop.f32.mrb[46].mxu0 }
 0x591   : > { %v11036_v32 = vpop.f32.mrb[47].mxu0 }
 0x593   : > { %8206 = vmatmul.mubr.msk.bf16.gmra.mrb[12].mxu1 %vm4318_vm11, %v7187_v48 }
 0x62e   : > { %v8179_v3 = vpop.f32.mrb[16].mxu1 }
 0x62f   : > { %v8212_v28 = vadd.f32 %v8179_v3, %v3121_v9  ;;  %v6365_v21 = vpop.f32.mrb[17].mxu1  ;;  %v3172_v3 = vadd.f32 %v11034_v27, %v11041_v59 }
 0x630   : > { %v8215_v37 = vadd.f32 %v6365_v21, %v3113_v36  ;;  %v8180_v35 = vpop.f32.mrb[18].mxu1  ;;  %v3161_v36 = vadd.f32 %v11041_v59, %v11032_v13  ;;  %v3164_v21 = vadd.f32 %v11041_v59, %v11036_v32 }
 0x631   : > { %v8213_v24 = vadd.f32 %v8212_v28, %v11052_v20  ;;  %v8218_v31 = vadd.f32 %v8180_v35, %v3124_v49  ;;  %v6368_v14 = vpop.f32.mrb[19].mxu1 }
 0x632   : > { %v8216_v44 = vadd.f32 %v8215_v37, %v11052_v20  ;;  %v8221_v39 = vadd.f32 %v6368_v14, %v3116_v15 }
 0x633   : > { %v6597_v61 = vmax.f32 %v8213_v24, 0.0  ;;  %v8219_v4 = vadd.f32 %v8218_v31, %v11052_v20 }
 0x634   : > { %v6595_v54 = vmax.f32 %v8216_v44, 0.0  ;;  %v8222_v6 = vadd.f32 %v8221_v39, %v11052_v20 }
 0x635   : > { %6629 = vst.msk [vmem:[%s11060_s12 + $0x10] sm:$0xff] %vm4318_vm11, %v6597_v61  ;;  %v6598_v10 = vmax.f32 %v8219_v4, 0.0 }
 0x636   : > { %6627 = vst.msk [vmem:[%s11060_s12] sm:$0xff] %vm4318_vm11, %v6595_v54  ;;  %v6596_v16 = vmax.f32 %v8222_v6, 0.0  ;;  %v8183_v34 = vpop.f32.mrb[20].mxu1 }
 0x637   : > { %6630 = vst.msk [vmem:[%s11060_s12 + $0x18] sm:$0xff] %vm4318_vm11, %v6598_v10  ;;  %v8224_v5 = vadd.f32 %v8183_v34, %v3137_v45  ;;  %v6381_v63 = vpop.f32.mrb[21].mxu1 }
 0x638   : > { %6628 = vst.msk [vmem:[%s11060_s12 + $0x8] sm:$0xff] %vm4318_vm11, %v6596_v16  ;;  %v8227_v53 = vadd.f32 %v6381_v63, %v3129_v1  ;;  %v8184_v46 = vpop.f32.mrb[22].mxu1 }
 0x639   : > { %v8225_v52 = vadd.f32 %v8224_v5, %v11052_v20  ;;  %v8230_v12 = vadd.f32 %v8184_v46, %v3140_v25  ;;  %v6384_v18 = vpop.f32.mrb[23].mxu1 }
 0x63a   : > { %v8228_v7 = vadd.f32 %v8227_v53, %v11052_v20  ;;  %v8233_v47 = vadd.f32 %v6384_v18, %v3132_v23 }
 0x63b   : > { %v6601_v2 = vmax.f32 %v8225_v52, 0.0  ;;  %v8231_v22 = vadd.f32 %v8230_v12, %v11052_v20 }
 0x63c   : > { %v6599_v38 = vmax.f32 %v8228_v7, 0.0  ;;  %v8234_v55 = vadd.f32 %v8233_v47, %v11052_v20 }
 0x63d   : > { %6633 = vst.msk [vmem:[%s11060_s12 + $0x30] sm:$0xff] %vm4318_vm11, %v6601_v2  ;;  %v6602_v33 = vmax.f32 %v8231_v22, 0.0 }
 0x63e   : > { %6631 = vst.msk [vmem:[%s11060_s12 + $0x20] sm:$0xff] %vm4318_vm11, %v6599_v38  ;;  %v6600_v43 = vmax.f32 %v8234_v55, 0.0  ;;  %v8187_v62 = vpop.f32.mrb[24].mxu1 }
 0x63f   : > { %6634 = vst.msk [vmem:[%s11060_s12 + $0x38] sm:$0xff] %vm4318_vm11, %v6602_v33  ;;  %v8236_v29 = vadd.f32 %v8187_v62, %v3153_v56  ;;  %v6397_v30 = vpop.f32.mrb[25].mxu1 }
 0x640   : > { %6632 = vst.msk [vmem:[%s11060_s12 + $0x28] sm:$0xff] %vm4318_vm11, %v6600_v43  ;;  %v8239_v8 = vadd.f32 %v6397_v30, %v3145_v26  ;;  %v8188_v48 = vpop.f32.mrb[26].mxu1 }
 0x641   : > { %v8237_v11 = vadd.f32 %v8236_v29, %v11052_v20  ;;  %v8242_v17 = vadd.f32 %v8188_v48, %v3156_v60  ;;  %v6400_v58 = vpop.f32.mrb[27].mxu1 }
 0x642   : > { %v8240_v50 = vadd.f32 %v8239_v8, %v11052_v20  ;;  %v8245_v41 = vadd.f32 %v6400_v58, %v3148_v0 }
 0x643   : > { %v6605_v51 = vmax.f32 %v8237_v11, 0.0  ;;  %v8243_v42 = vadd.f32 %v8242_v17, %v11052_v20 }
 0x644   : > { %v6603_v19 = vmax.f32 %v8240_v50, 0.0  ;;  %v8246_v9 = vadd.f32 %v8245_v41, %v11052_v20 }
 0x645   : > { %6637 = vst.msk [vmem:[%s11060_s12 + $0x50] sm:$0xff] %vm4318_vm11, %v6605_v51  ;;  %v6606_v49 = vmax.f32 %v8243_v42, 0.0 }
 0x646   : > { %6635 = vst.msk [vmem:[%s11060_s12 + $0x40] sm:$0xff] %vm4318_vm11, %v6603_v19  ;;  %v6604_v15 = vmax.f32 %v8246_v9, 0.0  ;;  %v8191_v28 = vpop.f32.mrb[28].mxu1 }
 0x647   : > { %6638 = vst.msk [vmem:[%s11060_s12 + $0x58] sm:$0xff] %vm4318_vm11, %v6606_v49  ;;  %v8248_v57 = vadd.f32 %v8191_v28, %v3169_v40  ;;  %v6413_v37 = vpop.f32.mrb[29].mxu1 }
 0x648   : > { %6636 = vst.msk [vmem:[%s11060_s12 + $0x48] sm:$0xff] %vm4318_vm11, %v6604_v15  ;;  %v8251_v13 = vadd.f32 %v6413_v37, %v3161_v36  ;;  %v8192_v35 = vpop.f32.mrb[30].mxu1 }
 0x649   : > { %v8249_v27 = vadd.f32 %v8248_v57, %v11052_v20  ;;  %v8254_v24 = vadd.f32 %v8192_v35, %v3172_v3  ;;  %v6416_v31 = vpop.f32.mrb[31].mxu1 }
 0x64a   : > { %v8252_v14 = vadd.f32 %v8251_v13, %v11052_v20  ;;  %v8257_v44 = vadd.f32 %v6416_v31, %v3164_v21 }
 0x64b   : > { %v6609_v32 = vmax.f32 %v8249_v27, 0.0  ;;  %v8255_v39 = vadd.f32 %v8254_v24, %v11052_v20 }
 0x64c   : > { %v6607_v61 = vmax.f32 %v8252_v14, 0.0  ;;  %v8258_v4 = vadd.f32 %v8257_v44, %v11052_v20 }
 0x64d   : > { %6641 = vst.msk [vmem:[%s11060_s12 + $0x70] sm:$0xff] %vm4318_vm11, %v6609_v32  ;;  %v6610_v45 = vmax.f32 %v8255_v39, 0.0 }
 0x64e   : > { %6639 = vst.msk [vmem:[%s11060_s12 + $0x60] sm:$0xff] %vm4318_vm11, %v6607_v61  ;;  %v6608_v54 = vmax.f32 %v8258_v4, 0.0  ;;  %v8195_v6 = vpop.f32.mrb[0].mxu1 }
 0x64f   : > { %6642 = vst.msk [vmem:[%s11060_s12 + $0x78] sm:$0xff] %vm4318_vm11, %v6610_v45  ;;  %v8259_v1 = vadd.f32 %v8195_v6, %v11041_v59  ;;  %v6429_v10 = vpop.f32.mrb[1].mxu1 }
 0x650   : > { %6640 = vst.msk [vmem:[%s11060_s12 + $0x68] sm:$0xff] %vm4318_vm11, %v6608_v54  ;;  %v8261_v25 = vadd.f32 %v11041_v59, %v6429_v10  ;;  %v8196_v16 = vpop.f32.mrb[2].mxu1 }
 0x651   : > { %v8260_v34 = vadd.f32 %v8259_v1, %v11052_v20  ;;  %v8263_v23 = vadd.f32 %v8196_v16, %v11041_v59  ;;  %v6432_v5 = vpop.f32.mrb[3].mxu1 }
 0x652   : > { %v8262_v63 = vadd.f32 %v8261_v25, %v11052_v20  ;;  %v8265_v53 = vadd.f32 %v11041_v59, %v6432_v5 }
 0x653   : > { %v6613_v46 = vmax.f32 %v8260_v34, 0.0  ;;  %v8264_v52 = vadd.f32 %v8263_v23, %v11052_v20 }
 0x654   : > { %v6611_v12 = vmax.f32 %v8262_v63, 0.0  ;;  %v8266_v18 = vadd.f32 %v8265_v53, %v11052_v20 }
 0x655   : > { %6645 = vst.msk [vmem:[%s11060_s12 + $0x90] sm:$0xff] %vm4318_vm11, %v6613_v46  ;;  %v6614_v7 = vmax.f32 %v8264_v52, 0.0 }
 0x656   : > { %6643 = vst.msk [vmem:[%s11060_s12 + $0x80] sm:$0xff] %vm4318_vm11, %v6611_v12  ;;  %v6612_v47 = vmax.f32 %v8266_v18, 0.0  ;;  %v8199_v2 = vpop.f32.mrb[4].mxu1 }
 0x657   : > { %6646 = vst.msk [vmem:[%s11060_s12 + $0x98] sm:$0xff] %vm4318_vm11, %v6614_v7  ;;  %v8267_v22 = vadd.f32 %v8199_v2, %v11041_v59  ;;  %v6445_v56 = vpop.f32.mrb[5].mxu1 }
 0x658   : > { %6644 = vst.msk [vmem:[%s11060_s12 + $0x88] sm:$0xff] %vm4318_vm11, %v6612_v47  ;;  %v8269_v38 = vadd.f32 %v11041_v59, %v6445_v56  ;;  %v8200_v55 = vpop.f32.mrb[6].mxu1 }
 0x659   : > { %v8268_v26 = vadd.f32 %v8267_v22, %v11052_v20  ;;  %v8271_v33 = vadd.f32 %v8200_v55, %v11041_v59  ;;  %v6448_v60 = vpop.f32.mrb[7].mxu1 }
 0x65a   : > { %v8270_v43 = vadd.f32 %v8269_v38, %v11052_v20  ;;  %v8273_v62 = vadd.f32 %v11041_v59, %v6448_v60 }
 0x65b   : > { %v6617_v0 = vmax.f32 %v8268_v26, 0.0  ;;  %v8272_v29 = vadd.f32 %v8271_v33, %v11052_v20 }
 0x65c   : > { %v6615_v30 = vmax.f32 %v8270_v43, 0.0  ;;  %v8274_v8 = vadd.f32 %v8273_v62, %v11052_v20 }
 0x65d   : > { %6649 = vst.msk [vmem:[%s11060_s12 + $0xb0] sm:$0xff] %vm4318_vm11, %v6617_v0  ;;  %v6618_v48 = vmax.f32 %v8272_v29, 0.0 }
 0x65e   : > { %6647 = vst.msk [vmem:[%s11060_s12 + $0xa0] sm:$0xff] %vm4318_vm11, %v6615_v30  ;;  %v6616_v11 = vmax.f32 %v8274_v8, 0.0  ;;  %v8203_v17 = vpop.f32.mrb[8].mxu1 }
 0x65f   : > { %6650 = vst.msk [vmem:[%s11060_s12 + $0xb8] sm:$0xff] %vm4318_vm11, %v6618_v48  ;;  %v8275_v58 = vadd.f32 %v8203_v17, %v11041_v59  ;;  %v6461_v50 = vpop.f32.mrb[9].mxu1 }
 0x660   : > { %6648 = vst.msk [vmem:[%s11060_s12 + $0xa8] sm:$0xff] %vm4318_vm11, %v6616_v11  ;;  %v8277_v41 = vadd.f32 %v11041_v59, %v6461_v50  ;;  %v8204_v51 = vpop.f32.mrb[10].mxu1 }
 0x661   : > { %v8276_v42 = vadd.f32 %v8275_v58, %v11052_v20  ;;  %v8279_v40 = vadd.f32 %v8204_v51, %v11041_v59  ;;  %v6464_v19 = vpop.f32.mrb[11].mxu1 }
 0x662   : > { %v8278_v9 = vadd.f32 %v8277_v41, %v11052_v20  ;;  %v8281_v36 = vadd.f32 %v11041_v59, %v6464_v19 }
 0x663   : > { %v6621_v49 = vmax.f32 %v8276_v42, 0.0  ;;  %v8280_v3 = vadd.f32 %v8279_v40, %v11052_v20 }
 0x664   : > { %v6619_v15 = vmax.f32 %v8278_v9, 0.0  ;;  %v8282_v28 = vadd.f32 %v8281_v36, %v11052_v20 }
 0x665   : > { %6653 = vst.msk [vmem:[%s11060_s12 + $0xd0] sm:$0xff] %vm4318_vm11, %v6621_v49  ;;  %v6622_v21 = vmax.f32 %v8280_v3, 0.0 }
 0x666   : > { %6651 = vst.msk [vmem:[%s11060_s12 + $0xc0] sm:$0xff] %vm4318_vm11, %v6619_v15  ;;  %v6620_v57 = vmax.f32 %v8282_v28, 0.0  ;;  %v8207_v37 = vpop.f32.mrb[12].mxu1 }
 0x667   : > { %6654 = vst.msk [vmem:[%s11060_s12 + $0xd8] sm:$0xff] %vm4318_vm11, %v6622_v21  ;;  %v8283_v13 = vadd.f32 %v8207_v37, %v11041_v59  ;;  %v6477_v35 = vpop.f32.mrb[13].mxu1 }
 0x668   : > { %6652 = vst.msk [vmem:[%s11060_s12 + $0xc8] sm:$0xff] %vm4318_vm11, %v6620_v57  ;;  %v8285_v27 = vadd.f32 %v11041_v59, %v6477_v35  ;;  %v8208_v24 = vpop.f32.mrb[14].mxu1 }
 0x669   : > { %v8284_v31 = vadd.f32 %v8283_v13, %v11052_v20  ;;  %v8287_v14 = vadd.f32 %v8208_v24, %v11041_v59  ;;  %v6480_v44 = vpop.f32.mrb[15].mxu1 }
 0x66a   : > { %v8286_v32 = vadd.f32 %v8285_v27, %v11052_v20  ;;  %v8289_v39 = vadd.f32 %v11041_v59, %v6480_v44 }
 0x66b   : > { %v6625_v61 = vmax.f32 %v8284_v31, 0.0  ;;  %v8288_v4 = vadd.f32 %v8287_v14, %v11052_v20 }
 0x66c   : > { %v6623_v45 = vmax.f32 %v8286_v32, 0.0  ;;  %v8290_v54 = vadd.f32 %v8289_v39, %v11052_v20 }
 0x66d   : > { %6657 = vst.msk [vmem:[%s11060_s12 + $0xf0] sm:$0xff] %vm4318_vm11, %v6625_v61  ;;  %v6626_v6 = vmax.f32 %v8288_v4, 0.0 }
 0x66e   : > { %6655 = vst.msk [vmem:[%s11060_s12 + $0xe0] sm:$0xff] %vm4318_vm11, %v6623_v45  ;;  %v6624_v1 = vmax.f32 %v8290_v54, 0.0 }
 0x66f   : > { %6658 = vst.msk [vmem:[%s11060_s12 + $0xf8] sm:$0xff] %vm4318_vm11, %v6626_v6 }
 0x670   : > { %6656 = vst.msk [vmem:[%s11060_s12 + $0xe8] sm:$0xff] %vm4318_vm11, %v6624_v1 }
 0x671 PF: > { %s17_s24 = sadd.s32 1, %s8897_s24  }
 0x672   : > { %p14_p4 = scmp.ge.s32.totalorder %s17_s24, 4  }
 0x674   :  { %16 = sbr.rel (!%p14_p4) target bundleno = 1 (0x1), region = 79 }

</bundles_post_ra>
